<compile_context>
chip_gen: v6e
topology: v6e:2x2x1
jax: 0.10.0
libtpu: 0.0.40
codegen_flags: <defaults>
</compile_context>

<pallas_src>
import numpy as np
import jax
import jax.numpy as jnp
from jax import lax
from jax.experimental import pallas as pl
from jax.experimental.pallas import tpu as pltpu

H_IMG, W_IMG = 7, 5                 # spatial size implied by conv_fc (128*7*5)
P_VALID = H_IMG * W_IMG             # 35 valid positions per frame
FRAME = 64                          # zero-padded 9x7 frame (63) + 1 pad lane
DELTAS = tuple((dy - 1) * 7 + (dx - 1) for dy in range(3) for dx in range(3))


def _elu(v):
    return jnp.where(v > 0, v, jnp.exp(jnp.minimum(v, 0.0)) - 1.0)


def _sigmoid(v):
    return 1.0 / (1.0 + jnp.exp(-v))


# ------------------------------- kernels ----------------------------------- #

def conv_kernel(cat1_ref, mask_ref, vsel_ref,
                w1_ref, b1_ref, w2_ref, b2_ref, w3_ref, b3_ref, o_ref):
    """conv_module: 3 x (Conv2d(3x3, pad=1) + ELU) for nSeg frames."""
    BF = cat1_ref.shape[1]                       # nSeg * FRAME
    nseg = o_ref.shape[0]
    mask = mask_ref[...]                         # (1, BF): 1.0 at interior lanes

    # layer 1 (1 -> 32): im2col rows precomputed in the wrapper.
    h = _elu((jnp.dot(w1_ref[...], cat1_ref[...],
                      preferred_element_type=jnp.float32)
              + b1_ref[...]) * mask)             # (32, BF)

    # layers 2 (32 -> 64) and 3 (64 -> 128): a single im2col matmul each.
    for w_ref, b_ref in ((w2_ref, b2_ref), (w3_ref, b3_ref)):
        hh = jnp.concatenate([h, h], axis=1)     # wrapped copy for tap shifts
        cat = jnp.concatenate(
            [hh[:, (d % BF):(d % BF) + BF] for d in DELTAS], axis=0)
        h = _elu((jnp.dot(w_ref[...], cat,
                          preferred_element_type=jnp.float32)
                  + b_ref[...]) * mask)          # (Cout, BF)

    # gather the 35 valid spatial positions per frame (hoisted selector).
    vsel = vsel_ref[...]                         # (FRAME, 35)
    for s in range(nseg):
        o_ref[s] = jnp.dot(h[:, s * FRAME:(s + 1) * FRAME], vsel,
                           preferred_element_type=jnp.float32)   # (128, 35)


def head_kernel(x_ref, wfc_ref, bfc_ref,
                wih1_ref, whh1_ref, bl1_ref,
                wih2_ref, whh2_ref, bl2_ref,
                wr_ref, br_ref, wo_ref, bo_ref, o_ref):
    """conv_fc + 2-layer LSTM + rnn_fc + readout for one sequence."""
    feats = x_ref[0]                             # (nSeg, 4480)
    nseg = feats.shape[0]
    hd = whh1_ref.shape[0]                       # LSTM hidden size (64)

    # conv_fc: bf16 operands, f32 accumulation.  Dropout is identity (eval).
    h = jnp.dot(feats.astype(jnp.bfloat16), wfc_ref[...],
                preferred_element_type=jnp.float32) + bfc_ref[...]
    h = _elu(h)                                  # (nSeg, 1024)

    def lstm_cell(gates, whh_ref, hs, cs):
        g = gates + jnp.dot(hs, whh_ref[...],
                            preferred_element_type=jnp.float32)
        ig = _sigmoid(g[:, 0:hd])
        fg = _sigmoid(g[:, hd:2 * hd])
        cg = jnp.tanh(g[:, 2 * hd:3 * hd])
        og = _sigmoid(g[:, 3 * hd:4 * hd])
        cs = fg * cs + ig * cg
        hs = og * jnp.tanh(cs)
        return hs, cs

    # layer-1 input projection batched over all time steps (one MXU matmul).
    gx1 = (jnp.dot(h, wih1_ref[...], preferred_element_type=jnp.float32)
           + bl1_ref[...])                       # (nSeg, 256)

    h1 = jnp.zeros((1, hd), jnp.float32)
    c1 = jnp.zeros((1, hd), jnp.float32)
    h2 = jnp.zeros((1, hd), jnp.float32)
    c2 = jnp.zeros((1, hd), jnp.float32)
    # TODO(synk): LSTM inter-layer Dropout is a no-op at inference (eval mode).
    for t in range(nseg):                        # nSeg is small & static
        onehot = (lax.broadcasted_iota(jnp.int32, (1, nseg), 1) == t
                  ).astype(jnp.float32)
        g1 = jnp.dot(onehot, gx1, preferred_element_type=jnp.float32)
        h1, c1 = lstm_cell(g1, whh1_ref, h1, c1)
        g2 = (jnp.dot(h1, wih2_ref[...], preferred_element_type=jnp.float32)
              + bl2_ref[...])
        h2, c2 = lstm_cell(g2, whh2_ref, h2, c2)

    # rnn_fc + ELU (Dropout identity) + readout.
    r = _elu(jnp.dot(h2, wr_ref[...], preferred_element_type=jnp.float32)
             + br_ref[...])                      # (1, 1024)
    o_ref[0] = (jnp.dot(r, wo_ref[...], preferred_element_type=jnp.float32)
                + bo_ref[...])                   # (1, num_classes)


# ------------------------------- wrapper ------------------------------------ #

def _const_spec(a):
    nd = a.ndim
    return pl.BlockSpec(a.shape, lambda g, nd=nd: (0,) * nd)


def pallas_forward(x, P, nSeg):
    B = x.shape[0]
    assert B % nSeg == 0
    n_seq = B // nSeg
    BF = nSeg * FRAME
    num_class = P['Wo'].shape[0]

    # ---- hoisted constants & weight packing (done once) ----
    img = jnp.pad(x[:, 0], ((0, 0), (1, 1), (1, 1)))             # (B, 9, 7)
    frame = jnp.pad(img.reshape(B, 63), ((0, 0), (0, 1)))        # (B, 64)
    fp = jnp.pad(frame, ((0, 0), (8, 8)))                        # (B, 80)
    cat1 = jnp.stack([fp[:, 8 + d:8 + d + FRAME].reshape(B * FRAME)
                      for d in DELTAS], axis=0)                  # (9, B*FRAME)

    rr = np.arange(FRAME)
    ri, rj = rr // 7, rr % 7
    interior = ((rr < 63) & (ri >= 1) & (ri <= H_IMG)
                & (rj >= 1) & (rj <= W_IMG)).astype(np.float32)
    mask = jnp.asarray(np.tile(interior, nSeg))[None, :]         # (1, BF)

    vsel_np = np.zeros((FRAME, P_VALID), np.float32)
    for i in range(H_IMG):
        for j in range(W_IMG):
            vsel_np[(i + 1) * 7 + (j + 1), i * W_IMG + j] = 1.0
    vsel = jnp.asarray(vsel_np)                                  # (64, 35)

    def conv_w(w):      # torch (Cout, Cin, 3, 3) -> (Cout, 9*Cin), col=t*Cin+cin
        co, ci = w.shape[0], w.shape[1]
        return jnp.transpose(w, (0, 2, 3, 1)).reshape(co, 9 * ci)

    w1, b1 = conv_w(P['Wc1']), P['bc1'][:, None]
    w2, b2 = conv_w(P['Wc2']), P['bc2'][:, None]
    w3, b3 = conv_w(P['Wc3']), P['bc3'][:, None]

    conv_in = [cat1, mask, vsel, w1, b1, w2, b2, w3, b3]
    conv_specs = ([pl.BlockSpec((9, BF), lambda g: (0, g))]
                  + [_const_spec(a) for a in conv_in[1:]])
    feats = pl.pallas_call(
        conv_kernel,
        out_shape=jax.ShapeDtypeStruct((B, 128, P_VALID), jnp.float32),
        grid_spec=pltpu.PrefetchScalarGridSpec(
            num_scalar_prefetch=0,
            grid=(n_seq,),
            in_specs=conv_specs,
            out_specs=pl.BlockSpec((nSeg, 128, P_VALID),
                                   lambda g: (g, 0, 0))),
        compiler_params=pltpu.CompilerParams(
            dimension_semantics=("parallel",)),
    )(*conv_in)

    # PyTorch flatten order is (c, i, j) == the (128, 35) row-major layout.
    feats = feats.reshape(n_seq, nSeg, 128 * P_VALID)

    wfc = P['Wfc'].T.astype(jnp.bfloat16)                        # (4480, 1024)
    bfc = P['bfc'][None, :]
    wih1, whh1 = P['Wih0'].T, P['Whh0'].T                        # (1024,256),(64,256)
    bl1 = (P['bih0'] + P['bhh0'])[None, :]
    wih2, whh2 = P['Wih1'].T, P['Whh1'].T
    bl2 = (P['bih1'] + P['bhh1'])[None, :]
    wr, br = P['Wr'].T, P['br'][None, :]
    wo, bo = P['Wo'].T, P['bo'][None, :]

    head_in = [feats, wfc, bfc, wih1, whh1, bl1, wih2, whh2, bl2,
               wr, br, wo, bo]
    head_specs = ([pl.BlockSpec((1, nSeg, feats.shape[-1]),
                                lambda g: (g, 0, 0))]
                  + [_const_spec(a) for a in head_in[1:]])
    out = pl.pallas_call(
        head_kernel,
        out_shape=jax.ShapeDtypeStruct((n_seq, 1, num_class), jnp.float32),
        grid_spec=pltpu.PrefetchScalarGridSpec(
            num_scalar_prefetch=0,
            grid=(n_seq,),
            in_specs=head_specs,
            out_specs=pl.BlockSpec((1, 1, num_class), lambda g: (g, 0, 0))),
        compiler_params=pltpu.CompilerParams(
            dimension_semantics=("parallel",),
            vmem_limit_bytes=48 * 1024 * 1024),
    )(*head_in)
    return out.reshape(n_seq, num_class)


# --------------------------- pure-JAX reference ----------------------------- #

def ref_forward(x, P, nSeg):
    dn = ('NCHW', 'OIHW', 'NCHW')

    def conv(h, w, b):
        y = lax.conv_general_dilated(h, w, (1, 1), ((1, 1), (1, 1)),
                                     dimension_numbers=dn)
        return y + b[None, :, None, None]

    h = x
    for l in (1, 2, 3):
        h = jax.nn.elu(conv(h, P[f'Wc{l}'], P[f'bc{l}']))
    h = h.reshape(h.shape[0], -1)
    h = jax.nn.elu(h @ P['Wfc'].T + P['bfc'])
    h = h.reshape(-1, nSeg, h.shape[-1])

    def lstm(seq, Wih, Whh, bih, bhh):
        Bq, T, _ = seq.shape
        Hd = Whh.shape[1]
        hs = jnp.zeros((Bq, Hd)); cs = jnp.zeros((Bq, Hd))
        outs = []
        for t in range(T):
            g = seq[:, t] @ Wih.T + hs @ Whh.T + bih + bhh
            i, f, gg, o = jnp.split(g, 4, axis=-1)
            cs = jax.nn.sigmoid(f) * cs + jax.nn.sigmoid(i) * jnp.tanh(gg)
            hs = jax.nn.sigmoid(o) * jnp.tanh(cs)
            outs.append(hs)
        return jnp.stack(outs, axis=1)

    s = lstm(h, P['Wih0'], P['Whh0'], P['bih0'], P['bhh0'])
    s = lstm(s, P['Wih1'], P['Whh1'], P['bih1'], P['bhh1'])
    out = s[:, -1]
    out = jax.nn.elu(out @ P['Wr'].T + P['br'])
    return out @ P['Wo'].T + P['bo']


# -------------------------------- params ------------------------------------ #

def init_params(key, num_classes=2):
    ks = iter(jax.random.split(key, 24))

    def n(shape, fan_in):
        return jax.random.normal(next(ks), shape, jnp.float32) / np.sqrt(fan_in)

    def b(shape):
        return 0.05 * jax.random.normal(next(ks), shape, jnp.float32)

    P = {}
    P['Wc1'], P['bc1'] = n((32, 1, 3, 3), 9), b((32,))
    P['Wc2'], P['bc2'] = n((64, 32, 3, 3), 9 * 32), b((64,))
    P['Wc3'], P['bc3'] = n((128, 64, 3, 3), 9 * 64), b((128,))
    P['Wfc'], P['bfc'] = n((1024, 128 * H_IMG * W_IMG), 128 * P_VALID), b((1024,))
    P['Wih0'], P['Whh0'] = n((256, 1024), 1024), n((256, 64), 64)
    P['bih0'], P['bhh0'] = b((256,)), b((256,))
    P['Wih1'], P['Whh1'] = n((256, 64), 64), n((256, 64), 64)
    P['bih1'], P['bhh1'] = b((256,)), b((256,))
    P['Wr'], P['br'] = n((1024, 64), 64), b((1024,))
    P['Wo'], P['bo'] = n((num_classes, 1024), 1024), b((num_classes,))
    return P


# --------------------------------- main -------------------------------------- #

if __name__ == "__main__":
    nSeg, num_classes = 4, 2
    B = 2 * nSeg                      # two sequences of nSeg frames each
    key = jax.random.PRNGKey(0)
    kx, kp = jax.random.split(key)
    x = jax.random.normal(kx, (B, 1, H_IMG, W_IMG), jnp.float32)
    P = init_params(kp, num_classes)

    out = pallas_forward(x, P, nSeg)
    out = jax.block_until_ready(out)
    assert out.shape == (B // nSeg, num_classes), out.shape

    ref = ref_forward(x, P, nSeg)
    rel = float(jnp.max(jnp.abs(out - ref)) / (jnp.max(jnp.abs(ref)) + 1e-6))
    assert rel < 2e-2, f"mismatch vs reference: rel err {rel}"
    print("KERNEL_OK")
</pallas_src>

<mosaic_0001>
module attributes {stable_mosaic.version = 11 : i64} {
  func.func @conv_kernel(%arg0: i32, %arg1: memref<9x256xf32, #tpu.memory_space<vmem>>, %arg2: memref<1x256xf32, #tpu.memory_space<vmem>>, %arg3: memref<64x35xf32, #tpu.memory_space<vmem>>, %arg4: memref<32x9xf32, #tpu.memory_space<vmem>>, %arg5: memref<32x1xf32, #tpu.memory_space<vmem>>, %arg6: memref<64x288xf32, #tpu.memory_space<vmem>>, %arg7: memref<64x1xf32, #tpu.memory_space<vmem>>, %arg8: memref<128x576xf32, #tpu.memory_space<vmem>>, %arg9: memref<128x1xf32, #tpu.memory_space<vmem>>, %arg10: memref<4x128x35xf32, #tpu.memory_space<vmem>>) attributes {dimension_semantics = [#tpu.dimension_semantics<parallel>], iteration_bounds = array<i64: 2>, scalar_prefetch = 0 : i64, scratch_operands = 0 : i64, tpu.core_type = #tpu.core_type<tc>, window_params = [{transform_indices = @transform_0, window_bounds = array<i64: 9, 256>}, {pipeline_mode = #tpu.pipeline_mode<synchronous>, transform_indices = @transform_1, window_bounds = array<i64: 1, 256>}, {pipeline_mode = #tpu.pipeline_mode<synchronous>, transform_indices = @transform_2, window_bounds = array<i64: 64, 35>}, {pipeline_mode = #tpu.pipeline_mode<synchronous>, transform_indices = @transform_3, window_bounds = array<i64: 32, 9>}, {pipeline_mode = #tpu.pipeline_mode<synchronous>, transform_indices = @transform_4, window_bounds = array<i64: 32, 1>}, {pipeline_mode = #tpu.pipeline_mode<synchronous>, transform_indices = @transform_5, window_bounds = array<i64: 64, 288>}, {pipeline_mode = #tpu.pipeline_mode<synchronous>, transform_indices = @transform_6, window_bounds = array<i64: 64, 1>}, {pipeline_mode = #tpu.pipeline_mode<synchronous>, transform_indices = @transform_7, window_bounds = array<i64: 128, 576>}, {pipeline_mode = #tpu.pipeline_mode<synchronous>, transform_indices = @transform_8, window_bounds = array<i64: 128, 1>}, {transform_indices = @transform_9, window_bounds = array<i64: 4, 128, 35>}]} {
    %c0 = arith.constant 0 : index
    %c0_0 = arith.constant 0 : index
    %0 = vector.load %arg2[%c0, %c0_0] : memref<1x256xf32, #tpu.memory_space<vmem>>, vector<1x256xf32>
    %c0_1 = arith.constant 0 : index
    %c0_2 = arith.constant 0 : index
    %1 = vector.load %arg4[%c0_1, %c0_2] : memref<32x9xf32, #tpu.memory_space<vmem>>, vector<32x9xf32>
    %c0_3 = arith.constant 0 : index
    %c0_4 = arith.constant 0 : index
    %2 = vector.load %arg1[%c0_3, %c0_4] : memref<9x256xf32, #tpu.memory_space<vmem>>, vector<9x256xf32>
    %cst = arith.constant dense<0.000000e+00> : vector<32x256xf32>
    %3 = tpu.matmul %1, %2, %cst {dimension_numbers = #tpu.dot_dimension_numbers<[1], [0], [0], [1], [0, 0, 1, 1], [], []>} : vector<32x9xf32>, vector<9x256xf32>, vector<32x256xf32> -> vector<32x256xf32>
    %c0_5 = arith.constant 0 : index
    %c0_6 = arith.constant 0 : index
    %4 = vector.load %arg5[%c0_5, %c0_6] : memref<32x1xf32, #tpu.memory_space<vmem>>, vector<32x1xf32>
    %5 = vector.broadcast %4 : vector<32x1xf32> to vector<32x256xf32>
    %6 = arith.addf %3, %5 : vector<32x256xf32>
    %7 = vector.broadcast %0 : vector<1x256xf32> to vector<32x256xf32>
    %8 = arith.mulf %6, %7 : vector<32x256xf32>
    %cst_7 = arith.constant 0.000000e+00 : f32
    %9 = vector.broadcast %cst_7 : f32 to vector<32x256xf32>
    %10 = arith.cmpf ogt, %8, %9 : vector<32x256xf32>
    %cst_8 = arith.constant 0.000000e+00 : f32
    %11 = vector.broadcast %cst_8 : f32 to vector<32x256xf32>
    %12 = arith.minimumf %8, %11 : vector<32x256xf32>
    %13 = math.exp %12 : vector<32x256xf32>
    %cst_9 = arith.constant 1.000000e+00 : f32
    %14 = vector.broadcast %cst_9 : f32 to vector<32x256xf32>
    %15 = arith.subf %13, %14 : vector<32x256xf32>
    %16 = arith.select %10, %8, %15 : vector<32x256xi1>, vector<32x256xf32>
    %17 = tpu.concatenate %16, %16 in 1 : vector<32x256xf32>, vector<32x256xf32> -> vector<32x512xf32>
    %18 = vector.extract_strided_slice %17 {offsets = [0, 248], sizes = [32, 256], strides = [1, 1]} : vector<32x512xf32> to vector<32x256xf32>
    %19 = vector.extract_strided_slice %17 {offsets = [0, 249], sizes = [32, 256], strides = [1, 1]} : vector<32x512xf32> to vector<32x256xf32>
    %20 = vector.extract_strided_slice %17 {offsets = [0, 250], sizes = [32, 256], strides = [1, 1]} : vector<32x512xf32> to vector<32x256xf32>
    %21 = vector.extract_strided_slice %17 {offsets = [0, 255], sizes = [32, 256], strides = [1, 1]} : vector<32x512xf32> to vector<32x256xf32>
    %22 = vector.extract_strided_slice %17 {offsets = [0, 0], sizes = [32, 256], strides = [1, 1]} : vector<32x512xf32> to vector<32x256xf32>
    %23 = vector.extract_strided_slice %17 {offsets = [0, 1], sizes = [32, 256], strides = [1, 1]} : vector<32x512xf32> to vector<32x256xf32>
    %24 = vector.extract_strided_slice %17 {offsets = [0, 6], sizes = [32, 256], strides = [1, 1]} : vector<32x512xf32> to vector<32x256xf32>
    %25 = vector.extract_strided_slice %17 {offsets = [0, 7], sizes = [32, 256], strides = [1, 1]} : vector<32x512xf32> to vector<32x256xf32>
    %26 = vector.extract_strided_slice %17 {offsets = [0, 8], sizes = [32, 256], strides = [1, 1]} : vector<32x512xf32> to vector<32x256xf32>
    %27 = tpu.concatenate %18, %19, %20, %21, %22, %23, %24, %25, %26 in 0 : vector<32x256xf32>, vector<32x256xf32>, vector<32x256xf32>, vector<32x256xf32>, vector<32x256xf32>, vector<32x256xf32>, vector<32x256xf32>, vector<32x256xf32>, vector<32x256xf32> -> vector<288x256xf32>
    %c0_10 = arith.constant 0 : index
    %c0_11 = arith.constant 0 : index
    %28 = vector.load %arg6[%c0_10, %c0_11] : memref<64x288xf32, #tpu.memory_space<vmem>>, vector<64x288xf32>
    %cst_12 = arith.constant dense<0.000000e+00> : vector<64x256xf32>
    %29 = tpu.matmul %28, %27, %cst_12 {dimension_numbers = #tpu.dot_dimension_numbers<[1], [0], [0], [1], [0, 0, 1, 1], [], []>} : vector<64x288xf32>, vector<288x256xf32>, vector<64x256xf32> -> vector<64x256xf32>
    %c0_13 = arith.constant 0 : index
    %c0_14 = arith.constant 0 : index
    %30 = vector.load %arg7[%c0_13, %c0_14] : memref<64x1xf32, #tpu.memory_space<vmem>>, vector<64x1xf32>
    %31 = vector.broadcast %30 : vector<64x1xf32> to vector<64x256xf32>
    %32 = arith.addf %29, %31 : vector<64x256xf32>
    %33 = vector.broadcast %0 : vector<1x256xf32> to vector<64x256xf32>
    %34 = arith.mulf %32, %33 : vector<64x256xf32>
    %cst_15 = arith.constant 0.000000e+00 : f32
    %35 = vector.broadcast %cst_15 : f32 to vector<64x256xf32>
    %36 = arith.cmpf ogt, %34, %35 : vector<64x256xf32>
    %cst_16 = arith.constant 0.000000e+00 : f32
    %37 = vector.broadcast %cst_16 : f32 to vector<64x256xf32>
    %38 = arith.minimumf %34, %37 : vector<64x256xf32>
    %39 = math.exp %38 : vector<64x256xf32>
    %cst_17 = arith.constant 1.000000e+00 : f32
    %40 = vector.broadcast %cst_17 : f32 to vector<64x256xf32>
    %41 = arith.subf %39, %40 : vector<64x256xf32>
    %42 = arith.select %36, %34, %41 : vector<64x256xi1>, vector<64x256xf32>
    %43 = tpu.concatenate %42, %42 in 1 : vector<64x256xf32>, vector<64x256xf32> -> vector<64x512xf32>
    %44 = vector.extract_strided_slice %43 {offsets = [0, 248], sizes = [64, 256], strides = [1, 1]} : vector<64x512xf32> to vector<64x256xf32>
    %45 = vector.extract_strided_slice %43 {offsets = [0, 249], sizes = [64, 256], strides = [1, 1]} : vector<64x512xf32> to vector<64x256xf32>
    %46 = vector.extract_strided_slice %43 {offsets = [0, 250], sizes = [64, 256], strides = [1, 1]} : vector<64x512xf32> to vector<64x256xf32>
    %47 = vector.extract_strided_slice %43 {offsets = [0, 255], sizes = [64, 256], strides = [1, 1]} : vector<64x512xf32> to vector<64x256xf32>
    %48 = vector.extract_strided_slice %43 {offsets = [0, 0], sizes = [64, 256], strides = [1, 1]} : vector<64x512xf32> to vector<64x256xf32>
    %49 = vector.extract_strided_slice %43 {offsets = [0, 1], sizes = [64, 256], strides = [1, 1]} : vector<64x512xf32> to vector<64x256xf32>
    %50 = vector.extract_strided_slice %43 {offsets = [0, 6], sizes = [64, 256], strides = [1, 1]} : vector<64x512xf32> to vector<64x256xf32>
    %51 = vector.extract_strided_slice %43 {offsets = [0, 7], sizes = [64, 256], strides = [1, 1]} : vector<64x512xf32> to vector<64x256xf32>
    %52 = vector.extract_strided_slice %43 {offsets = [0, 8], sizes = [64, 256], strides = [1, 1]} : vector<64x512xf32> to vector<64x256xf32>
    %53 = tpu.concatenate %44, %45, %46, %47, %48, %49, %50, %51, %52 in 0 : vector<64x256xf32>, vector<64x256xf32>, vector<64x256xf32>, vector<64x256xf32>, vector<64x256xf32>, vector<64x256xf32>, vector<64x256xf32>, vector<64x256xf32>, vector<64x256xf32> -> vector<576x256xf32>
    %c0_18 = arith.constant 0 : index
    %c0_19 = arith.constant 0 : index
    %54 = vector.load %arg8[%c0_18, %c0_19] : memref<128x576xf32, #tpu.memory_space<vmem>>, vector<128x576xf32>
    %cst_20 = arith.constant dense<0.000000e+00> : vector<128x256xf32>
    %55 = tpu.matmul %54, %53, %cst_20 {dimension_numbers = #tpu.dot_dimension_numbers<[1], [0], [0], [1], [0, 0, 1, 1], [], []>} : vector<128x576xf32>, vector<576x256xf32>, vector<128x256xf32> -> vector<128x256xf32>
    %c0_21 = arith.constant 0 : index
    %c0_22 = arith.constant 0 : index
    %56 = vector.load %arg9[%c0_21, %c0_22] : memref<128x1xf32, #tpu.memory_space<vmem>>, vector<128x1xf32>
    %57 = vector.broadcast %56 : vector<128x1xf32> to vector<128x256xf32>
    %58 = arith.addf %55, %57 : vector<128x256xf32>
    %59 = vector.broadcast %0 : vector<1x256xf32> to vector<128x256xf32>
    %60 = arith.mulf %58, %59 : vector<128x256xf32>
    %cst_23 = arith.constant 0.000000e+00 : f32
    %61 = vector.broadcast %cst_23 : f32 to vector<128x256xf32>
    %62 = arith.cmpf ogt, %60, %61 : vector<128x256xf32>
    %cst_24 = arith.constant 0.000000e+00 : f32
    %63 = vector.broadcast %cst_24 : f32 to vector<128x256xf32>
    %64 = arith.minimumf %60, %63 : vector<128x256xf32>
    %65 = math.exp %64 : vector<128x256xf32>
    %cst_25 = arith.constant 1.000000e+00 : f32
    %66 = vector.broadcast %cst_25 : f32 to vector<128x256xf32>
    %67 = arith.subf %65, %66 : vector<128x256xf32>
    %68 = arith.select %62, %60, %67 : vector<128x256xi1>, vector<128x256xf32>
    %c0_26 = arith.constant 0 : index
    %c0_27 = arith.constant 0 : index
    %69 = vector.load %arg3[%c0_26, %c0_27] : memref<64x35xf32, #tpu.memory_space<vmem>>, vector<64x35xf32>
    %70 = vector.extract_strided_slice %68 {offsets = [0, 0], sizes = [128, 64], strides = [1, 1]} : vector<128x256xf32> to vector<128x64xf32>
    %cst_28 = arith.constant dense<0.000000e+00> : vector<128x35xf32>
    %71 = tpu.matmul %70, %69, %cst_28 {dimension_numbers = #tpu.dot_dimension_numbers<[1], [0], [0], [1], [0, 0, 1, 1], [], []>} : vector<128x64xf32>, vector<64x35xf32>, vector<128x35xf32> -> vector<128x35xf32>
    %c0_29 = arith.constant 0 : index
    %c0_30 = arith.constant 0 : index
    %c0_31 = arith.constant 0 : index
    %72 = vector.load %arg10[%c0_29, %c0_30, %c0_31] : memref<4x128x35xf32, #tpu.memory_space<vmem>>, vector<1x128x35xf32>
    %73 = vector.shape_cast %72 : vector<1x128x35xf32> to vector<128x35xf32>
    %74 = vector.shape_cast %71 : vector<128x35xf32> to vector<1x128x35xf32>
    tpu.vector_store %arg10[%c0_29, %c0_30, %c0_31], %74 {strides = array<i32>} : memref<4x128x35xf32, #tpu.memory_space<vmem>>, vector<1x128x35xf32>,
    %75 = vector.extract_strided_slice %68 {offsets = [0, 64], sizes = [128, 64], strides = [1, 1]} : vector<128x256xf32> to vector<128x64xf32>
    %cst_32 = arith.constant dense<0.000000e+00> : vector<128x35xf32>
    %76 = tpu.matmul %75, %69, %cst_32 {dimension_numbers = #tpu.dot_dimension_numbers<[1], [0], [0], [1], [0, 0, 1, 1], [], []>} : vector<128x64xf32>, vector<64x35xf32>, vector<128x35xf32> -> vector<128x35xf32>
    %c1 = arith.constant 1 : index
    %c0_33 = arith.constant 0 : index
    %c0_34 = arith.constant 0 : index
    %77 = vector.load %arg10[%c1, %c0_33, %c0_34] : memref<4x128x35xf32, #tpu.memory_space<vmem>>, vector<1x128x35xf32>
    %78 = vector.shape_cast %77 : vector<1x128x35xf32> to vector<128x35xf32>
    %79 = vector.shape_cast %76 : vector<128x35xf32> to vector<1x128x35xf32>
    tpu.vector_store %arg10[%c1, %c0_33, %c0_34], %79 {strides = array<i32>} : memref<4x128x35xf32, #tpu.memory_space<vmem>>, vector<1x128x35xf32>,
    %80 = vector.extract_strided_slice %68 {offsets = [0, 128], sizes = [128, 64], strides = [1, 1]} : vector<128x256xf32> to vector<128x64xf32>
    %cst_35 = arith.constant dense<0.000000e+00> : vector<128x35xf32>
    %81 = tpu.matmul %80, %69, %cst_35 {dimension_numbers = #tpu.dot_dimension_numbers<[1], [0], [0], [1], [0, 0, 1, 1], [], []>} : vector<128x64xf32>, vector<64x35xf32>, vector<128x35xf32> -> vector<128x35xf32>
    %c2 = arith.constant 2 : index
    %c0_36 = arith.constant 0 : index
    %c0_37 = arith.constant 0 : index
    %82 = vector.load %arg10[%c2, %c0_36, %c0_37] : memref<4x128x35xf32, #tpu.memory_space<vmem>>, vector<1x128x35xf32>
    %83 = vector.shape_cast %82 : vector<1x128x35xf32> to vector<128x35xf32>
    %84 = vector.shape_cast %81 : vector<128x35xf32> to vector<1x128x35xf32>
    tpu.vector_store %arg10[%c2, %c0_36, %c0_37], %84 {strides = array<i32>} : memref<4x128x35xf32, #tpu.memory_space<vmem>>, vector<1x128x35xf32>,
    %85 = vector.extract_strided_slice %68 {offsets = [0, 192], sizes = [128, 64], strides = [1, 1]} : vector<128x256xf32> to vector<128x64xf32>
    %cst_38 = arith.constant dense<0.000000e+00> : vector<128x35xf32>
    %86 = tpu.matmul %85, %69, %cst_38 {dimension_numbers = #tpu.dot_dimension_numbers<[1], [0], [0], [1], [0, 0, 1, 1], [], []>} : vector<128x64xf32>, vector<64x35xf32>, vector<128x35xf32> -> vector<128x35xf32>
    %c3 = arith.constant 3 : index
    %c0_39 = arith.constant 0 : index
    %c0_40 = arith.constant 0 : index
    %87 = vector.load %arg10[%c3, %c0_39, %c0_40] : memref<4x128x35xf32, #tpu.memory_space<vmem>>, vector<1x128x35xf32>
    %88 = vector.shape_cast %87 : vector<1x128x35xf32> to vector<128x35xf32>
    %89 = vector.shape_cast %86 : vector<128x35xf32> to vector<1x128x35xf32>
    tpu.vector_store %arg10[%c3, %c0_39, %c0_40], %89 {strides = array<i32>} : memref<4x128x35xf32, #tpu.memory_space<vmem>>, vector<1x128x35xf32>,
    return
  }
  func.func @transform_0(%arg0: i32) -> (i32, i32) {
    %c0_i32 = arith.constant 0 : i32
    %c0_i32_0 = arith.constant 0 : i32
    return %c0_i32, %arg0 : i32, i32
  }
  func.func @transform_1(%arg0: i32) -> (i32, i32) {
    %c0_i32 = arith.constant 0 : i32
    %c0_i32_0 = arith.constant 0 : i32
    %c0_i32_1 = arith.constant 0 : i32
    return %c0_i32, %c0_i32_0 : i32, i32
  }
  func.func @transform_2(%arg0: i32) -> (i32, i32) {
    %c0_i32 = arith.constant 0 : i32
    %c0_i32_0 = arith.constant 0 : i32
    %c0_i32_1 = arith.constant 0 : i32
    return %c0_i32, %c0_i32_0 : i32, i32
  }
  func.func @transform_3(%arg0: i32) -> (i32, i32) {
    %c0_i32 = arith.constant 0 : i32
    %c0_i32_0 = arith.constant 0 : i32
    %c0_i32_1 = arith.constant 0 : i32
    return %c0_i32, %c0_i32_0 : i32, i32
  }
  func.func @transform_4(%arg0: i32) -> (i32, i32) {
    %c0_i32 = arith.constant 0 : i32
    %c0_i32_0 = arith.constant 0 : i32
    %c0_i32_1 = arith.constant 0 : i32
    return %c0_i32, %c0_i32_0 : i32, i32
  }
  func.func @transform_5(%arg0: i32) -> (i32, i32) {
    %c0_i32 = arith.constant 0 : i32
    %c0_i32_0 = arith.constant 0 : i32
    %c0_i32_1 = arith.constant 0 : i32
    return %c0_i32, %c0_i32_0 : i32, i32
  }
  func.func @transform_6(%arg0: i32) -> (i32, i32) {
    %c0_i32 = arith.constant 0 : i32
    %c0_i32_0 = arith.constant 0 : i32
    %c0_i32_1 = arith.constant 0 : i32
    return %c0_i32, %c0_i32_0 : i32, i32
  }
  func.func @transform_7(%arg0: i32) -> (i32, i32) {
    %c0_i32 = arith.constant 0 : i32
    %c0_i32_0 = arith.constant 0 : i32
    %c0_i32_1 = arith.constant 0 : i32
    return %c0_i32, %c0_i32_0 : i32, i32
  }
  func.func @transform_8(%arg0: i32) -> (i32, i32) {
    %c0_i32 = arith.constant 0 : i32
    %c0_i32_0 = arith.constant 0 : i32
    %c0_i32_1 = arith.constant 0 : i32
    return %c0_i32, %c0_i32_0 : i32, i32
  }
  func.func @transform_9(%arg0: i32) -> (i32, i32, i32) {
    %c0_i32 = arith.constant 0 : i32
    %c0_i32_0 = arith.constant 0 : i32
    %c0_i32_1 = arith.constant 0 : i32
    return %arg0, %c0_i32, %c0_i32_0 : i32, i32, i32
  }
}

</mosaic_0001>

<bundles_post_ra>
// kernel: tpu_custom_call.1
= control target key start
LH: loop header
LB: loop body
LE: loop exit
PB: predicated region body
PF: predicated region fallthrough
CT: control target
= control target key end

     0   :  { %s5250_s30 = smov 0   ;;  %s5252_s10 = smov 0   ;;  %s9203_s0 = inlined_call_operand.vmem [shape: f32[9,512], index: 0, kind: input, shape index: {}]   ;;  %s9204_s1 = inlined_call_operand.vmem [shape: f32[1,256], index: 1, kind: input, shape index: {}]   ;;  %s9205_s2 = inlined_call_operand.vmem [shape: f32[64,35], index: 2, kind: input, shape index: {}]   ;;  %s9206_s3 = inlined_call_operand.vmem [shape: f32[32,9], index: 3, kind: input, shape index: {}]   ;;  %s9207_s4 = inlined_call_operand.vmem [shape: f32[32,1], index: 4, kind: input, shape index: {}]   ;;  %s9208_s5 = inlined_call_operand.vmem [shape: f32[64,288], index: 5, kind: input, shape index: {}]   ;;  %s9209_s6 = inlined_call_operand.vmem [shape: f32[64,1], index: 6, kind: input, shape index: {}]   ;;  %s9210_s7 = inlined_call_operand.vmem [shape: f32[128,576], index: 7, kind: input, shape index: {}]   ;;  %s9211_s8 = inlined_call_operand.vmem [shape: f32[128,1], index: 8, kind: input, shape index: {}]   ;;  %s9212_s9 = inlined_call_operand.vmem [shape: f32[8,128,35], index: 9, kind: output, shape index: {}]  }
   0x1   :  { %s5254_s11 = smov 0  }
   0x2 LB: > { %s5267_s13 = sadd.s32 1, %s5186_s11   ;;  %s26_s15 = sadd.s32 1, %s5182_s10  ;;  %s5186_s11 = sphi %s5254_s11, %s9678_s11   ;;  %s5182_s10 = sphi %s5252_s10, %s9677_s10   ;;  %s5178_s30 = sphi %s5250_s30, %s9676_s30  }
   0x3   : > { %s23_s14 = ssub.s32 %s5186_s11, %s5267_s13  ;;  %p33_p1 = scmp.ne.s32.totalorder %s5182_s10, %s5178_s30 }
   0x4   : > { %p24_p0 = scmp.eq.s32.totalorder %s23_s14, 0  ;;  %p34_p2 = scmp.eq.s32.totalorder %s5186_s11, 0 }
   0x5   : > { %p4539_p4 = scmp.ge.s32.totalorder %s5186_s11, 2 }
   0x6   : > { %s5276_s16 = scalar_select %p24_p0, %s5182_s10, %s26_s15  }
   0x7   : > { %p35_p3 = por %p34_p2, %p33_p1  ;;  %277 = sbr.rel (%p4539_p4) target bundleno = 18 (0x12), region = 48 }
   0xc   : > { %280 = sbr.rel (!%p35_p3) target bundleno = 18 (0x12), region = 52  ;;  %s282_s17 = sand.u32 (%p35_p3), 1, %s5182_s10  }
   0xd   : > { %s4748_s18 = sshll.u32 (%p35_p3), %s5186_s11, 4  ;;  %s4540_s19 = sshll.u32 (%p35_p3), %s282_s17, 5 }
   0xe   : > { %s287_s22 = scalar_lea.vmem (%p35_p3), %s9203_s0, %s4748_s18  ;;  %s284_s23 = scalar_lea.vmem (%p35_p3), [#allocation2], %s4540_s19 }
   0xf   : > { %v300_v0 = vld [vmem:[%s287_s22] sm:$0xff] (%p35_p3)  ;;  %v302_v1 = vld [vmem:[%s287_s22 + $0x8] sm:$0xff] (%p35_p3) }
  0x10   : > { %v304_v2 = vld [vmem:[%s287_s22 + $0x20] sm:$0xff] (%p35_p3)  ;;  %301 = vst [vmem:[%s284_s23] sm:$0xff] (%p35_p3), %v300_v0  ;;  %303 = vst [vmem:[%s284_s23 + $0x8] sm:$0xff] (%p35_p3), %v302_v1  ;;  %v306_v3 = vld [vmem:[%s287_s22 + $0x28] sm:$0xff] (%p35_p3) }
  0x11   : > { %305 = vst [vmem:[%s284_s23 + $0x10] sm:$0xff] %v304_v2  ;;  %307 = vst [vmem:[%s284_s23 + $0x18] sm:$0xff] %v306_v3 }
  0x12 PF: > { %p4543_p5 = scmp.ge.s32.totalorder %s5186_s11, 1  ;;  %p312_p6 = scmp.lt.s32.totalorder %s5186_s11, 3 }
  0x14   : > { %p313_p7 = pnand %p4543_p5, %p312_p6 }
  0x16   : > { %316 = sbr.rel (%p313_p7) target bundleno = 2368 (0x940), region = 75 }
  0x1b   : > { %s319_s24 = sand.u32 1, %s5178_s30   ;;  %vm409_vm0 = vcmask 1040384   ;;  %v9213_v4 = vmov 0.0   ;;  %v373_v5 = vld [vmem:[%s9207_s4 + $0x8] sm:$0xff]  ;;  %v5189_v6 = vmov 0   ;;  %v372_v11 = vld [vmem:[%s9207_s4] sm:$0xff]  ;;  %v506_v26 = vlaneseq }
  0x1c   : > { %s4544_s25 = sshll.u32 %s319_s24, 5  ;;  %480 = vmatprep.mubr.f32.mxu1 %v9213_v4  ;;  %1403 = vmatprep.mubr.f32.mxu0 %v9213_v4  ;;  %v364_v12 = vld [vmem:[%s9206_s3] sm:$0xff]  ;;  %vm396_vm1 = vcmask 72704   ;;  %v375_v13 = vld [vmem:[%s9207_s4 + $0x18] sm:$0xff]  ;;  %v374_v14 = vld [vmem:[%s9207_s4 + $0x10] sm:$0xff]  ;;  %s5190_s29 = smov 113  }
  0x1d   : > { %5043 = vset.pattern.permute.xlu1 %v5189_v6  ;;  %5042 = vset.pattern.permute.xlu0 %v5189_v6  ;;  %s321_s28 = scalar_lea.vmem [#allocation2], %s4544_s25  ;;  %v806_v15 = vld [vmem:[%s9209_s6 + $0x30] sm:$0xff]  ;;  %v365_v16 = vld [vmem:[%s9206_s3 + $0x8] sm:$0xff]  ;;  %v807_v17 = vld [vmem:[%s9209_s6 + $0x38] sm:$0xff]  ;;  %v507_v27 = vshrl.u32 %v506_v26, 7  ;;  %s5191_s30 = smov 121  }
  0x1e   : > { %v371_v7 = vld [vmem:[%s321_s28 + $0x18] sm:$0x1]  ;;  %v370_v8 = vld [vmem:[%s321_s28 + $0x10] sm:$0x1]  ;;  %v369_v9 = vld [vmem:[%s321_s28 + $0x8] sm:$0xff]  ;;  %383 = vperm.xlu1 %5043, %v373_v5   ;;  %393 = vperm.xlu0 %5042, %v375_v13   ;;  %s9239_s14 = smov 114  }
  0x1f   : > { %4548 = vmatprep.subr.msk.mxu1 %vm409_vm0, %v371_v7  ;;  %v368_v10 = vld [vmem:[%s321_s28] sm:$0xff]  ;;  %v366_v19 = vld [vmem:[%s9206_s3 + $0x10] sm:$0xff]  ;;  %v805_v20 = vld [vmem:[%s9209_s6 + $0x28] sm:$0xff]  ;;  %v508_v29 = vsub.s32 0, %v507_v27  ;;  %v512_v35 = vsub.s32 1, %v507_v27  ;;  %s5193_s15 = smov 126  }
  0x20   : > { %4549 = vmatpush1.msk.msra.mxu1 %vm409_vm0, %v370_v8  ;;  %v804_v18 = vld [vmem:[%s9209_s6 + $0x20] sm:$0xff]  ;;  %v802_v21 = vld [vmem:[%s9209_s6 + $0x10] sm:$0xff]  ;;  %v367_v22 = vld [vmem:[%s9206_s3 + $0x18] sm:$0xff]  ;;  %s5194_s17 = smov 119   ;;  %s5195_s18 = smov 127   ;;  %vm742_vm10 = vcmask 924672  }
  0x21   : > { %446 = vmatprep.subr.mxu1 %v369_v9  ;;  %v803_v23 = vld [vmem:[%s9209_s6 + $0x18] sm:$0xff]  ;;  %v800_v24 = vld [vmem:[%s9209_s6] sm:$0xff]  ;;  %v801_v25 = vld [vmem:[%s9209_s6 + $0x8] sm:$0xff]  ;;  %s9237_s19 = smov 112   ;;  %s5197_s20 = smov 120   ;;  %vm646_vm11 = vcmask 990208  }
  0x22   : > { %447 = vmatpush1.msra.mxu1 %v368_v10  ;;  %378 = vperm.xlu1 %5043, %v372_v11   ;;  %v363_v30 = vld [vmem:[%s9204_s1] sm:$0x3]  ;;  %s5198_s21 = smov 8   ;;  %vm717_vm12 = vcmask 932864   ;;  %vm692_vm13 = vcmask 973824   ;;  %vm621_vm14 = vcmask 1031168  }
  0x23   : > { %4550 = vmatmul.mubr.msk.f32.vlgmr.msra.gmra.mxu1 %vm396_vm1, %v364_v12  ;;  %388 = vperm.xlu0 %5042, %v374_v14   ;;  %v5349_v31 = vrot.slane %v363_v30, %v508_v29  ;;  %v5352_v40 = vrot.slane %v363_v30, %v512_v35  ;;  %vm767_vm15 = vcmask 916480   ;;  %vm596_vm0 = vcmask 1039360   ;;  %s9398_s28 = smov 114   ;;  %s9399_s22 = smov 112  }
  0x24   : > { %486 = vmatprep.mubr.f32.mxu1 %v9213_v4 }
  0x25   : > { %9317 = vst [vmem:[#allocation3_spill] sm:$0xff] %v5349_v31  ;;  %9318 = vst [vmem:[#allocation4_spill] sm:$0xff] %v5352_v40 }
  0x26   : > { %840 = vperm.xlu1 %5043, %v806_v15  }
  0x27   : > { %4551 = vmatmul.mubr.msk.f32.gmra.mxu1 %vm396_vm1, %v365_v16  ;;  %845 = vperm.xlu0 %5042, %v807_v17  }
  0x28   : > { %492 = vmatprep.mubr.f32.mxu1 %v9213_v4 }
  0x2a   : > { %830 = vperm.xlu1 %5043, %v804_v18  }
  0x2b   : > { %4552 = vmatmul.mubr.msk.f32.gmra.mxu1 %vm396_vm1, %v366_v19  ;;  %835 = vperm.xlu0 %5042, %v805_v20  }
  0x2c   : > { %498 = vmatprep.mubr.f32.mxu1 %v9213_v4 }
  0x2e   : > { %820 = vperm.xlu1 %5043, %v802_v21  }
  0x2f   : > { %4553 = vmatmul.mubr.msk.f32.gmra.mxu1 %vm396_vm1, %v367_v22  ;;  %825 = vperm.xlu0 %5042, %v803_v23   ;;  %vm671_vm1 = vcmask 982016  }
  0x32   : > { %810 = vperm.xlu1 %5043, %v800_v24  }
  0x33   : > { %815 = vperm.xlu0 %5042, %v801_v25  }
  0x99   : > { %v384_v28 = vpop.permute.xlu1 %383  ;;  %v5371_v60 = vpop.permute.xlu0 %393 }
  0x9d   : > { %v379_v32 = vpop.permute.xlu1 %378 }
  0x9e   : > { %v389_v0 = vpop.permute.xlu0 %388 }
  0xa1   : > { %v5411_v30 = vpop.permute.xlu1 %840 }
  0xa2   : > { %9319 = vst [vmem:[#allocation5_spill] sm:$0xff] %v5411_v30 }
  0xe3   : > { %v482_v33 = vpop.f32.mrf.mxu1 }
  0xe4   : > { %v483_v34 = vadd.f32 %v482_v33, %v379_v32 }
  0xe5   : > { %v484_v36 = vpop.f32.mrf.mxu1 }
  0xe6   : > { %v516_v37 = vmul.f32 %v5349_v31, %v483_v34  ;;  %v485_v39 = vadd.f32 %v484_v36, %v379_v32  ;;  %v5413_v32 = vpop.permute.xlu0 %845  ;;  %v5419_v34 = vpop.permute.xlu1 %830 }
  0xe7   : > { %v488_v46 = vpop.f32.mrf.mxu1  ;;  %9320 = vst [vmem:[#allocation6_spill] sm:$0xff] %v5413_v32  ;;  %9321 = vst [vmem:[#allocation7_spill] sm:$0xff] %v5419_v34 }
  0xe8   : > { %v532_v38 = vmin.f32 %v516_v37, 0.0  ;;  %v517_v42 = vmul.f32 %v5352_v40, %v485_v39  ;;  %vm524_vm2 = vcmp.gt.f32.partialorder %v516_v37, 0.0  ;;  %v489_v49 = vadd.f32 %v488_v46, %v384_v28 }
  0xe9   : > { %v490_v55 = vpop.f32.mrf.mxu1 }
  0xea   : > { %v540_v41 = vmul.f32 1.442695, %v532_v38  ;;  %v533_v43 = vmin.f32 %v517_v42, 0.0  ;;  %v518_v50 = vmul.f32 %v5349_v31, %v489_v49  ;;  %vm525_vm3 = vcmp.gt.f32.partialorder %v517_v42, 0.0  ;;  %v5421_v35 = vpop.permute.xlu0 %835  ;;  %v5425_v39 = vpop.permute.xlu1 %820 }
  0xeb   : > { %v491_v57 = vadd.f32 %v490_v55, %v384_v28  ;;  %v494_v1 = vpop.f32.mrf.mxu1  ;;  %9322 = vst [vmem:[#allocation8_spill] sm:$0xff] %v5421_v35  ;;  %9323 = vst [vmem:[#allocation9_spill] sm:$0xff] %v5425_v39 }
  0xec   : > { %5044 = vpow2.f32 %v540_v41  ;;  %v542_v44 = vmul.f32 1.442695, %v533_v43  ;;  %v534_v51 = vmin.f32 %v518_v50, 0.0  ;;  %vm526_vm4 = vcmp.gt.f32.partialorder %v518_v50, 0.0 }
  0xed   : > { %v519_v58 = vmul.f32 %v5352_v40, %v491_v57  ;;  %v495_v3 = vadd.f32 %v494_v1, %v389_v0  ;;  %v496_v10 = vpop.f32.mrf.mxu1 }
  0xee   : > { %5046 = vpow2.f32 %v542_v44  ;;  %v544_v54 = vmul.f32 1.442695, %v534_v51  ;;  %v497_v12 = vadd.f32 %v496_v10, %v389_v0  ;;  %v5427_v41 = vpop.permute.xlu0 %825  ;;  %v5433_v43 = vpop.permute.xlu1 %810 }
  0xef   : > { %v535_v59 = vmin.f32 %v519_v58, 0.0  ;;  %v520_v5 = vmul.f32 %v5349_v31, %v495_v3  ;;  %vm527_vm5 = vcmp.gt.f32.partialorder %v519_v58, 0.0  ;;  %v500_v18 = vpop.f32.mrf.mxu1  ;;  %9324 = vst [vmem:[#allocation10_spill] sm:$0xff] %v5427_v41  ;;  %9325 = vst [vmem:[#allocation11_spill] sm:$0xff] %v5433_v43  ;;  %v777_v41 = vld [vmem:[%s9208_s5 + $0x8] sm:$0xff] }
  0xf0   : > { %5048 = vpow2.f32 %v544_v54  ;;  %v521_v13 = vmul.f32 %v5352_v40, %v497_v12  ;;  %v501_v19 = vadd.f32 %v500_v18, %v5371_v60  ;;  %1290 = vmatprep.mubr.f32.mxu1 %v777_v41 }
  0xf1   : > { %v546_v61 = vmul.f32 1.442695, %v535_v59  ;;  %v536_v6 = vmin.f32 %v520_v5, 0.0  ;;  %vm528_vm6 = vcmp.gt.f32.partialorder %v520_v5, 0.0  ;;  %v502_v26 = vpop.f32.mrf.mxu1 }
  0xf2   : > { %v537_v14 = vmin.f32 %v521_v13, 0.0  ;;  %v522_v21 = vmul.f32 %v5349_v31, %v501_v19  ;;  %vm529_vm7 = vcmp.gt.f32.partialorder %v521_v13, 0.0  ;;  %v503_v28 = vadd.f32 %v502_v26, %v5371_v60  ;;  %v5435_v44 = vpop.permute.xlu0 %815 }
  0xf3   : > { %5050 = vpow2.f32 %v546_v61  ;;  %v548_v9 = vmul.f32 1.442695, %v536_v6  ;;  %9326 = vst [vmem:[#allocation12_spill] sm:$0xff] %v5435_v44 }
  0xf4   : > { %v550_v15 = vmul.f32 1.442695, %v537_v14  ;;  %v538_v22 = vmin.f32 %v522_v21, 0.0  ;;  %v523_v29 = vmul.f32 %v5352_v40, %v503_v28  ;;  %vm530_vm8 = vcmp.gt.f32.partialorder %v522_v21, 0.0 }
  0xf5   : > { %5052 = vpow2.f32 %v548_v9 }
  0xf6   : > { %5054 = vpow2.f32 %v550_v15  ;;  %v552_v24 = vmul.f32 1.442695, %v538_v22  ;;  %v539_v33 = vmin.f32 %v523_v29, 0.0  ;;  %vm531_vm9 = vcmp.gt.f32.partialorder %v523_v29, 0.0 }
  0xf8   : > { %5056 = vpow2.f32 %v552_v24  ;;  %v554_v36 = vmul.f32 1.442695, %v539_v33 }
  0xf9   : > { %v5045_v45 = vpop.eup %5044 }
  0xfa   : > { %v4554_v47 = vadd.f32 -1.0, %v5045_v45  ;;  %5058 = vpow2.f32 %v554_v36 }
  0xfb   : > { %v5047_v52 = vpop.eup %5046 }
  0xfc   : > { %v564_v48 = vsel %vm524_vm2, %v516_v37, %v4554_v47  ;;  %v4555_v53 = vadd.f32 -1.0, %v5047_v52  ;;  %vm1056_vm2 = vcmask 64512  }
  0xfd   : > { %726 = vrot.lane.b32.xlu0 %v564_v48, %s5190_s29  ;;  %632 = vrot.lane.b32.xlu1 %v564_v48, %s5191_s30  ;;  %v5049_v62 = vpop.eup %5048 }
  0xfe   : > { %v565_v56 = vsel %vm525_vm3, %v517_v42, %v4555_v53  ;;  %v4556_v63 = vadd.f32 -1.0, %v5049_v62  ;;  %vm1201_vm3 = vcmask 261120  }
 0x100   : > { %v566_v2 = vsel %vm526_vm4, %v518_v50, %v4556_v63  ;;  %v5051_v7 = vpop.eup %5050 }
 0x101   : > { %701 = vrot.lane.b32.xlu0 %v564_v48, %s9239_s14  ;;  %607 = vrot.lane.b32.xlu1 %v564_v48, %s5193_s15  ;;  %v4557_v8 = vadd.f32 -1.0, %v5051_v7 }
 0x102   : > { %v5053_v16 = vpop.eup %5052 }
 0x103   : > { %v567_v11 = vsel %vm527_vm5, %v519_v58, %v4557_v8  ;;  %v4558_v17 = vadd.f32 -1.0, %v5053_v16  ;;  %v5055_v23 = vpop.eup %5054 }
 0x104   : > { %v4559_v25 = vadd.f32 -1.0, %v5055_v23 }
 0x105   : > { %676 = vrot.lane.b32.xlu0 %v564_v48, %s5194_s17  ;;  %582 = vrot.lane.b32.xlu1 %v564_v48, %s5195_s18  ;;  %v568_v20 = vsel %vm528_vm6, %v520_v5, %v4558_v17  ;;  %v5057_v37 = vpop.eup %5056 }
 0x106   : > { %v569_v27 = vsel %vm529_vm7, %v521_v13, %v4559_v25  ;;  %v4560_v38 = vadd.f32 -1.0, %v5057_v37 }
 0x107   : > { %v5059_v47 = vpop.eup %5058 }
 0x108   : > { %v570_v42 = vsel %vm530_vm8, %v522_v21, %v4560_v38  ;;  %v4561_v50 = vadd.f32 -1.0, %v5059_v47 }
 0x109   : > { %751 = vrot.lane.b32.xlu0 %v564_v48, %s9237_s19  ;;  %655 = vrot.lane.b32.xlu1 %v564_v48, %s5197_s20 }
 0x10a   : > { %v571_v53 = vsel %vm531_vm9, %v523_v29, %v4561_v50 }
 0x10d   : > { %630 = vrot.lane.b32.xlu0 %v565_v56, %s5191_s30  ;;  %850 = vrot.lane.b32.xlu1 %v564_v48, %s5198_s21 }
 0x111   : > { %605 = vrot.lane.b32.xlu0 %v565_v56, %s5193_s15  ;;  %728 = vrot.lane.b32.xlu1 %v565_v56, %s5190_s29 }
 0x115   : > { %580 = vrot.lane.b32.xlu0 %v565_v56, %s5195_s18  ;;  %703 = vrot.lane.b32.xlu1 %v565_v56, %s9239_s14 }
 0x119   : > { %657 = vrot.lane.b32.xlu0 %v565_v56, %s5197_s20  ;;  %678 = vrot.lane.b32.xlu1 %v565_v56, %s5194_s17 }
 0x11d   : > { %848 = vrot.lane.b32.xlu0 %v565_v56, %s5198_s21  ;;  %753 = vrot.lane.b32.xlu1 %v565_v56, %s9237_s19 }
 0x121   : > { %730 = vrot.lane.b32.xlu0 %v566_v2, %s5190_s29  ;;  %636 = vrot.lane.b32.xlu1 %v566_v2, %s5191_s30 }
 0x125   : > { %705 = vrot.lane.b32.xlu0 %v566_v2, %s9239_s14  ;;  %611 = vrot.lane.b32.xlu1 %v566_v2, %s5193_s15 }
 0x129   : > { %680 = vrot.lane.b32.xlu0 %v566_v2, %s5194_s17  ;;  %586 = vrot.lane.b32.xlu1 %v566_v2, %s5195_s18 }
 0x12d   : > { %659 = vrot.lane.b32.xlu0 %v566_v2, %s5197_s20  ;;  %755 = vrot.lane.b32.xlu1 %v566_v2, %s9237_s19 }
 0x131   : > { %634 = vrot.lane.b32.xlu0 %v567_v11, %s5191_s30  ;;  %854 = vrot.lane.b32.xlu1 %v566_v2, %s5198_s21 }
 0x135   : > { %609 = vrot.lane.b32.xlu0 %v567_v11, %s5193_s15  ;;  %732 = vrot.lane.b32.xlu1 %v567_v11, %s5190_s29 }
 0x139   : > { %584 = vrot.lane.b32.xlu0 %v567_v11, %s5195_s18  ;;  %707 = vrot.lane.b32.xlu1 %v567_v11, %s9239_s14 }
 0x13d   : > { %757 = vrot.lane.b32.xlu0 %v567_v11, %s9237_s19  ;;  %682 = vrot.lane.b32.xlu1 %v567_v11, %s5194_s17 }
 0x141   : > { %852 = vrot.lane.b32.xlu0 %v567_v11, %s5198_s21  ;;  %661 = vrot.lane.b32.xlu1 %v567_v11, %s5197_s20 }
 0x145   : > { %734 = vrot.lane.b32.xlu0 %v568_v20, %s5190_s29  ;;  %640 = vrot.lane.b32.xlu1 %v568_v20, %s5191_s30 }
 0x149   : > { %709 = vrot.lane.b32.xlu0 %v568_v20, %s9239_s14  ;;  %615 = vrot.lane.b32.xlu1 %v568_v20, %s5193_s15 }
 0x14d   : > { %684 = vrot.lane.b32.xlu0 %v568_v20, %s5194_s17  ;;  %590 = vrot.lane.b32.xlu1 %v568_v20, %s5195_s18 }
 0x151   : > { %663 = vrot.lane.b32.xlu0 %v568_v20, %s5197_s20  ;;  %858 = vrot.lane.b32.xlu1 %v568_v20, %s5198_s21 }
 0x155   : > { %759 = vrot.lane.b32.xlu0 %v568_v20, %s9237_s19  ;;  %736 = vrot.lane.b32.xlu1 %v569_v27, %s5190_s29 }
 0x159   : > { %638 = vrot.lane.b32.xlu0 %v569_v27, %s5191_s30  ;;  %711 = vrot.lane.b32.xlu1 %v569_v27, %s9239_s14 }
 0x15d   : > { %613 = vrot.lane.b32.xlu0 %v569_v27, %s5193_s15  ;;  %686 = vrot.lane.b32.xlu1 %v569_v27, %s5194_s17 }
 0x161   : > { %588 = vrot.lane.b32.xlu0 %v569_v27, %s5195_s18  ;;  %665 = vrot.lane.b32.xlu1 %v569_v27, %s5197_s20 }
 0x165   : > { %856 = vrot.lane.b32.xlu0 %v569_v27, %s5198_s21  ;;  %761 = vrot.lane.b32.xlu1 %v569_v27, %s9237_s19 }
 0x169   : > { %738 = vrot.lane.b32.xlu0 %v570_v42, %s5190_s29  ;;  %644 = vrot.lane.b32.xlu1 %v570_v42, %s5191_s30 }
 0x16d   : > { %713 = vrot.lane.b32.xlu0 %v570_v42, %s9239_s14  ;;  %619 = vrot.lane.b32.xlu1 %v570_v42, %s5193_s15 }
 0x16f   : > { %v5439_v45 = vpop.permute.xlu0 %726  ;;  %v5441_v46 = vpop.permute.xlu1 %632 }
 0x171   : > { %688 = vrot.lane.b32.xlu0 %v570_v42, %s5194_s17  ;;  %594 = vrot.lane.b32.xlu1 %v570_v42, %s5195_s18 }
 0x173   : > { %v5445_v48 = vpop.permute.xlu0 %701  ;;  %v5447_v49 = vpop.permute.xlu1 %607 }
 0x175   : > { %667 = vrot.lane.b32.xlu0 %v570_v42, %s5197_s20  ;;  %862 = vrot.lane.b32.xlu1 %v570_v42, %s5198_s21 }
 0x177   : > { %v5451_v51 = vpop.permute.xlu0 %676  ;;  %v5453_v52 = vpop.permute.xlu1 %582 }
 0x179   : > { %763 = vrot.lane.b32.xlu0 %v570_v42, %s9237_s19  ;;  %740 = vrot.lane.b32.xlu1 %v571_v53, %s5190_s29 }
 0x17b   : > { %v5457_v54 = vpop.permute.xlu0 %751  ;;  %v5459_v55 = vpop.permute.xlu1 %655 }
 0x17d   : > { %642 = vrot.lane.b32.xlu0 %v571_v53, %s5191_s30  ;;  %715 = vrot.lane.b32.xlu1 %v571_v53, %s9239_s14 }
 0x17f   : > { %v631_v56 = vpop.permute.xlu0 %630  ;;  %v5463_v57 = vpop.permute.xlu1 %850 }
 0x180   : > { %v648_v12 = vsel %vm646_vm11, %v5441_v46, %v631_v56  ;;  %v647_v16 = vsel %vm646_vm11, %v631_v56, %v5441_v46 }
 0x181   : > { %617 = vrot.lane.b32.xlu0 %v571_v53, %s5193_s15  ;;  %690 = vrot.lane.b32.xlu1 %v571_v53, %s5194_s17 }
 0x183   : > { %v606_v58 = vpop.permute.xlu0 %605  ;;  %v5467_v59 = vpop.permute.xlu1 %728 }
 0x184   : > { %v744_v9 = vsel %vm742_vm10, %v5467_v59, %v5439_v45  ;;  %v623_v20 = vsel %vm621_vm14, %v5447_v49, %v606_v58  ;;  %v622_v24 = vsel %vm621_vm14, %v606_v58, %v5447_v49  ;;  %v743_v38 = vsel %vm742_vm10, %v5439_v45, %v5467_v59 }
 0x185   : > { %592 = vrot.lane.b32.xlu0 %v571_v53, %s5195_s18  ;;  %669 = vrot.lane.b32.xlu1 %v571_v53, %s5197_s20 }
 0x187   : > { %v5471_v60 = vpop.permute.xlu0 %580  ;;  %v5473_v61 = vpop.permute.xlu1 %703 }
 0x188   : > { %v719_v13 = vsel %vm717_vm12, %v5473_v61, %v5445_v48  ;;  %v598_v27 = vsel %vm596_vm0, %v5453_v52, %v5471_v60  ;;  %v597_v33 = vsel %vm596_vm0, %v5471_v60, %v5453_v52  ;;  %v718_v47 = vsel %vm717_vm12, %v5445_v48, %v5473_v61 }
 0x189   : > { %860 = vrot.lane.b32.xlu0 %v571_v53, %s5198_s21  ;;  %765 = vrot.lane.b32.xlu1 %v571_v53, %s9237_s19 }
 0x18b   : > { %v5477_v62 = vpop.permute.xlu0 %657  ;;  %v5479_v63 = vpop.permute.xlu1 %678 }
 0x18c   : > { %v694_v17 = vsel %vm692_vm13, %v5479_v63, %v5451_v51  ;;  %v693_v50 = vsel %vm692_vm13, %v5451_v51, %v5479_v63 }
 0x18d   : > { %916 = vrot.lane.b32.xlu0 %v631_v56, %s5198_s21  ;;  %1008 = vrot.lane.b32.xlu1 %v5439_v45, %s5198_s21  ;;  %v672_v56 = vsel %vm671_vm1, %v5459_v55, %v5477_v62 }
 0x18f   : > { %v5484_v0 = vpop.permute.xlu0 %848  ;;  %v5486_v1 = vpop.permute.xlu1 %753 }
 0x190   : > { %v769_v21 = vsel %vm767_vm15, %v5486_v1, %v5457_v54 }
 0x191   : > { %892 = vrot.lane.b32.xlu0 %v606_v58, %s5198_s21  ;;  %984 = vrot.lane.b32.xlu1 %v5445_v48, %s5198_s21 }
 0x193   : > { %v5491_v2 = vpop.permute.xlu0 %730  ;;  %v5493_v3 = vpop.permute.xlu1 %636 }
 0x195   : > { %868 = vrot.lane.b32.xlu0 %v5471_v60, %s5198_s21  ;;  %960 = vrot.lane.b32.xlu1 %v5451_v51, %s5198_s21  ;;  %v768_v60 = vsel %vm767_vm15, %v5457_v54, %v5486_v1 }
 0x197   : > { %v5499_v5 = vpop.permute.xlu0 %705  ;;  %v5501_v6 = vpop.permute.xlu1 %611 }
 0x199   : > { %940 = vrot.lane.b32.xlu0 %v5477_v62, %s5198_s21  ;;  %936 = vrot.lane.b32.xlu1 %v5459_v55, %s5198_s21 }
 0x19b   : > { %v5507_v7 = vpop.permute.xlu0 %680  ;;  %v5509_v8 = vpop.permute.xlu1 %586 }
 0x19d   : > { %1032 = vrot.lane.b32.xlu1 %v5457_v54, %s5198_s21  ;;  %1012 = vrot.lane.b32.xlu0 %v744_v9, %s5198_s21 }
 0x19f   : > { %v5517_v10 = vpop.permute.xlu0 %659  ;;  %v5519_v11 = vpop.permute.xlu1 %755 }
 0x1a1   : > { %914 = vrot.lane.b32.xlu1 %v648_v12, %s5198_s21  ;;  %988 = vrot.lane.b32.xlu0 %v719_v13, %s5198_s21 }
 0x1a3   : > { %v5528_v14 = vpop.permute.xlu0 %634  ;;  %v5530_v15 = vpop.permute.xlu1 %854 }
 0x1a4   : > { %v650_v52 = vsel %vm646_vm11, %v5493_v3, %v5528_v14  ;;  %v649_v51 = vsel %vm646_vm11, %v5528_v14, %v5493_v3 }
 0x1a5   : > { %912 = vrot.lane.b32.xlu1 %v647_v16, %s5198_s21  ;;  %964 = vrot.lane.b32.xlu0 %v694_v17, %s5198_s21 }
 0x1a7   : > { %v5539_v18 = vpop.permute.xlu0 %609  ;;  %v5541_v19 = vpop.permute.xlu1 %732 }
 0x1a8   : > { %v625_v55 = vsel %vm621_vm14, %v5501_v6, %v5539_v18  ;;  %v624_v63 = vsel %vm621_vm14, %v5539_v18, %v5501_v6 }
 0x1a9   : > { %890 = vrot.lane.b32.xlu1 %v623_v20, %s5198_s21  ;;  %1036 = vrot.lane.b32.xlu0 %v769_v21, %s5198_s21 }
 0x1ab   : > { %v5550_v22 = vpop.permute.xlu0 %584  ;;  %v5552_v23 = vpop.permute.xlu1 %707 }
 0x1ac   : > { %v600_v3 = vsel %vm596_vm0, %v5509_v8, %v5550_v22  ;;  %v599_v12 = vsel %vm596_vm0, %v5550_v22, %v5509_v8  ;;  %v720_v20 = vsel %vm717_vm12, %v5499_v5, %v5552_v23 }
 0x1ad   : > { %888 = vrot.lane.b32.xlu1 %v622_v24, %s5198_s21  ;;  %1014 = vrot.lane.b32.xlu0 %v5491_v2, %s5198_s21  ;;  %v721_v24 = vsel %vm717_vm12, %v5552_v23, %v5499_v5 }
 0x1af   : > { %v5559_v25 = vpop.permute.xlu0 %757  ;;  %v5561_v26 = vpop.permute.xlu1 %682 }
 0x1b1   : > { %866 = vrot.lane.b32.xlu1 %v598_v27, %s5198_s21  ;;  %990 = vrot.lane.b32.xlu0 %v5499_v5, %s5198_s21  ;;  %v771_v5 = vsel %vm767_vm15, %v5559_v25, %v5519_v11 }
 0x1b3   : > { %v5569_v28 = vpop.permute.xlu0 %852  ;;  %v5571_v29 = vpop.permute.xlu1 %661 }
 0x1b5   : > { %864 = vrot.lane.b32.xlu1 %v597_v33, %s5198_s21  ;;  %966 = vrot.lane.b32.xlu0 %v5507_v7, %s5198_s21  ;;  %v696_v33 = vsel %vm692_vm13, %v5561_v26, %v5507_v7 }
 0x1b7   : > { %v5579_v36 = vpop.permute.xlu0 %734  ;;  %v5581_v37 = vpop.permute.xlu1 %640 }
 0x1b9   : > { %1010 = vrot.lane.b32.xlu1 %v743_v38, %s5198_s21  ;;  %1038 = vrot.lane.b32.xlu0 %v5519_v11, %s5198_s21 }
 0x1bb   : > { %v5589_v42 = vpop.permute.xlu0 %709  ;;  %v5591_v46 = vpop.permute.xlu1 %615 }
 0x1bd   : > { %986 = vrot.lane.b32.xlu1 %v718_v47, %s5198_s21  ;;  %946 = vrot.lane.b32.xlu0 %v5571_v29, %s5198_s21  ;;  %v673_v47 = vsel %vm671_vm1, %v5517_v10, %v5571_v29 }
 0x1bf   : > { %v5599_v49 = vpop.permute.xlu0 %684  ;;  %v5601_v45 = vpop.permute.xlu1 %590 }
 0x1c1   : > { %962 = vrot.lane.b32.xlu1 %v693_v50, %s5198_s21  ;;  %920 = vrot.lane.b32.xlu0 %v650_v52, %s5198_s21  ;;  %v770_v50 = vsel %vm767_vm15, %v5519_v11, %v5559_v25 }
 0x1c3   : > { %v5611_v48 = vpop.permute.xlu0 %663  ;;  %v5613_v53 = vpop.permute.xlu1 %858 }
 0x1c5   : > { %938 = vrot.lane.b32.xlu1 %v672_v56, %s5198_s21  ;;  %918 = vrot.lane.b32.xlu0 %v649_v51, %s5198_s21 }
 0x1c7   : > { %v5623_v58 = vpop.permute.xlu0 %759  ;;  %v5625_v59 = vpop.permute.xlu1 %736 }
 0x1c9   : > { %1034 = vrot.lane.b32.xlu1 %v768_v60, %s5198_s21  ;;  %896 = vrot.lane.b32.xlu0 %v625_v55, %s5198_s21  ;;  %v748_v55 = vsel %vm742_vm10, %v5625_v59, %v5579_v36 }
 0x1cb   : > { %v5635_v61 = vpop.permute.xlu0 %638  ;;  %v5637_v62 = vpop.permute.xlu1 %711 }
 0x1cd   : > { %942 = vrot.lane.b32.xlu1 %v5517_v10, %s5198_s21  ;;  %894 = vrot.lane.b32.xlu0 %v624_v63, %s5198_s21 }
 0x1cf   : > { %v5645_v54 = vpop.permute.xlu0 %613  ;;  %v5647_v1 = vpop.permute.xlu1 %686 }
 0x1d1   : > { %922 = vrot.lane.b32.xlu1 %v5528_v14, %s5198_s21  ;;  %872 = vrot.lane.b32.xlu0 %v600_v3, %s5198_s21  ;;  %v745_v14 = vsel %vm742_vm10, %v5491_v2, %v5541_v19 }
 0x1d3   : > { %v5655_v9 = vpop.permute.xlu0 %588  ;;  %v5657_v6 = vpop.permute.xlu1 %665 }
 0x1d5   : > { %898 = vrot.lane.b32.xlu1 %v5539_v18, %s5198_s21  ;;  %870 = vrot.lane.b32.xlu0 %v599_v12, %s5198_s21  ;;  %v746_v18 = vsel %vm742_vm10, %v5541_v19, %v5491_v2  ;;  %v695_v2 = vsel %vm692_vm13, %v5507_v7, %v5561_v26  ;;  %v652_v12 = vsel %vm646_vm11, %v5581_v37, %v5635_v61 }
 0x1d7   : > { %v5665_v13 = vpop.permute.xlu0 %856  ;;  %v5667_v16 = vpop.permute.xlu1 %761 }
 0x1d9   : > { %874 = vrot.lane.b32.xlu1 %v5550_v22, %s5198_s21  ;;  %1016 = vrot.lane.b32.xlu0 %v745_v14, %s5198_s21  ;;  %v723_v14 = vsel %vm717_vm12, %v5637_v62, %v5589_v42 }
 0x1db   : > { %v5675_v17 = vpop.permute.xlu0 %738  ;;  %v5677_v8 = vpop.permute.xlu1 %644 }
 0x1dd   : > { %1018 = vrot.lane.b32.xlu1 %v746_v18, %s5198_s21  ;;  %992 = vrot.lane.b32.xlu0 %v720_v20, %s5198_s21 }
 0x1df   : > { %v5687_v21 = vpop.permute.xlu0 %713  ;;  %v5689_v22 = vpop.permute.xlu1 %619 }
 0x1e1   : > { %994 = vrot.lane.b32.xlu1 %v721_v24, %s5198_s21  ;;  %968 = vrot.lane.b32.xlu0 %v695_v2, %s5198_s21  ;;  %v651_v24 = vsel %vm646_vm11, %v5635_v61, %v5581_v37  ;;  %v698_v2 = vsel %vm692_vm13, %v5647_v1, %v5599_v49  ;;  %v773_v37 = vsel %vm767_vm15, %v5667_v16, %v5623_v58 }
 0x1e3   : > { %v5699_v19 = vpop.permute.xlu0 %688  ;;  %v5701_v27 = vpop.permute.xlu1 %594 }
 0x1e5   : > { %970 = vrot.lane.b32.xlu1 %v696_v33, %s5198_s21  ;;  %1042 = vrot.lane.b32.xlu0 %v771_v5, %s5198_s21 }
 0x1e7   : > { %v5711_v23 = vpop.permute.xlu0 %667  ;;  %v5713_v38 = vpop.permute.xlu1 %862 }
 0x1e9   : > { %944 = vrot.lane.b32.xlu1 %v673_v47, %s5198_s21  ;;  %1044 = vrot.lane.b32.xlu0 %v5623_v58, %s5198_s21  ;;  %v627_v47 = vsel %vm621_vm14, %v5591_v46, %v5645_v54 }
 0x1eb   : > { %v5721_v7 = vpop.permute.xlu0 %763  ;;  %v5723_v26 = vpop.permute.xlu1 %740 }
 0x1ed   : > { %1040 = vrot.lane.b32.xlu1 %v770_v50, %s5198_s21  ;;  %928 = vrot.lane.b32.xlu0 %v5635_v61, %s5198_s21 }
 0x1ef   : > { %v5731_v52 = vpop.permute.xlu0 %642  ;;  %v5733_v10 = vpop.permute.xlu1 %715 }
 0x1f0   : > { %v725_v30 = vsel %vm717_vm12, %v5733_v10, %v5687_v21 }
 0x1f1   : > { %1020 = vrot.lane.b32.xlu1 %v5579_v36, %s5198_s21  ;;  %904 = vrot.lane.b32.xlu0 %v5645_v54, %s5198_s21 }
 0x1f3   : > { %v5739_v29 = vpop.permute.xlu0 %617  ;;  %v5741_v56 = vpop.permute.xlu1 %690 }
 0x1f4   : > { %v699_v32 = vsel %vm692_vm13, %v5699_v19, %v5741_v56 }
 0x1f5   : > { %996 = vrot.lane.b32.xlu1 %v5589_v42, %s5198_s21  ;;  %880 = vrot.lane.b32.xlu0 %v5655_v9, %s5198_s21 }
 0x1f7   : > { %v5747_v11 = vpop.permute.xlu0 %592  ;;  %v5749_v25 = vpop.permute.xlu1 %669 }
 0x1f9   : > { %972 = vrot.lane.b32.xlu1 %v5599_v49, %s5198_s21  ;;  %952 = vrot.lane.b32.xlu0 %v5657_v6, %s5198_s21 }
 0x1fb   : > { %v5755_v51 = vpop.permute.xlu0 %860  ;;  %v5757_v60 = vpop.permute.xlu1 %765 }
 0x1fd   : > { %948 = vrot.lane.b32.xlu1 %v5611_v48, %s5198_s21  ;;  %1024 = vrot.lane.b32.xlu0 %v748_v55, %s5198_s21  ;;  %v626_v55 = vsel %vm621_vm14, %v5645_v54, %v5591_v46  ;;  %v601_v54 = vsel %vm596_vm0, %v5655_v9, %v5601_v45 }
 0x1ff   : > { %v5765_v63 = vpop.permute.xlu0 %916  ;;  %v5767_v3 = vpop.permute.xlu1 %1008 }
 0x200   : > { %9327 = vst [vmem:[#allocation13_spill] sm:$0xff] %v5767_v3 }
 0x201   : > { %926 = vrot.lane.b32.xlu1 %v652_v12, %s5198_s21  ;;  %1000 = vrot.lane.b32.xlu0 %v723_v14, %s5198_s21 }
 0x203   : > { %v5777_v18 = vpop.permute.xlu0 %892  ;;  %v5779_v20 = vpop.permute.xlu1 %984 }
 0x204   : > { %9328 = vst [vmem:[#allocation14_spill] sm:$0xff] %v5779_v20 }
 0x205   : > { %924 = vrot.lane.b32.xlu1 %v651_v24, %s5198_s21  ;;  %976 = vrot.lane.b32.xlu0 %v698_v2, %s5198_s21  ;;  %v602_v24 = vsel %vm596_vm0, %v5601_v45, %v5655_v9  ;;  %v722_v9 = vsel %vm717_vm12, %v5589_v42, %v5637_v62 }
 0x207   : > { %v5789_v33 = vpop.permute.xlu0 %868  ;;  %v5791_v5 = vpop.permute.xlu1 %960 }
 0x208   : > { %9329 = vst [vmem:[#allocation15_spill] sm:$0xff] %v5791_v5 }
 0x209   : > { %902 = vrot.lane.b32.xlu1 %v627_v47, %s5198_s21  ;;  %1048 = vrot.lane.b32.xlu0 %v773_v37, %s5198_s21 }
 0x20b   : > { %v5801_v61 = vpop.permute.xlu0 %940  ;;  %v5803_v50 = vpop.permute.xlu1 %936 }
 0x20c   : > { %9330 = vst [vmem:[#allocation16_spill] sm:$0xff] %v5801_v61  ;;  %9331 = vst [vmem:[#allocation17_spill] sm:$0xff] %v5803_v50 }
 0x20d   : > { %900 = vrot.lane.b32.xlu1 %v626_v55, %s5198_s21  ;;  %1026 = vrot.lane.b32.xlu0 %v5675_v17, %s5198_s21  ;;  %v747_v55 = vsel %vm742_vm10, %v5579_v36, %v5625_v59  ;;  %v697_v59 = vsel %vm692_vm13, %v5599_v49, %v5647_v1  ;;  %v653_v49 = vsel %vm646_vm11, %v5731_v52, %v5677_v8 }
 0x20f   : > { %v5811_v12 = vpop.permute.xlu0 %1012  ;;  %v5813_v14 = vpop.permute.xlu1 %1032 }
 0x210   : > { %9332 = vst [vmem:[#allocation18_spill] sm:$0xff] %v5811_v12 }
 0x211   : > { %878 = vrot.lane.b32.xlu1 %v602_v24, %s5198_s21  ;;  %1002 = vrot.lane.b32.xlu0 %v5687_v21, %s5198_s21 }
 0x213   : > { %v5821_v2 = vpop.permute.xlu0 %988  ;;  %v5823_v46 = vpop.permute.xlu1 %914 }
 0x214   : > { %9333 = vst [vmem:[#allocation19_spill] sm:$0xff] %v5821_v2 }
 0x215   : > { %876 = vrot.lane.b32.xlu1 %v601_v54, %s5198_s21  ;;  %978 = vrot.lane.b32.xlu0 %v5699_v19, %s5198_s21 }
 0x217   : > { %v5831_v47 = vpop.permute.xlu0 %964  ;;  %v5833_v37 = vpop.permute.xlu1 %912 }
 0x218   : > { %9334 = vst [vmem:[#allocation20_spill] sm:$0xff] %v5831_v47 }
 0x219   : > { %1022 = vrot.lane.b32.xlu1 %v747_v55, %s5198_s21  ;;  %954 = vrot.lane.b32.xlu0 %v5711_v23, %s5198_s21  ;;  %v654_v55 = vsel %vm646_vm11, %v5677_v8, %v5731_v52 }
 0x21b   : > { %v5841_v24 = vpop.permute.xlu0 %1036  ;;  %v5843_v45 = vpop.permute.xlu1 %890 }
 0x21d   : > { %998 = vrot.lane.b32.xlu1 %v722_v9, %s5198_s21  ;;  %1050 = vrot.lane.b32.xlu0 %v5721_v7, %s5198_s21  ;;  %v674_v9 = vsel %vm671_vm1, %v5611_v48, %v5657_v6  ;;  %v629_v48 = vsel %vm621_vm14, %v5689_v22, %v5739_v29 }
 0x21f   : > { %v5851_v54 = vpop.permute.xlu0 %1014  ;;  %v5853_v36 = vpop.permute.xlu1 %888 }
 0x221   : > { %974 = vrot.lane.b32.xlu1 %v697_v59, %s5198_s21  ;;  %932 = vrot.lane.b32.xlu0 %v654_v55, %s5198_s21  ;;  %v772_v55 = vsel %vm767_vm15, %v5623_v58, %v5667_v16 }
 0x223   : > { %v5863_v42 = vpop.permute.xlu0 %990  ;;  %v5865_v62 = vpop.permute.xlu1 %866 }
 0x224   : > { %9335 = vst [vmem:[#allocation21_spill] sm:$0xff] %v5863_v42 }
 0x225   : > { %950 = vrot.lane.b32.xlu1 %v674_v9, %s5198_s21  ;;  %930 = vrot.lane.b32.xlu0 %v653_v49, %s5198_s21  ;;  %v628_v9 = vsel %vm621_vm14, %v5739_v29, %v5689_v22  ;;  %v604_v49 = vsel %vm596_vm0, %v5701_v27, %v5747_v11 }
 0x227   : > { %v5875_v1 = vpop.permute.xlu0 %966  ;;  %v5877_v59 = vpop.permute.xlu1 %864 }
 0x228   : > { %9336 = vst [vmem:[#allocation22_spill] sm:$0xff] %v5875_v1 }
 0x229   : > { %1046 = vrot.lane.b32.xlu1 %v772_v55, %s5198_s21  ;;  %908 = vrot.lane.b32.xlu0 %v629_v48, %s5198_s21 }
 0x22b   : > { %v5887_v6 = vpop.permute.xlu0 %1038  ;;  %v5889_v8 = vpop.permute.xlu1 %1010 }
 0x22c   : > { %9337 = vst [vmem:[#allocation23_spill] sm:$0xff] %v5889_v8 }
 0x22d   : > { %934 = vrot.lane.b32.xlu1 %v5731_v52, %s5198_s21  ;;  %906 = vrot.lane.b32.xlu0 %v628_v9, %s5198_s21  ;;  %v603_v52 = vsel %vm596_vm0, %v5747_v11, %v5701_v27 }
 0x22f   : > { %v5897_v58 = vpop.permute.xlu0 %946  ;;  %v5899_v16 = vpop.permute.xlu1 %986 }
 0x230   : > { %9338 = vst [vmem:[#allocation24_spill] sm:$0xff] %v5897_v58  ;;  %9339 = vst [vmem:[#allocation25_spill] sm:$0xff] %v5899_v16 }
 0x231   : > { %910 = vrot.lane.b32.xlu1 %v5739_v29, %s5198_s21  ;;  %884 = vrot.lane.b32.xlu0 %v604_v49, %s5198_s21  ;;  %v749_v29 = vsel %vm742_vm10, %v5675_v17, %v5723_v26 }
 0x233   : > { %v5907_v55 = vpop.permute.xlu0 %920  ;;  %v5909_v22 = vpop.permute.xlu1 %962 }
 0x234   : > { %9340 = vst [vmem:[#allocation26_spill] sm:$0xff] %v5909_v22 }
 0x235   : > { %882 = vrot.lane.b32.xlu0 %v603_v52, %s5198_s21  ;;  %886 = vrot.lane.b32.xlu1 %v5747_v11, %s5198_s21  ;;  %v724_v11 = vsel %vm717_vm12, %v5687_v21, %v5733_v10  ;;  %v750_v52 = vsel %vm742_vm10, %v5723_v26, %v5675_v17 }
 0x237   : > { %v5917_v48 = vpop.permute.xlu0 %918  ;;  %v5919_v9 = vpop.permute.xlu1 %938 }
 0x238   : > { %9341 = vst [vmem:[#allocation27_spill] sm:$0xff] %v5919_v9 }
 0x239   : > { %1028 = vrot.lane.b32.xlu0 %v749_v29, %s5198_s21  ;;  %958 = vrot.lane.b32.xlu1 %v5749_v25, %s5198_s21 }
 0x23b   : > { %v5927_v49 = vpop.permute.xlu0 %896  ;;  %v5929_v27 = vpop.permute.xlu1 %1034 }
 0x23d   : > { %1004 = vrot.lane.b32.xlu0 %v724_v11, %s5198_s21  ;;  %1030 = vrot.lane.b32.xlu1 %v750_v52, %s5198_s21  ;;  %v675_v11 = vsel %vm671_vm1, %v5711_v23, %v5749_v25  ;;  %v700_v52 = vsel %vm692_vm13, %v5741_v56, %v5699_v19  ;;  %v774_v23 = vsel %vm767_vm15, %v5721_v7, %v5757_v60 }
 0x23f   : > { %v5939_v29 = vpop.permute.xlu0 %894  ;;  %v5941_v4 = vpop.permute.xlu1 %942 }
 0x240   : > { %9342 = vst [vmem:[#allocation28_spill] sm:$0xff] %v5941_v4 }
 0x241   : > { %980 = vrot.lane.b32.xlu0 %v699_v32, %s5198_s21  ;;  %1006 = vrot.lane.b32.xlu1 %v725_v30, %s5198_s21  ;;  %v775_v30 = vsel %vm767_vm15, %v5757_v60, %v5721_v7 }
 0x243   : > { %v5951_v17 = vpop.permute.xlu0 %872  ;;  %v5953_v26 = vpop.permute.xlu1 %922 }
 0x245   : > { %956 = vrot.lane.b32.xlu0 %v675_v11, %s5198_s21  ;;  %982 = vrot.lane.b32.xlu1 %v700_v52, %s5198_s21 }
 0x247   : > { %v5963_v21 = vpop.permute.xlu0 %870  ;;  %v5965_v32 = vpop.permute.xlu1 %898 }
 0x249   : > { %1054 = vrot.lane.b32.xlu0 %v775_v30, %s5198_s21  ;;  %1052 = vrot.lane.b32.xlu1 %v774_v23, %s5198_s21 }
 0x24b   : > { %v5975_v19 = vpop.permute.xlu0 %1016  ;;  %v5977_v10 = vpop.permute.xlu1 %874 }
 0x24f   : > { %v5979_v56 = vpop.permute.xlu0 %992  ;;  %v5981_v25 = vpop.permute.xlu1 %1018 }
 0x250   : > { %9343 = vst [vmem:[#allocation29_spill] sm:$0xff] %v5979_v56 }
 0x253   : > { %v5983_v11 = vpop.permute.xlu0 %968  ;;  %v5985_v52 = vpop.permute.xlu1 %994 }
 0x254   : > { %9344 = vst [vmem:[#allocation30_spill] sm:$0xff] %v5983_v11  ;;  %9345 = vst [vmem:[#allocation31_spill] sm:$0xff] %v5985_v52 }
 0x257   : > { %v5987_v35 = vpop.permute.xlu0 %1042  ;;  %v5989_v34 = vpop.permute.xlu1 %970 }
 0x258   : > { %9346 = vst [vmem:[#allocation32_spill] sm:$0xff] %v5989_v34 }
 0x25b   : > { %v5991_v7 = vpop.permute.xlu0 %1044  ;;  %v5993_v60 = vpop.permute.xlu1 %944 }
 0x25c   : > { %9347 = vst [vmem:[#allocation33_spill] sm:$0xff] %v5993_v60 }
 0x25f   : > { %v929_v30 = vpop.permute.xlu0 %928  ;;  %v5995_v23 = vpop.permute.xlu1 %1040 }
 0x263   : > { %v905_v39 = vpop.permute.xlu0 %904  ;;  %v6000_v44 = vpop.permute.xlu1 %1020 }
 0x267   : > { %v6002_v40 = vpop.permute.xlu0 %880  ;;  %v6004_v31 = vpop.permute.xlu1 %996 }
 0x268   : > { %9348 = vst [vmem:[#allocation34_spill] sm:$0xff] %v6004_v31 }
 0x26b   : > { %v6006_v43 = vpop.permute.xlu0 %952  ;;  %v6008_v50 = vpop.permute.xlu1 %972 }
 0x26c   : > { %9349 = vst [vmem:[#allocation35_spill] sm:$0xff] %v6006_v43  ;;  %9350 = vst [vmem:[#allocation36_spill] sm:$0xff] %v6008_v50 }
 0x26f   : > { %v6010_v9 = vpop.permute.xlu0 %1024  ;;  %v6012_v61 = vpop.permute.xlu1 %948 }
 0x270   : > { %9351 = vst [vmem:[#allocation37_spill] sm:$0xff] %v6012_v61 }
 0x273   : > { %v6014_v4 = vpop.permute.xlu0 %1000  ;;  %v927_v60 = vpop.permute.xlu1 %926 }
 0x274   : > { %9352 = vst [vmem:[#allocation38_spill] sm:$0xff] %v6014_v4 }
 0x277   : > { %v6016_v58 = vpop.permute.xlu0 %976  ;;  %v925_v41 = vpop.permute.xlu1 %924 }
 0x278   : > { %9353 = vst [vmem:[#allocation39_spill] sm:$0xff] %v6016_v58  ;;  %v1085_v8 = vsel %vm1056_vm2, %v925_v41, %v927_v60 }
 0x27b   : > { %v6018_v5 = vpop.permute.xlu0 %1048  ;;  %v903_v22 = vpop.permute.xlu1 %902 }
 0x27f   : > { %v6020_v47 = vpop.permute.xlu0 %1026  ;;  %v901_v1 = vpop.permute.xlu1 %900 }
 0x283   : > { %v6022_v11 = vpop.permute.xlu0 %1002  ;;  %v879_v43 = vpop.permute.xlu1 %878 }
 0x284   : > { %9354 = vst [vmem:[#allocation40_spill] sm:$0xff] %v6022_v11 }
 0x287   : > { %v6024_v34 = vpop.permute.xlu0 %978  ;;  %v877_v50 = vpop.permute.xlu1 %876 }
 0x288   : > { %9355 = vst [vmem:[#allocation41_spill] sm:$0xff] %v6024_v34 }
 0x28b   : > { %v6026_v20 = vpop.permute.xlu0 %954  ;;  %v6028_v61 = vpop.permute.xlu1 %1022 }
 0x28c   : > { %9356 = vst [vmem:[#allocation42_spill] sm:$0xff] %v6026_v20 }
 0x28f   : > { %v6030_v16 = vpop.permute.xlu0 %1050  ;;  %v6032_v58 = vpop.permute.xlu1 %998 }
 0x290   : > { %9357 = vst [vmem:[#allocation43_spill] sm:$0xff] %v6032_v58  ;;  %v1086_v58 = vsel %vm1056_vm2, %v927_v60, %v929_v30  ;;  %v1124_v30 = vsel %vm1056_vm2, %v5995_v23, %v5987_v35  ;;  %v1122_v35 = vsel %vm1056_vm2, %v5929_v27, %v5841_v24  ;;  %v1116_v24 = vsel %vm1056_vm2, %v5975_v19, %v5981_v25 }
 0x293   : > { %v933_v2 = vpop.permute.xlu0 %932  ;;  %v6034_v42 = vpop.permute.xlu1 %974 }
 0x294   : > { %9358 = vst [vmem:[#allocation44_spill] sm:$0xff] %v6034_v42 }
 0x297   : > { %v931_v56 = vpop.permute.xlu0 %930  ;;  %v6036_v52 = vpop.permute.xlu1 %950 }
 0x298   : > { %9359 = vst [vmem:[#allocation45_spill] sm:$0xff] %v6036_v52  ;;  %v1087_v3 = vsel %vm1056_vm2, %v931_v56, %v933_v2  ;;  %v1084_v52 = vsel %vm1056_vm2, %v5907_v55, %v5953_v26 }
 0x29b   : > { %v909_v31 = vpop.permute.xlu0 %908  ;;  %v6038_v4 = vpop.permute.xlu1 %1046 }
 0x29f   : > { %v907_v34 = vpop.permute.xlu0 %906  ;;  %v935_v11 = vpop.permute.xlu1 %934 }
 0x2a0   : > { %v1088_v20 = vsel %vm1056_vm2, %v933_v2, %v935_v11  ;;  %v1083_v11 = vsel %vm1056_vm2, %v5917_v48, %v5907_v55  ;;  %v1079_v26 = vsel %vm1056_vm2, %v907_v34, %v909_v31  ;;  %v1078_v55 = vsel %vm1056_vm2, %v903_v22, %v905_v39 }
 0x2a1   : > { %1226 = vmatprep.subr.mxu1 %v1088_v20  ;;  %v1081_v20 = vsel %vm1056_vm2, %v5833_v37, %v5823_v46  ;;  %v1077_v48 = vsel %vm1056_vm2, %v901_v1, %v903_v22  ;;  %v1074_v34 = vsel %vm1056_vm2, %v5843_v45, %v5777_v18  ;;  %v1073_v39 = vsel %vm1056_vm2, %v5853_v36, %v5843_v45 }
 0x2a2   : > { %1227 = vmatpush1.msra.mxu1 %v1087_v3  ;;  %v1082_v3 = vsel %vm1056_vm2, %v5823_v46, %v5765_v63  ;;  %v1076_v46 = vsel %vm1056_vm2, %v5927_v49, %v5965_v32  ;;  %v1069_v18 = vsel %vm1056_vm2, %v877_v50, %v879_v43  ;;  %v1068_v36 = vsel %vm1056_vm2, %v5951_v17, %v5977_v10 }
 0x2a3   : > { %v885_v42 = vpop.permute.xlu0 %884  ;;  %1228 = vmatprep.subr.mxu1 %v1086_v58  ;;  %v911_v12 = vpop.permute.xlu1 %910  ;;  %v1061_v10 = vsel %vm1056_vm2, %v5665_v13, %v5613_v53 }
 0x2a4   : > { %1229 = vmatpush1.msra.mxu1 %v1085_v8  ;;  %v1080_v58 = vsel %vm1056_vm2, %v909_v31, %v911_v12  ;;  %v1075_v31 = vsel %vm1056_vm2, %v5939_v29, %v5927_v49  ;;  %v1070_v49 = vsel %vm1056_vm2, %v879_v43, %v6002_v40  ;;  %v1066_v40 = vsel %vm1056_vm2, %v5865_v62, %v5789_v33 }
 0x2a5   : > { %1230 = vmatprep.subr.mxu1 %v1084_v52  ;;  %v1065_v43 = vsel %vm1056_vm2, %v5877_v59, %v5865_v62  ;;  %v1062_v33 = vsel %vm1056_vm2, %v5613_v53, %v5665_v13  ;;  %v1060_v52 = vsel %vm1056_vm2, %v5530_v15, %v5569_v28  ;;  %v1058_v53 = vsel %vm1056_vm2, %v5463_v57, %v5484_v0 }
 0x2a6   : > { %1231 = vmatpush1.msra.mxu1 %v1083_v11  ;;  %v1126_v13 = vsel %vm1056_vm2, %v6038_v4, %v6018_v5  ;;  %v9365_v11 = vld [vmem:[#allocation38_spill] sm:$0xff] }
 0x2a7   : > { %v883_v2 = vpop.permute.xlu0 %882  ;;  %1232 = vmatprep.subr.mxu1 %v1082_v3  ;;  %v887_v8 = vpop.permute.xlu1 %886  ;;  %v9366_v3 = vld [vmem:[#allocation43_spill] sm:$0xff] }
 0x2a8   : > { %1233 = vmatpush1.msra.mxu1 %v1081_v20  ;;  %v1072_v1 = vsel %vm1056_vm2, %v885_v42, %v887_v8  ;;  %v1071_v22 = vsel %vm1056_vm2, %v883_v2, %v885_v42  ;;  %v1067_v42 = vsel %vm1056_vm2, %v5963_v21, %v5951_v17  ;;  %v1064_v17 = vsel %vm1056_vm2, %v5713_v38, %v5755_v51  ;;  %v784_v2 = vld [vmem:[%s9208_s5 + $0x40] sm:$0xff]  ;;  %v9367_v8 = vld [vmem:[#allocation34_spill] sm:$0xff] }
 0x2a9   : > { %1234 = vmatprep.subr.mxu1 %v1080_v58  ;;  %v1063_v21 = vsel %vm1056_vm2, %v5755_v51, %v5713_v38  ;;  %v1059_v51 = vsel %vm1056_vm2, %v5569_v28, %v5530_v15  ;;  %v1125_v15 = vsel %vm1056_vm2, %v5991_v7, %v6038_v4  ;;  %v1118_v4 = vsel %vm1056_vm2, %v6028_v61, %v6010_v9  ;;  %v9360_v7 = vld [vmem:[#allocation18_spill] sm:$0xff] }
 0x2aa   : > { %1235 = vmatpush1.msra.mxu1 %v1079_v26  ;;  %v1115_v9 = vsel %vm1056_vm2, %v5851_v54, %v5975_v19  ;;  %v9364_v19 = vld [vmem:[#allocation40_spill] sm:$0xff]  ;;  %v1110_v20 = vsel %vm1056_vm2, %v9366_v3, %v9365_v11  ;;  %v1109_v58 = vsel %vm1056_vm2, %v9367_v8, %v9366_v3  ;;  %v9368_v26 = vld [vmem:[#allocation31_spill] sm:$0xff]  ;;  %v791_v8 = vld [vmem:[%s9208_s5 + $0x78] sm:$0xff] }
 0x2ab   : > { %v6060_v56 = vpop.permute.xlu0 %1028  ;;  %1236 = vmatprep.subr.mxu1 %v1078_v55  ;;  %v6062_v63 = vpop.permute.xlu1 %958  ;;  %v9369_v55 = vld [vmem:[#allocation29_spill] sm:$0xff]  ;;  %v785_v11 = vld [vmem:[%s9208_s5 + $0x48] sm:$0xff] }
 0x2ac   : > { %1237 = vmatpush1.msra.mxu1 %v1077_v48  ;;  %v1119_v5 = vsel %vm1056_vm2, %v6020_v47, %v6060_v56  ;;  %v1117_v47 = vsel %vm1056_vm2, %v6000_v44, %v6028_v61  ;;  %v9361_v44 = vld [vmem:[#allocation23_spill] sm:$0xff]  ;;  %v1108_v48 = vsel %vm1056_vm2, %v9369_v55, %v9368_v26  ;;  %v789_v3 = vld [vmem:[%s9208_s5 + $0x68] sm:$0xff]  ;;  %v794_v26 = vld [vmem:[%s9208_s5 + $0x90] sm:$0xff] }
 0x2ad   : > { %1238 = vmatprep.subr.mxu1 %v1076_v46  ;;  %v1114_v61 = vsel %vm1056_vm2, %v9361_v44, %v9360_v7  ;;  %v776_v7 = vld [vmem:[%s9208_s5] sm:$0xff] }
 0x2ae   : > { %1239 = vmatpush1.msra.mxu1 %v1075_v31  ;;  %v9371_v31 = vld [vmem:[#allocation19_spill] sm:$0xff] }
 0x2af   : > { %v6076_v12 = vpop.permute.xlu0 %1004  ;;  %1240 = vmatprep.subr.mxu1 %v1074_v34  ;;  %v1031_v37 = vpop.permute.xlu1 %1030  ;;  %v9372_v34 = vld [vmem:[#allocation25_spill] sm:$0xff] }
 0x2b0   : > { %1241 = vmatpush1.msra.mxu1 %v1073_v39  ;;  %v1120_v28 = vsel %vm1056_vm2, %v6060_v56, %v1031_v37  ;;  %v1111_v41 = vsel %vm1056_vm2, %v9364_v19, %v6076_v12  ;;  %v9370_v56 = vld [vmem:[#allocation21_spill] sm:$0xff]  ;;  %v1106_v39 = vsel %vm1056_vm2, %v9372_v34, %v9371_v31  ;;  %v9373_v37 = vld [vmem:[#allocation14_spill] sm:$0xff] }
 0x2b1   : > { %1242 = vmatprep.subr.mxu1 %v1072_v1  ;;  %v1107_v46 = vsel %vm1056_vm2, %v9370_v56, %v9369_v55  ;;  %v1105_v1 = vsel %vm1056_vm2, %v9373_v37, %v9372_v34  ;;  %v782_v19 = vld [vmem:[%s9208_s5 + $0x30] sm:$0xff] }
 0x2b2   : > { %1243 = vmatpush1.msra.mxu1 %v1071_v22  ;;  %v798_v55 = vld [vmem:[%s9208_s5 + $0xb0] sm:$0xff] }
 0x2b3   : > { %v6083_v29 = vpop.permute.xlu0 %980  ;;  %1244 = vmatprep.subr.mxu1 %v1070_v49  ;;  %v6085_v45 = vpop.permute.xlu1 %1006  ;;  %v9374_v49 = vld [vmem:[#allocation41_spill] sm:$0xff] }
 0x2b4   : > { %1245 = vmatpush1.msra.mxu1 %v1069_v18  ;;  %v1112_v54 = vsel %vm1056_vm2, %v6076_v12, %v6085_v45  ;;  %v787_v12 = vld [vmem:[%s9208_s5 + $0x58] sm:$0xff]  ;;  %v1103_v18 = vsel %vm1056_vm2, %v9374_v49, %v6083_v29  ;;  %v9375_v45 = vld [vmem:[#allocation39_spill] sm:$0xff] }
 0x2b5   : > { %1246 = vmatprep.subr.mxu1 %v1068_v36  ;;  %v9376_v36 = vld [vmem:[#allocation44_spill] sm:$0xff] }
 0x2b6   : > { %1247 = vmatpush1.msra.mxu1 %v1067_v42  ;;  %v1102_v42 = vsel %vm1056_vm2, %v9376_v36, %v9375_v45 }
 0x2b7   : > { %v6099_v50 = vpop.permute.xlu0 %956  ;;  %1248 = vmatprep.subr.mxu1 %v1066_v40  ;;  %v6101_v32 = vpop.permute.xlu1 %982  ;;  %v790_v40 = vld [vmem:[%s9208_s5 + $0x70] sm:$0xff] }
 0x2b8   : > { %1249 = vmatpush1.msra.mxu1 %v1065_v43  ;;  %v1104_v22 = vsel %vm1056_vm2, %v6083_v29, %v6101_v32  ;;  %v9377_v43 = vld [vmem:[#allocation36_spill] sm:$0xff] }
 0x2b9   : > { %1250 = vmatprep.subr.mxu1 %v1064_v17  ;;  %v1101_v32 = vsel %vm1056_vm2, %v9377_v43, %v9376_v36  ;;  %v9378_v29 = vld [vmem:[#allocation32_spill] sm:$0xff]  ;;  %v9379_v17 = vld [vmem:[#allocation30_spill] sm:$0xff] }
 0x2ba   : > { %1251 = vmatpush1.msra.mxu1 %v1063_v21  ;;  %v1100_v21 = vsel %vm1056_vm2, %v9379_v17, %v9378_v29 }
 0x2bb   : > { %v1055_v62 = vpop.permute.xlu0 %1054  ;;  %1252 = vmatprep.subr.mxu1 %v1062_v33  ;;  %v1053_v59 = vpop.permute.xlu1 %1052  ;;  %v9380_v33 = vld [vmem:[#allocation22_spill] sm:$0xff] }
 0x2bc   : > { %1253 = vmatpush1.msra.mxu1 %v1061_v10  ;;  %v1128_v60 = vsel %vm1056_vm2, %v1053_v59, %v1055_v62  ;;  %v1127_v38 = vsel %vm1056_vm2, %v6030_v16, %v1053_v59  ;;  %v1057_v16 = vsel %vm1056_vm2, %v5484_v0, %v5463_v57  ;;  %v1123_v57 = vsel %vm1056_vm2, %v5887_v6, %v5995_v23  ;;  %v778_v0 = vld [vmem:[%s9208_s5 + $0x10] sm:$0xff]  ;;  %v9381_v59 = vld [vmem:[#allocation20_spill] sm:$0xff]  ;;  %v9382_v10 = vld [vmem:[#allocation26_spill] sm:$0xff] }
 0x2bd   : > { %1254 = vmatprep.subr.mxu1 %v1060_v52  ;;  %1363 = vmatprep.subr.mxu0 %v1128_v60  ;;  %v1121_v6 = vsel %vm1056_vm2, %v5813_v14, %v5929_v27  ;;  %v9362_v23 = vmov 0.0   ;;  %v781_v14 = vld [vmem:[%s9208_s5 + $0x28] sm:$0xff]  ;;  %v9363_v27 = vld [vmem:[#allocation13_spill] sm:$0xff]  ;;  %v1099_v62 = vsel %vm1056_vm2, %v9380_v33, %v9379_v17  ;;  %v1098_v52 = vsel %vm1056_vm2, %v9382_v10, %v9381_v59 }
 0x2be   : > { %1255 = vmatpush1.msra.mxu1 %v1059_v51  ;;  %1364 = vmatpush1.msra.mxu0 %v1127_v38  ;;  %v1113_v25 = vsel %vm1056_vm2, %v9363_v27, %v9361_v44  ;;  %v793_v60 = vld [vmem:[%s9208_s5 + $0x88] sm:$0xff]  ;;  %v9383_v38 = vld [vmem:[#allocation15_spill] sm:$0xff]  ;;  %v799_v44 = vld [vmem:[%s9208_s5 + $0xb8] sm:$0xff] }
 0x2bf   : > { %1256 = vmatprep.subr.mxu1 %v1058_v53  ;;  %1365 = vmatprep.subr.mxu0 %v1126_v13  ;;  %v1097_v51 = vsel %vm1056_vm2, %v9383_v38, %v9382_v10  ;;  %v1096_v53 = vsel %vm1056_vm2, %v6099_v50, %v6062_v63  ;;  %v9384_v13 = vld [vmem:[#allocation42_spill] sm:$0xff]  ;;  %v9387_v63 = vld [vmem:[#allocation37_spill] sm:$0xff]  ;;  %v780_v27 = vld [vmem:[%s9208_s5 + $0x20] sm:$0xff] }
 0x2c0   : > { %1257 = vmatpush1.msra.mxu1 %v1057_v16  ;;  %1366 = vmatpush1.msra.mxu0 %v1125_v15  ;;  %v1095_v16 = vsel %vm1056_vm2, %v9384_v13, %v6099_v50  ;;  %v9385_v15 = vld [vmem:[#allocation35_spill] sm:$0xff]  ;;  %v9388_v50 = vld [vmem:[#allocation24_spill] sm:$0xff] }
 0x2c1   : > { %1258 = vmatprep.subr.mxu1 %v1120_v28  ;;  %1367 = vmatprep.subr.mxu0 %v1124_v30  ;;  %v9386_v28 = vld [vmem:[#allocation45_spill] sm:$0xff]  ;;  %v9397_v17 = vld [vmem:[#allocation12_spill] sm:$0xff] }
 0x2c2   : > { %1259 = vmatpush2.msra.mxu1 %v1119_v5  ;;  %1368 = vmatpush1.msra.mxu0 %v1123_v57  ;;  %v1094_v30 = vsel %vm1056_vm2, %v9386_v28, %v9385_v15  ;;  %v796_v5 = vld [vmem:[%s9208_s5 + $0xa0] sm:$0xff]  ;;  %v1093_v57 = vsel %vm1056_vm2, %v9387_v63, %v9386_v28 }
 0x2c3   : > { %1260 = vmatprep.subr.mxu1 %v1118_v4  ;;  %1369 = vmatprep.subr.mxu0 %v1122_v35  ;;  %v9389_v4 = vld [vmem:[#allocation33_spill] sm:$0xff] }
 0x2c4   : > { %1261 = vmatpush2.msra.mxu1 %v1117_v47  ;;  %1370 = vmatpush1.msra.mxu0 %v1121_v6  ;;  %v1092_v35 = vsel %vm1056_vm2, %v9389_v4, %v9388_v50  ;;  %v9391_v6 = vld [vmem:[#allocation16_spill] sm:$0xff] }
 0x2c5   : > { %1262 = vmatprep.subr.mxu1 %v1116_v24  ;;  %4562 = vmatmul.mubr.msk.f32.vlgmr.msra.gmra.mxu0 %vm1201_vm3, %v778_v0  ;;  %v9390_v0 = vld [vmem:[#allocation28_spill] sm:$0xff]  ;;  %v9392_v24 = vld [vmem:[#allocation27_spill] sm:$0xff] }
 0x2c6   : > { %1263 = vmatpush2.msra.mxu1 %v1115_v9  ;;  %1409 = vmatprep.mubr.f32.mxu0 %v9362_v23  ;;  %v1091_v47 = vsel %vm1056_vm2, %v9390_v0, %v9389_v4  ;;  %v1090_v9 = vsel %vm1056_vm2, %v9392_v24, %v9391_v6 }
 0x2c7   : > { %1264 = vmatprep.subr.mxu1 %v1114_v61  ;;  %v9393_v61 = vld [vmem:[#allocation17_spill] sm:$0xff] }
 0x2c8   : > { %1265 = vmatpush2.msra.mxu1 %v1113_v25  ;;  %v779_v25 = vld [vmem:[%s9208_s5 + $0x18] sm:$0xff] }
 0x2c9   : > { %1266 = vmatprep.subr.mxu1 %v1112_v54  ;;  %4563 = vmatmul.mubr.msk.f32.gmra.mxu0 %vm1201_vm3, %v781_v14  ;;  %v1089_v14 = vsel %vm1056_vm2, %v9393_v61, %v9392_v24  ;;  %v783_v54 = vld [vmem:[%s9208_s5 + $0x38] sm:$0xff] }
 0x2ca   : > { %1267 = vmatpush2.msra.mxu1 %v1111_v41  ;;  %1415 = vmatprep.mubr.f32.mxu0 %v9362_v23  ;;  %v786_v41 = vld [vmem:[%s9208_s5 + $0x50] sm:$0xff] }
 0x2cb   : > { %1268 = vmatprep.subr.mxu1 %v1110_v20  ;;  %v788_v20 = vld [vmem:[%s9208_s5 + $0x60] sm:$0xff] }
 0x2cc   : > { %1269 = vmatpush2.msra.mxu1 %v1109_v58  ;;  %v795_v58 = vld [vmem:[%s9208_s5 + $0x98] sm:$0xff] }
 0x2cd   : > { %1270 = vmatprep.subr.mxu1 %v1108_v48  ;;  %4564 = vmatmul.mubr.msk.f32.gmra.mxu0 %vm1201_vm3, %v784_v2  ;;  %v792_v2 = vld [vmem:[%s9208_s5 + $0x80] sm:$0xff]  ;;  %v797_v48 = vld [vmem:[%s9208_s5 + $0xa8] sm:$0xff] }
 0x2ce   : > { %1271 = vmatpush2.msra.mxu1 %v1107_v46  ;;  %1421 = vmatprep.mubr.f32.mxu0 %v9362_v23  ;;  %v9394_v46 = vld [vmem:[#allocation11_spill] sm:$0xff] }
 0x2cf   : > { %1272 = vmatprep.subr.mxu1 %v1106_v39 }
 0x2d0   : > { %1273 = vmatpush2.msra.mxu1 %v1105_v1  ;;  %v9395_v1 = vld [vmem:[#allocation3_spill] sm:$0xff] }
 0x2d1   : > { %1274 = vmatprep.subr.mxu1 %v1104_v22  ;;  %4565 = vmatmul.mubr.msk.f32.gmra.mxu0 %vm1201_vm3, %v787_v12 }
 0x2d2   : > { %1275 = vmatpush2.msra.mxu1 %v1103_v18  ;;  %1427 = vmatprep.mubr.f32.mxu0 %v9362_v23 }
 0x2d3   : > { %1276 = vmatprep.subr.mxu1 %v1102_v42  ;;  %v9396_v42 = vld [vmem:[#allocation4_spill] sm:$0xff] }
 0x2d4   : > { %1277 = vmatpush2.msra.mxu1 %v1101_v32 }
 0x2d5   : > { %1278 = vmatprep.subr.mxu1 %v1100_v21  ;;  %4566 = vmatmul.mubr.msk.f32.gmra.mxu0 %vm1201_vm3, %v790_v40 }
 0x2d6   : > { %1279 = vmatpush2.msra.mxu1 %v1099_v62  ;;  %1433 = vmatprep.mubr.f32.mxu0 %v9362_v23 }
 0x2d7   : > { %1280 = vmatprep.subr.mxu1 %v1098_v52 }
 0x2d8   : > { %1281 = vmatpush2.msra.mxu1 %v1097_v51 }
 0x2d9   : > { %1282 = vmatprep.subr.mxu1 %v1096_v53  ;;  %4567 = vmatmul.mubr.msk.f32.gmra.mxu0 %vm1201_vm3, %v793_v60 }
 0x2da   : > { %1283 = vmatpush2.msra.mxu1 %v1095_v16  ;;  %1439 = vmatprep.mubr.f32.mxu0 %v9362_v23 }
 0x2db   : > { %1284 = vmatprep.subr.mxu1 %v1094_v30 }
 0x2dc   : > { %1285 = vmatpush2.msra.mxu1 %v1093_v57 }
 0x2dd   : > { %1286 = vmatprep.subr.mxu1 %v1092_v35  ;;  %4568 = vmatmul.mubr.msk.f32.gmra.mxu0 %vm1201_vm3, %v796_v5 }
 0x2de   : > { %1287 = vmatpush2.msra.mxu1 %v1091_v47  ;;  %1445 = vmatprep.mubr.f32.mxu0 %v9362_v23  ;;  %v9400_v47 = vld [vmem:[#allocation9_spill] sm:$0xff] }
 0x2df   : > { %1288 = vmatprep.subr.mxu1 %v1090_v9 }
 0x2e0   : > { %1289 = vmatpush2.msra.mxu1 %v1089_v14 }
 0x2e1   : > { %1291 = vmatmul.mubr.f32.vlgmr.msra.gmra.mxu1 %v776_v7  ;;  %4569 = vmatmul.mubr.msk.f32.gmra.mxu0 %vm1201_vm3, %v799_v44 }
 0x2e2   : > { %1296 = vmatprep.mubr.f32.mxu1 %v780_v27 }
 0x2e5   : > { %1297 = vmatmul.mubr.f32.gmra.mxu1 %v779_v25 }
 0x2e6   : > { %1302 = vmatprep.mubr.f32.mxu1 %v783_v54 }
 0x2e9   : > { %1303 = vmatmul.mubr.f32.gmra.mxu1 %v782_v19 }
 0x2ea   : > { %1308 = vmatprep.mubr.f32.mxu1 %v786_v41 }
 0x2ed   : > { %1309 = vmatmul.mubr.f32.gmra.mxu1 %v785_v11 }
 0x2ee   : > { %1314 = vmatprep.mubr.f32.mxu1 %v789_v3 }
 0x2f1   : > { %1315 = vmatmul.mubr.f32.gmra.mxu1 %v788_v20 }
 0x2f2   : > { %1320 = vmatprep.mubr.f32.mxu1 %v792_v2 }
 0x2f5   : > { %1321 = vmatmul.mubr.f32.gmra.mxu1 %v791_v8 }
 0x2f6   : > { %1326 = vmatprep.mubr.f32.mxu1 %v795_v58 }
 0x2f9   : > { %1327 = vmatmul.mubr.f32.gmra.mxu1 %v794_v26 }
 0x2fa   : > { %1332 = vmatprep.mubr.f32.mxu1 %v798_v55 }
 0x2fd   : > { %1333 = vmatmul.mubr.f32.gmra.mxu1 %v797_v48  ;;  %v9401_v48 = vld [vmem:[#allocation10_spill] sm:$0xff] }
 0x385   : > { %v1405_v34 = vpop.f32.mrf.mxu0 }
 0x387   : > { %v1407_v49 = vpop.f32.mrf.mxu0 }
 0x389   : > { %v1411_v59 = vpop.f32.mrf.mxu0 }
 0x38b   : > { %v1413_v51 = vpop.f32.mrf.mxu0 }
 0x38d   : > { %v1417_v9 = vpop.f32.mrf.mxu0 }
 0x38f   : > { %v1419_v11 = vpop.f32.mrf.mxu0 }
 0x3a1   : > { %v1292_v56 = vpop.f32.mrf.mxu1 }
 0x3a2   : > { %v1293_v31 = vadd.f32 %v1292_v56, %v9394_v46 }
 0x3a3   : > { %v1294_v39 = vpop.f32.mrf.mxu1 }
 0x3a4   : > { %v1406_v12 = vadd.f32 %v1405_v34, %v1293_v31  ;;  %v1295_v37 = vadd.f32 %v1294_v39, %v9394_v46  ;;  %v1423_v46 = vpop.f32.mrf.mxu0 }
 0x3a5   : > { %v1298_v29 = vpop.f32.mrf.mxu1 }
 0x3a6   : > { %v1452_v22 = vmul.f32 %v1406_v12, %v9395_v1  ;;  %v1408_v45 = vadd.f32 %v1407_v49, %v1295_v37  ;;  %v1299_v21 = vadd.f32 %v1298_v29, %v9397_v17 }
 0x3a7   : > { %v1300_v62 = vpop.f32.mrf.mxu1 }
 0x3a8   : > { %v1484_v18 = vmin.f32 %v1452_v22, 0.0  ;;  %v1453_v40 = vmul.f32 %v1408_v45, %v9396_v42  ;;  %vm1468_vm4 = vcmp.gt.f32.partialorder %v1452_v22, 0.0  ;;  %v1301_v60 = vadd.f32 %v1300_v62, %v9397_v17 }
 0x3a9   : > { %v1412_v38 = vadd.f32 %v1411_v59, %v1299_v21  ;;  %v1304_v35 = vpop.f32.mrf.mxu1  ;;  %v9402_v59 = vld [vmem:[#allocation7_spill] sm:$0xff] }
 0x3aa   : > { %v1500_v36 = vmul.f32 1.442695, %v1484_v18  ;;  %v1485_v43 = vmin.f32 %v1453_v40, 0.0  ;;  %v1414_v13 = vadd.f32 %v1413_v51, %v1301_v60  ;;  %vm1469_vm5 = vcmp.gt.f32.partialorder %v1453_v40, 0.0 }
 0x3ab   : > { %v1454_v53 = vmul.f32 %v1412_v38, %v9395_v1  ;;  %v1305_v6 = vadd.f32 %v1304_v35, %v9400_v47  ;;  %v1306_v54 = vpop.f32.mrf.mxu1 }
 0x3ac   : > { %5060 = vpow2.f32 %v1500_v36  ;;  %v1502_v32 = vmul.f32 1.442695, %v1485_v43  ;;  %v1455_v15 = vmul.f32 %v1414_v13, %v9396_v42  ;;  %v1307_v19 = vadd.f32 %v1306_v54, %v9400_v47 }
 0x3ad   : > { %v1486_v16 = vmin.f32 %v1454_v53, 0.0  ;;  %vm1470_vm6 = vcmp.gt.f32.partialorder %v1454_v53, 0.0  ;;  %v1418_v61 = vadd.f32 %v1417_v9, %v1305_v6  ;;  %v1310_v26 = vpop.f32.mrf.mxu1 }
 0x3ae   : > { %5062 = vpow2.f32 %v1502_v32  ;;  %v1487_v63 = vmin.f32 %v1455_v15, 0.0  ;;  %vm1471_vm7 = vcmp.gt.f32.partialorder %v1455_v15, 0.0  ;;  %v1420_v3 = vadd.f32 %v1419_v11, %v1307_v19 }
 0x3af   : > { %v1504_v5 = vmul.f32 1.442695, %v1486_v16  ;;  %v1456_v27 = vmul.f32 %v1418_v61, %v9395_v1  ;;  %v1311_v56 = vadd.f32 %v1310_v26, %v9401_v48  ;;  %v1312_v39 = vpop.f32.mrf.mxu1 }
 0x3b0   : > { %v1506_v50 = vmul.f32 1.442695, %v1487_v63  ;;  %v1457_v20 = vmul.f32 %v1420_v3, %v9396_v42  ;;  %v1313_v12 = vadd.f32 %v1312_v39, %v9401_v48 }
 0x3b1   : > { %5064 = vpow2.f32 %v1504_v5  ;;  %v1488_v25 = vmin.f32 %v1456_v27, 0.0  ;;  %vm1472_vm8 = vcmp.gt.f32.partialorder %v1456_v27, 0.0  ;;  %v1424_v34 = vadd.f32 %v1423_v46, %v1311_v56 }
 0x3b2   : > { %5066 = vpow2.f32 %v1506_v50  ;;  %v1489_v2 = vmin.f32 %v1457_v20, 0.0  ;;  %vm1473_vm9 = vcmp.gt.f32.partialorder %v1457_v20, 0.0 }
 0x3b3   : > { %v1508_v41 = vmul.f32 1.442695, %v1488_v25  ;;  %v1458_v37 = vmul.f32 %v1424_v34, %v9395_v1 }
 0x3b4   : > { %v1510_v8 = vmul.f32 1.442695, %v1489_v2  ;;  %v9407_v2 = vld [vmem:[#allocation8_spill] sm:$0xff] }
 0x3b5   : > { %5068 = vpow2.f32 %v1508_v41  ;;  %v1490_v49 = vmin.f32 %v1458_v37, 0.0  ;;  %vm1474_vm3 = vcmp.gt.f32.partialorder %v1458_v37, 0.0 }
 0x3b6   : > { %5070 = vpow2.f32 %v1510_v8 }
 0x3b9   : > { %v5061_v33 = vpop.eup %5060 }
 0x3ba   : > { %v4570_v10 = vadd.f32 -1.0, %v5061_v33  ;;  %v1316_v33 = vpop.f32.mrf.mxu1 }
 0x3bb   : > { %v5063_v28 = vpop.eup %5062 }
 0x3bc   : > { %v1548_v52 = vsel %vm1468_vm4, %v1452_v22, %v4570_v10  ;;  %v4571_v30 = vadd.f32 -1.0, %v5063_v28  ;;  %v1425_v22 = vpop.f32.mrf.mxu0  ;;  %v1317_v10 = vadd.f32 %v1316_v33, %v9402_v59  ;;  %v1318_v5 = vpop.f32.mrf.mxu1 }
 0x3bd   : > { %1630 = vrot.lane.b32.xlu0 %v1548_v52, %s5193_s15  ;;  %1582 = vrot.lane.b32.xlu1 %v1548_v52, %s5195_s18  ;;  %v1426_v18 = vadd.f32 %v1425_v22, %v1313_v12  ;;  %v1319_v50 = vadd.f32 %v1318_v5, %v9402_v59 }
 0x3be   : > { %v1549_v57 = vsel %vm1469_vm5, %v1453_v40, %v4571_v30  ;;  %v5065_v4 = vpop.eup %5064  ;;  %v1512_v40 = vmul.f32 1.442695, %v1490_v49  ;;  %v1322_v41 = vpop.f32.mrf.mxu1 }
 0x3bf   : > { %v4572_v0 = vadd.f32 -1.0, %v5065_v4  ;;  %v5067_v24 = vpop.eup %5066  ;;  %v1459_v43 = vmul.f32 %v1426_v18, %v9396_v42  ;;  %v1323_v8 = vadd.f32 %v1322_v41, %v9407_v2 }
 0x3c0   : > { %v4573_v44 = vadd.f32 -1.0, %v5067_v24  ;;  %5072 = vpow2.f32 %v1512_v40  ;;  %v1324_v46 = vpop.f32.mrf.mxu1 }
 0x3c1   : > { %1764 = vrot.lane.b32.xlu0 %v1548_v52, %s5194_s17  ;;  %1678 = vrot.lane.b32.xlu1 %v1548_v52, %s5191_s30  ;;  %v1550_v7 = vsel %vm1470_vm6, %v1454_v53, %v4572_v0  ;;  %v1491_v29 = vmin.f32 %v1459_v43, 0.0  ;;  %vm1475_vm4 = vcmp.gt.f32.partialorder %v1459_v43, 0.0  ;;  %v1325_v39 = vadd.f32 %v1324_v46, %v9407_v2 }
 0x3c2   : > { %v1551_v14 = vsel %vm1471_vm7, %v1455_v15, %v4573_v44  ;;  %v5069_v58 = vpop.eup %5068 }
 0x3c3   : > { %v4574_v55 = vadd.f32 -1.0, %v5069_v58  ;;  %v5071_v45 = vpop.eup %5070  ;;  %v1514_v17 = vmul.f32 1.442695, %v1491_v29 }
 0x3c4   : > { %v4575_v36 = vadd.f32 -1.0, %v5071_v45 }
 0x3c5   : > { %1724 = vrot.lane.b32.xlu0 %v1548_v52, %s5197_s20  ;;  %2134 = vrot.lane.b32.xlu1 %v1548_v52, %s5198_s21  ;;  %v1552_v31 = vsel %vm1472_vm8, %v1456_v27, %v4574_v55  ;;  %5074 = vpow2.f32 %v1514_v17 }
 0x3c6   : > { %v1553_v32 = vsel %vm1473_vm9, %v1457_v20, %v4575_v36 }
 0x3c9   : > { %1860 = vrot.lane.b32.xlu0 %v1548_v52, %s5190_s29  ;;  %1812 = vrot.lane.b32.xlu1 %v1548_v52, %s9398_s28 }
 0x3cd   : > { %1908 = vrot.lane.b32.xlu0 %v1548_v52, %s9399_s22  ;;  %1628 = vrot.lane.b32.xlu1 %v1549_v57, %s5193_s15  ;;  %v5073_v21 = vpop.eup %5072  ;;  %v1429_v52 = vpop.f32.mrf.mxu0 }
 0x3ce   : > { %v4576_v62 = vadd.f32 -1.0, %v5073_v21  ;;  %v1430_v38 = vadd.f32 %v1429_v52, %v1317_v10 }
 0x3cf   : > { %v1431_v35 = vpop.f32.mrf.mxu0 }
 0x3d0   : > { %v1554_v60 = vsel %vm1474_vm3, %v1458_v37, %v4576_v62  ;;  %v1460_v13 = vmul.f32 %v1430_v38, %v9395_v1  ;;  %v1432_v6 = vadd.f32 %v1431_v35, %v1319_v50  ;;  %v9417_v35 = vld [vmem:[#allocation5_spill] sm:$0xff] }
 0x3d1   : > { %1580 = vrot.lane.b32.xlu0 %v1549_v57, %s5195_s18  ;;  %1766 = vrot.lane.b32.xlu1 %v1549_v57, %s5194_s17  ;;  %v1435_v58 = vpop.f32.mrf.mxu0 }
 0x3d2   : > { %v5075_v51 = vpop.eup %5074  ;;  %v1492_v30 = vmin.f32 %v1460_v13, 0.0  ;;  %vm1476_vm5 = vcmp.gt.f32.partialorder %v1460_v13, 0.0  ;;  %v1436_v56 = vadd.f32 %v1435_v58, %v1323_v8 }
 0x3d3   : > { %v4577_v53 = vadd.f32 -1.0, %v5075_v51  ;;  %v1437_v37 = vpop.f32.mrf.mxu0 }
 0x3d4   : > { %v1516_v4 = vmul.f32 1.442695, %v1492_v30  ;;  %v1462_v12 = vmul.f32 %v1436_v56, %v9395_v1  ;;  %v1438_v45 = vadd.f32 %v1437_v37, %v1325_v39  ;;  %v1328_v30 = vpop.f32.mrf.mxu1 }
 0x3d5   : > { %1676 = vrot.lane.b32.xlu0 %v1549_v57, %s5191_s30  ;;  %1726 = vrot.lane.b32.xlu1 %v1549_v57, %s5197_s20  ;;  %v1555_v28 = vsel %vm1475_vm4, %v1459_v43, %v4577_v53 }
 0x3d6   : > { %5076 = vpow2.f32 %v1516_v4  ;;  %v1494_v18 = vmin.f32 %v1462_v12, 0.0  ;;  %v1463_v17 = vmul.f32 %v1438_v45, %v9396_v42  ;;  %vm1478_vm7 = vcmp.gt.f32.partialorder %v1462_v12, 0.0  ;;  %v1330_v37 = vpop.f32.mrf.mxu1 }
 0x3d8   : > { %v1520_v29 = vmul.f32 1.442695, %v1494_v18  ;;  %v1495_v59 = vmin.f32 %v1463_v17, 0.0  ;;  %vm1479_vm8 = vcmp.gt.f32.partialorder %v1463_v17, 0.0 }
 0x3d9   : > { %2132 = vrot.lane.b32.xlu0 %v1549_v57, %s5198_s21  ;;  %1862 = vrot.lane.b32.xlu1 %v1549_v57, %s5190_s29 }
 0x3dd   : > { %1814 = vrot.lane.b32.xlu0 %v1549_v57, %s9398_s28  ;;  %1910 = vrot.lane.b32.xlu1 %v1549_v57, %s9399_s22 }
 0x3e1   : > { %1728 = vrot.lane.b32.xlu0 %v1550_v7, %s5197_s20  ;;  %1586 = vrot.lane.b32.xlu1 %v1550_v7, %s5195_s18 }
 0x3e3   : > { %v5077_v19 = vpop.eup %5076 }
 0x3e4   : > { %v4578_v20 = vadd.f32 -1.0, %v5077_v19 }
 0x3e5   : > { %1584 = vrot.lane.b32.xlu0 %v1551_v14, %s5195_s18  ;;  %1682 = vrot.lane.b32.xlu1 %v1550_v7, %s5191_s30 }
 0x3e6   : > { %v1556_v48 = vsel %vm1476_vm5, %v1460_v13, %v4578_v20 }
 0x3e9   : > { %1680 = vrot.lane.b32.xlu0 %v1551_v14, %s5191_s30  ;;  %1634 = vrot.lane.b32.xlu1 %v1550_v7, %s5193_s15 }
 0x3ed   : > { %1632 = vrot.lane.b32.xlu0 %v1551_v14, %s5193_s15  ;;  %1768 = vrot.lane.b32.xlu1 %v1550_v7, %s5194_s17 }
 0x3f1   : > { %1770 = vrot.lane.b32.xlu0 %v1551_v14, %s5194_s17  ;;  %2138 = vrot.lane.b32.xlu1 %v1550_v7, %s5198_s21 }
 0x3f5   : > { %2136 = vrot.lane.b32.xlu0 %v1551_v14, %s5198_s21  ;;  %1864 = vrot.lane.b32.xlu1 %v1550_v7, %s5190_s29 }
 0x3f9   : > { %1866 = vrot.lane.b32.xlu0 %v1551_v14, %s5190_s29  ;;  %1816 = vrot.lane.b32.xlu1 %v1550_v7, %s9398_s28 }
 0x3fd   : > { %1818 = vrot.lane.b32.xlu0 %v1551_v14, %s9398_s28  ;;  %1912 = vrot.lane.b32.xlu1 %v1550_v7, %s9399_s22  ;;  %v1461_v7 = vmul.f32 %v1432_v6, %v9396_v42  ;;  %v1329_v6 = vadd.f32 %v1328_v30, %v9417_v35 }
 0x3ff   : > { %vm1477_vm6 = vcmp.gt.f32.partialorder %v1461_v7, 0.0 }
 0x401   : > { %1914 = vrot.lane.b32.xlu0 %v1551_v14, %s9399_s22  ;;  %1730 = vrot.lane.b32.xlu1 %v1551_v14, %s5197_s20  ;;  %v1493_v14 = vmin.f32 %v1461_v7, 0.0 }
 0x403   : > { %v1518_v54 = vmul.f32 1.442695, %v1493_v14 }
 0x405   : > { %1772 = vrot.lane.b32.xlu0 %v1552_v31, %s5194_s17  ;;  %1590 = vrot.lane.b32.xlu1 %v1552_v31, %s5195_s18  ;;  %5078 = vpow2.f32 %v1518_v54 }
 0x406   : > { %5080 = vpow2.f32 %v1520_v29 }
 0x409   : > { %1732 = vrot.lane.b32.xlu0 %v1552_v31, %s5197_s20  ;;  %1686 = vrot.lane.b32.xlu1 %v1552_v31, %s5191_s30 }
 0x40d   : > { %1868 = vrot.lane.b32.xlu0 %v1552_v31, %s5190_s29  ;;  %1638 = vrot.lane.b32.xlu1 %v1552_v31, %s5193_s15 }
 0x411   : > { %1820 = vrot.lane.b32.xlu0 %v1552_v31, %s9398_s28  ;;  %2142 = vrot.lane.b32.xlu1 %v1552_v31, %s5198_s21 }
 0x412   : > { %v5079_v36 = vpop.eup %5078 }
 0x415   : > { %1588 = vrot.lane.b32.xlu0 %v1553_v32, %s5195_s18  ;;  %1916 = vrot.lane.b32.xlu1 %v1552_v31, %s9399_s22 }
 0x419   : > { %1684 = vrot.lane.b32.xlu0 %v1553_v32, %s5191_s30  ;;  %1774 = vrot.lane.b32.xlu1 %v1553_v32, %s5194_s17 }
 0x41d   : > { %1636 = vrot.lane.b32.xlu0 %v1553_v32, %s5193_s15  ;;  %1734 = vrot.lane.b32.xlu1 %v1553_v32, %s5197_s20 }
 0x421   : > { %2140 = vrot.lane.b32.xlu0 %v1553_v32, %s5198_s21  ;;  %1870 = vrot.lane.b32.xlu1 %v1553_v32, %s5190_s29 }
 0x425   : > { %1918 = vrot.lane.b32.xlu0 %v1553_v32, %s9399_s22  ;;  %1822 = vrot.lane.b32.xlu1 %v1553_v32, %s9398_s28  ;;  %v4579_v32 = vadd.f32 -1.0, %v5079_v36  ;;  %v1331_v36 = vadd.f32 %v1330_v37, %v9417_v35 }
 0x427   : > { %v1557_v62 = vsel %vm1477_vm6, %v1461_v7, %v4579_v32  ;;  %v1441_v7 = vpop.f32.mrf.mxu0 }
 0x428   : > { %v1442_v41 = vadd.f32 %v1441_v7, %v1329_v6 }
 0x429   : > { %1736 = vrot.lane.b32.xlu0 %v1554_v60, %s5197_s20  ;;  %1594 = vrot.lane.b32.xlu1 %v1554_v60, %s5195_s18  ;;  %v1443_v29 = vpop.f32.mrf.mxu0 }
 0x42d   : > { %1920 = vrot.lane.b32.xlu0 %v1554_v60, %s9399_s22  ;;  %1690 = vrot.lane.b32.xlu1 %v1554_v60, %s5191_s30 }
 0x42f   : > { %v6403_v16 = vpop.permute.xlu0 %1630  ;;  %v6405_v15 = vpop.permute.xlu1 %1582 }
 0x431   : > { %1592 = vrot.lane.b32.xlu0 %v1555_v28, %s5195_s18  ;;  %1642 = vrot.lane.b32.xlu1 %v1554_v60, %s5193_s15 }
 0x433   : > { %v6409_v63 = vpop.permute.xlu0 %1764  ;;  %v6411_v57 = vpop.permute.xlu1 %1678 }
 0x435   : > { %1688 = vrot.lane.b32.xlu0 %v1555_v28, %s5191_s30  ;;  %1776 = vrot.lane.b32.xlu1 %v1554_v60, %s5194_s17 }
 0x437   : > { %v6416_v0 = vpop.permute.xlu0 %1724  ;;  %v6418_v47 = vpop.permute.xlu1 %2134 }
 0x438   : > { %9403 = vst [vmem:[#allocation18_spill] sm:$0xff] %v6418_v47 }
 0x439   : > { %1640 = vrot.lane.b32.xlu0 %v1555_v28, %s5193_s15  ;;  %2146 = vrot.lane.b32.xlu1 %v1554_v60, %s5198_s21 }
 0x43b   : > { %v6422_v24 = vpop.permute.xlu0 %1860  ;;  %v6424_v9 = vpop.permute.xlu1 %1812 }
 0x43c   : > { %9404 = vst [vmem:[#allocation23_spill] sm:$0xff] %v6422_v24  ;;  %9405 = vst [vmem:[#allocation13_spill] sm:$0xff] %v6424_v9 }
 0x43d   : > { %1778 = vrot.lane.b32.xlu0 %v1555_v28, %s5194_s17  ;;  %1872 = vrot.lane.b32.xlu1 %v1554_v60, %s5190_s29 }
 0x43f   : > { %v6429_v44 = vpop.permute.xlu0 %1908  ;;  %v6431_v61 = vpop.permute.xlu1 %1628 }
 0x440   : > { %9406 = vst [vmem:[#allocation40_spill] sm:$0xff] %v6429_v44 }
 0x441   : > { %2144 = vrot.lane.b32.xlu0 %v1555_v28, %s5198_s21  ;;  %1824 = vrot.lane.b32.xlu1 %v1554_v60, %s9398_s28  ;;  %v1522_v60 = vmul.f32 1.442695, %v1495_v59  ;;  %v1444_v59 = vadd.f32 %v1443_v29, %v1331_v36  ;;  %v9425_v29 = vld [vmem:[#allocation6_spill] sm:$0xff] }
 0x443   : > { %v6435_v27 = vpop.permute.xlu0 %1580  ;;  %v6437_v25 = vpop.permute.xlu1 %1766  ;;  %5082 = vpow2.f32 %v1522_v60  ;;  %v1465_v30 = vmul.f32 %v1444_v59, %v9396_v42 }
 0x444   : > { %v1613_v24 = vsel %vm596_vm0, %v6405_v15, %v6435_v27 }
 0x445   : > { %1874 = vrot.lane.b32.xlu0 %v1555_v28, %s5190_s29  ;;  %1738 = vrot.lane.b32.xlu1 %v1555_v28, %s5197_s20  ;;  %v1497_v6 = vmin.f32 %v1465_v30, 0.0  ;;  %vm1481_vm3 = vcmp.gt.f32.partialorder %v1465_v30, 0.0 }
 0x447   : > { %v6441_v11 = vpop.permute.xlu0 %1676  ;;  %v6443_v3 = vpop.permute.xlu1 %1726 }
 0x449   : > { %1826 = vrot.lane.b32.xlu0 %v1555_v28, %s9398_s28  ;;  %1922 = vrot.lane.b32.xlu1 %v1555_v28, %s9399_s22  ;;  %v5081_v28 = vpop.eup %5080 }
 0x44a   : > { %v4580_v4 = vadd.f32 -1.0, %v5081_v28 }
 0x44b   : > { %v6448_v26 = vpop.permute.xlu0 %2132  ;;  %v6450_v55 = vpop.permute.xlu1 %1862 }
 0x44c   : > { %9408 = vst [vmem:[#allocation38_spill] sm:$0xff] %v6448_v26  ;;  %9409 = vst [vmem:[#allocation43_spill] sm:$0xff] %v6450_v55  ;;  %v1558_v19 = vsel %vm1478_vm7, %v1462_v12, %v4580_v4  ;;  %v1612_v55 = vsel %vm596_vm0, %v6435_v27, %v6405_v15 }
 0x44d   : > { %1780 = vrot.lane.b32.xlu0 %v1556_v48, %s5194_s17  ;;  %1598 = vrot.lane.b32.xlu1 %v1556_v48, %s5195_s18 }
 0x44f   : > { %v6454_v31 = vpop.permute.xlu0 %1814  ;;  %v6456_v34 = vpop.permute.xlu1 %1910 }
 0x450   : > { %9410 = vst [vmem:[#allocation34_spill] sm:$0xff] %v6454_v31  ;;  %9411 = vst [vmem:[#allocation31_spill] sm:$0xff] %v6456_v34  ;;  %v5083_v20 = vpop.eup %5082 }
 0x451   : > { %1740 = vrot.lane.b32.xlu0 %v1556_v48, %s5197_s20  ;;  %1694 = vrot.lane.b32.xlu1 %v1556_v48, %s5191_s30  ;;  %v4581_v58 = vadd.f32 -1.0, %v5083_v20  ;;  %v1526_v20 = vmul.f32 1.442695, %v1497_v6 }
 0x453   : > { %v6462_v22 = vpop.permute.xlu0 %1728  ;;  %v6464_v49 = vpop.permute.xlu1 %1586  ;;  %v1559_v39 = vsel %vm1479_vm8, %v1463_v17, %v4581_v58 }
 0x455   : > { %1876 = vrot.lane.b32.xlu0 %v1556_v48, %s5190_s29  ;;  %1646 = vrot.lane.b32.xlu1 %v1556_v48, %s5193_s15 }
 0x457   : > { %v6468_v40 = vpop.permute.xlu0 %1584  ;;  %v6470_v43 = vpop.permute.xlu1 %1682 }
 0x459   : > { %1828 = vrot.lane.b32.xlu0 %v1556_v48, %s9398_s28  ;;  %2150 = vrot.lane.b32.xlu1 %v1556_v48, %s5198_s21 }
 0x45b   : > { %v6475_v21 = vpop.permute.xlu0 %1680  ;;  %v6477_v33 = vpop.permute.xlu1 %1634 }
 0x45d   : > { %1596 = vrot.lane.b32.xlu0 %v1557_v62, %s5195_s18  ;;  %1924 = vrot.lane.b32.xlu1 %v1556_v48, %s9399_s22  ;;  %v1464_v48 = vmul.f32 %v1442_v41, %v9395_v1 }
 0x45f   : > { %v6481_v10 = vpop.permute.xlu0 %1632  ;;  %v6483_v52 = vpop.permute.xlu1 %1768  ;;  %v1496_v12 = vmin.f32 %v1464_v48, 0.0  ;;  %vm1480_vm9 = vcmp.gt.f32.partialorder %v1464_v48, 0.0 }
 0x461   : > { %1692 = vrot.lane.b32.xlu0 %v1557_v62, %s5191_s30  ;;  %1782 = vrot.lane.b32.xlu1 %v1557_v62, %s5194_s17  ;;  %v1524_v32 = vmul.f32 1.442695, %v1496_v12  ;;  %v1334_v12 = vpop.f32.mrf.mxu1 }
 0x462   : > { %v1335_v59 = vadd.f32 %v1334_v12, %v9425_v29 }
 0x463   : > { %v6487_v38 = vpop.permute.xlu0 %1770  ;;  %v6489_v51 = vpop.permute.xlu1 %2138  ;;  %5084 = vpow2.f32 %v1524_v32 }
 0x464   : > { %9412 = vst [vmem:[#allocation29_spill] sm:$0xff] %v6489_v51  ;;  %5086 = vpow2.f32 %v1526_v20  ;;  %v1336_v51 = vpop.f32.mrf.mxu1 }
 0x465   : > { %1644 = vrot.lane.b32.xlu0 %v1557_v62, %s5193_s15  ;;  %1742 = vrot.lane.b32.xlu1 %v1557_v62, %s5197_s20  ;;  %v1337_v12 = vadd.f32 %v1336_v51, %v9425_v29 }
 0x467   : > { %v6493_v53 = vpop.permute.xlu0 %2136  ;;  %v6495_v13 = vpop.permute.xlu1 %1864 }
 0x468   : > { %9413 = vst [vmem:[#allocation21_spill] sm:$0xff] %v6493_v53  ;;  %9414 = vst [vmem:[#allocation19_spill] sm:$0xff] %v6495_v13 }
 0x469   : > { %2148 = vrot.lane.b32.xlu0 %v1557_v62, %s5198_s21  ;;  %1878 = vrot.lane.b32.xlu1 %v1557_v62, %s5190_s29 }
 0x46b   : > { %v6499_v5 = vpop.permute.xlu0 %1866  ;;  %v6501_v50 = vpop.permute.xlu1 %1816 }
 0x46c   : > { %9415 = vst [vmem:[#allocation25_spill] sm:$0xff] %v6499_v5  ;;  %9416 = vst [vmem:[#allocation14_spill] sm:$0xff] %v6501_v50 }
 0x46d   : > { %1926 = vrot.lane.b32.xlu0 %v1557_v62, %s9399_s22  ;;  %1830 = vrot.lane.b32.xlu1 %v1557_v62, %s9398_s28 }
 0x46f   : > { %v6506_v14 = vpop.permute.xlu0 %1818  ;;  %v6508_v54 = vpop.permute.xlu1 %1912 }
 0x470   : > { %9418 = vst [vmem:[#allocation41_spill] sm:$0xff] %v6506_v14  ;;  %9419 = vst [vmem:[#allocation39_spill] sm:$0xff] %v6508_v54  ;;  %v5085_v58 = vpop.eup %5084 }
 0x471   : > { %1744 = vrot.lane.b32.xlu0 %v1558_v19, %s5197_s20  ;;  %1602 = vrot.lane.b32.xlu1 %v1558_v19, %s5195_s18  ;;  %v4582_v32 = vadd.f32 -1.0, %v5085_v58  ;;  %v5087_v44 = vpop.eup %5086 }
 0x473   : > { %v6512_v2 = vpop.permute.xlu0 %1914  ;;  %v6514_v8 = vpop.permute.xlu1 %1730  ;;  %v1560_v47 = vsel %vm1480_vm9, %v1464_v48, %v4582_v32 }
 0x474   : > { %9420 = vst [vmem:[#allocation44_spill] sm:$0xff] %v6512_v2 }
 0x475   : > { %1928 = vrot.lane.b32.xlu0 %v1558_v19, %s9399_s22  ;;  %1698 = vrot.lane.b32.xlu1 %v1558_v19, %s5191_s30 }
 0x477   : > { %v6519_v56 = vpop.permute.xlu0 %1772  ;;  %v6521_v46 = vpop.permute.xlu1 %1590 }
 0x479   : > { %1600 = vrot.lane.b32.xlu0 %v1559_v39, %s5195_s18  ;;  %1650 = vrot.lane.b32.xlu1 %v1558_v19, %s5193_s15 }
 0x47b   : > { %v6525_v18 = vpop.permute.xlu0 %1732  ;;  %v6527_v45 = vpop.permute.xlu1 %1686 }
 0x47d   : > { %1696 = vrot.lane.b32.xlu0 %v1559_v39, %s5191_s30  ;;  %1784 = vrot.lane.b32.xlu1 %v1558_v19, %s5194_s17 }
 0x47f   : > { %v6532_v62 = vpop.permute.xlu0 %1868  ;;  %v6534_v17 = vpop.permute.xlu1 %1638 }
 0x480   : > { %9421 = vst [vmem:[#allocation36_spill] sm:$0xff] %v6532_v62 }
 0x481   : > { %1648 = vrot.lane.b32.xlu0 %v1559_v39, %s5193_s15  ;;  %2154 = vrot.lane.b32.xlu1 %v1558_v19, %s5198_s21 }
 0x483   : > { %v6538_v60 = vpop.permute.xlu0 %1820  ;;  %v6540_v28 = vpop.permute.xlu1 %2142 }
 0x484   : > { %9422 = vst [vmem:[#allocation32_spill] sm:$0xff] %v6538_v60  ;;  %9423 = vst [vmem:[#allocation30_spill] sm:$0xff] %v6540_v28 }
 0x485   : > { %1786 = vrot.lane.b32.xlu0 %v1559_v39, %s5194_s17  ;;  %1880 = vrot.lane.b32.xlu1 %v1558_v19, %s5190_s29 }
 0x487   : > { %v6545_v4 = vpop.permute.xlu0 %1588  ;;  %v6547_v35 = vpop.permute.xlu1 %1916 }
 0x488   : > { %9424 = vst [vmem:[#allocation22_spill] sm:$0xff] %v6547_v35 }
 0x489   : > { %2152 = vrot.lane.b32.xlu0 %v1559_v39, %s5198_s21  ;;  %1832 = vrot.lane.b32.xlu1 %v1558_v19, %s9398_s28  ;;  %v1447_v19 = vpop.f32.mrf.mxu0 }
 0x48a   : > { %v1448_v26 = vadd.f32 %v1447_v19, %v1335_v59 }
 0x48b   : > { %v6551_v7 = vpop.permute.xlu0 %1684  ;;  %v6553_v41 = vpop.permute.xlu1 %1774 }
 0x48c   : > { %v1449_v53 = vpop.f32.mrf.mxu0 }
 0x48d   : > { %1882 = vrot.lane.b32.xlu0 %v1559_v39, %s5190_s29  ;;  %1746 = vrot.lane.b32.xlu1 %v1559_v39, %s5197_s20  ;;  %v1450_v19 = vadd.f32 %v1449_v53, %v1337_v12 }
 0x48f   : > { %v6557_v37 = vpop.permute.xlu0 %1636  ;;  %v6559_v36 = vpop.permute.xlu1 %1734 }
 0x491   : > { %1834 = vrot.lane.b32.xlu0 %v1559_v39, %s9398_s28  ;;  %1930 = vrot.lane.b32.xlu1 %v1559_v39, %s9399_s22  ;;  %v1466_v39 = vmul.f32 %v1448_v26, %v9395_v1  ;;  %v4583_v26 = vadd.f32 -1.0, %v5087_v44  ;;  %v1467_v1 = vmul.f32 %v1450_v19, %v9396_v42 }
 0x493   : > { %v6564_v6 = vpop.permute.xlu0 %2140  ;;  %v6566_v23 = vpop.permute.xlu1 %1870  ;;  %v1498_v59 = vmin.f32 %v1466_v39, 0.0  ;;  %v1561_v12 = vsel %vm1481_vm3, %v1465_v30, %v4583_v26  ;;  %vm1482_vm4 = vcmp.gt.f32.partialorder %v1466_v39, 0.0  ;;  %vm1483_vm5 = vcmp.gt.f32.partialorder %v1467_v1, 0.0 }
 0x494   : > { %9426 = vst [vmem:[#allocation20_spill] sm:$0xff] %v6564_v6  ;;  %9427 = vst [vmem:[#allocation26_spill] sm:$0xff] %v6566_v23  ;;  %v1499_v6 = vmin.f32 %v1467_v1, 0.0 }
 0x495   : > { %1788 = vrot.lane.b32.xlu0 %v1560_v47, %s5194_s17  ;;  %1606 = vrot.lane.b32.xlu1 %v1560_v47, %s5195_s18  ;;  %v1528_v29 = vmul.f32 1.442695, %v1498_v59 }
 0x496   : > { %v1530_v19 = vmul.f32 1.442695, %v1499_v6 }
 0x497   : > { %v6570_v58 = vpop.permute.xlu0 %1918  ;;  %v6572_v20 = vpop.permute.xlu1 %1822  ;;  %5088 = vpow2.f32 %v1528_v29 }
 0x498   : > { %9428 = vst [vmem:[#allocation15_spill] sm:$0xff] %v6570_v58  ;;  %9429 = vst [vmem:[#allocation42_spill] sm:$0xff] %v6572_v20  ;;  %5090 = vpow2.f32 %v1530_v19 }
 0x499   : > { %1748 = vrot.lane.b32.xlu0 %v1560_v47, %s5197_s20  ;;  %1702 = vrot.lane.b32.xlu1 %v1560_v47, %s5191_s30 }
 0x49b   : > { %v6578_v48 = vpop.permute.xlu0 %1736  ;;  %v6580_v32 = vpop.permute.xlu1 %1594 }
 0x49d   : > { %1884 = vrot.lane.b32.xlu0 %v1560_v47, %s5190_s29  ;;  %1654 = vrot.lane.b32.xlu1 %v1560_v47, %s5193_s15 }
 0x49f   : > { %v6584_v34 = vpop.permute.xlu0 %1920  ;;  %v6586_v51 = vpop.permute.xlu1 %1690 }
 0x4a0   : > { %9430 = vst [vmem:[#allocation35_spill] sm:$0xff] %v6584_v34 }
 0x4a1   : > { %1836 = vrot.lane.b32.xlu0 %v1560_v47, %s9398_s28  ;;  %2158 = vrot.lane.b32.xlu1 %v1560_v47, %s5198_s21 }
 0x4a3   : > { %v6591_v28 = vpop.permute.xlu0 %1592  ;;  %v6593_v53 = vpop.permute.xlu1 %1642 }
 0x4a4   : > { %v5089_v26 = vpop.eup %5088 }
 0x4a5   : > { %1604 = vrot.lane.b32.xlu0 %v1561_v12, %s5195_s18  ;;  %1932 = vrot.lane.b32.xlu1 %v1560_v47, %s9399_s22  ;;  %v4584_v2 = vadd.f32 -1.0, %v5089_v26  ;;  %v5091_v31 = vpop.eup %5090 }
 0x4a6   : > { %v4585_v26 = vadd.f32 -1.0, %v5091_v31 }
 0x4a7   : > { %v6597_v44 = vpop.permute.xlu0 %1688  ;;  %v6599_v59 = vpop.permute.xlu1 %1776  ;;  %v1562_v9 = vsel %vm1482_vm4, %v1466_v39, %v4584_v2 }
 0x4a8   : > { %v1563_v2 = vsel %vm1483_vm5, %v1467_v1, %v4585_v26 }
 0x4a9   : > { %1700 = vrot.lane.b32.xlu0 %v1561_v12, %s5191_s30  ;;  %1790 = vrot.lane.b32.xlu1 %v1561_v12, %s5194_s17 }
 0x4ab   : > { %v6603_v42 = vpop.permute.xlu0 %1640  ;;  %v6605_v54 = vpop.permute.xlu1 %2146 }
 0x4ac   : > { %9431 = vst [vmem:[#allocation45_spill] sm:$0xff] %v6605_v54 }
 0x4ad   : > { %1652 = vrot.lane.b32.xlu0 %v1561_v12, %s5193_s15  ;;  %1750 = vrot.lane.b32.xlu1 %v1561_v12, %s5197_s20 }
 0x4af   : > { %v6609_v30 = vpop.permute.xlu0 %1778  ;;  %v6611_v47 = vpop.permute.xlu1 %1872 }
 0x4b0   : > { %9432 = vst [vmem:[#allocation37_spill] sm:$0xff] %v6611_v47 }
 0x4b1   : > { %2156 = vrot.lane.b32.xlu0 %v1561_v12, %s5198_s21  ;;  %1886 = vrot.lane.b32.xlu1 %v1561_v12, %s5190_s29 }
 0x4b3   : > { %v6615_v6 = vpop.permute.xlu0 %2144  ;;  %v6617_v29 = vpop.permute.xlu1 %1824 }
 0x4b4   : > { %9433 = vst [vmem:[#allocation24_spill] sm:$0xff] %v6615_v6  ;;  %9434 = vst [vmem:[#allocation33_spill] sm:$0xff] %v6617_v29 }
 0x4b5   : > { %1934 = vrot.lane.b32.xlu0 %v1561_v12, %s9399_s22  ;;  %1838 = vrot.lane.b32.xlu1 %v1561_v12, %s9398_s28 }
 0x4b7   : > { %v6621_v19 = vpop.permute.xlu0 %1874  ;;  %v6623_v54 = vpop.permute.xlu1 %1738 }
 0x4b8   : > { %9435 = vst [vmem:[#allocation28_spill] sm:$0xff] %v6621_v19  ;;  %v1796_v19 = vsel %vm692_vm13, %v6409_v63, %v6437_v25 }
 0x4b9   : > { %1752 = vrot.lane.b32.xlu0 %v1562_v9, %s5197_s20  ;;  %1610 = vrot.lane.b32.xlu1 %v1562_v9, %s5195_s18 }
 0x4bb   : > { %v6627_v35 = vpop.permute.xlu0 %1826  ;;  %v6629_v6 = vpop.permute.xlu1 %1922 }
 0x4bc   : > { %9436 = vst [vmem:[#allocation16_spill] sm:$0xff] %v6627_v35  ;;  %9437 = vst [vmem:[#allocation27_spill] sm:$0xff] %v6629_v6 }
 0x4bd   : > { %1936 = vrot.lane.b32.xlu0 %v1562_v9, %s9399_s22  ;;  %1706 = vrot.lane.b32.xlu1 %v1562_v9, %s5191_s30 }
 0x4bf   : > { %v6633_v12 = vpop.permute.xlu0 %1780  ;;  %v6635_v58 = vpop.permute.xlu1 %1598 }
 0x4c1   : > { %1608 = vrot.lane.b32.xlu0 %v1563_v2, %s5195_s18  ;;  %1658 = vrot.lane.b32.xlu1 %v1562_v9, %s5193_s15  ;;  %s5199_s18 = smov 64  }
 0x4c3   : > { %v6639_v39 = vpop.permute.xlu0 %1740  ;;  %v6641_v50 = vpop.permute.xlu1 %1694 }
 0x4c5   : > { %1704 = vrot.lane.b32.xlu0 %v1563_v2, %s5191_s30  ;;  %1792 = vrot.lane.b32.xlu1 %v1562_v9, %s5194_s17 }
 0x4c7   : > { %v6645_v31 = vpop.permute.xlu0 %1876  ;;  %v6647_v14 = vpop.permute.xlu1 %1646 }
 0x4c9   : > { %1656 = vrot.lane.b32.xlu0 %v1563_v2, %s5193_s15  ;;  %2162 = vrot.lane.b32.xlu1 %v1562_v9, %s5198_s21 }
 0x4cb   : > { %v6651_v1 = vpop.permute.xlu0 %1828  ;;  %v6653_v26 = vpop.permute.xlu1 %2150 }
 0x4cc   : > { %9438 = vst [vmem:[#allocation17_spill] sm:$0xff] %v6651_v1  ;;  %9439 = vst [vmem:[#allocation11_spill] sm:$0xff] %v6653_v26 }
 0x4cd   : > { %1794 = vrot.lane.b32.xlu0 %v1563_v2, %s5194_s17  ;;  %1888 = vrot.lane.b32.xlu1 %v1562_v9, %s5190_s29 }
 0x4cf   : > { %v6657_v34 = vpop.permute.xlu0 %1596  ;;  %v6659_v6 = vpop.permute.xlu1 %1924 }
 0x4d0   : > { %9440 = vst [vmem:[#allocation12_spill] sm:$0xff] %v6659_v6 }
 0x4d1   : > { %2160 = vrot.lane.b32.xlu0 %v1563_v2, %s5198_s21  ;;  %1840 = vrot.lane.b32.xlu1 %v1562_v9, %s9398_s28 }
 0x4d3   : > { %v6663_v60 = vpop.permute.xlu0 %1692  ;;  %v6665_v20 = vpop.permute.xlu1 %1782 }
 0x4d5   : > { %1890 = vrot.lane.b32.xlu0 %v1563_v2, %s5190_s29  ;;  %1754 = vrot.lane.b32.xlu1 %v1563_v2, %s5197_s20 }
 0x4d7   : > { %v6669_v26 = vpop.permute.xlu0 %1644  ;;  %v6671_v29 = vpop.permute.xlu1 %1742 }
 0x4d9   : > { %1842 = vrot.lane.b32.xlu0 %v1563_v2, %s9398_s28  ;;  %1938 = vrot.lane.b32.xlu1 %v1563_v2, %s9399_s22 }
 0x4db   : > { %v6675_v6 = vpop.permute.xlu0 %2148  ;;  %v6677_v35 = vpop.permute.xlu1 %1878 }
 0x4dc   : > { %9441 = vst [vmem:[#allocation9_spill] sm:$0xff] %v6675_v6 }
 0x4dd   : > { %2168 = vrot.lane.b32.xlu0 %v6435_v27, %s5198_s21  ;;  %2356 = vrot.lane.b32.xlu1 %v6409_v63, %s5198_s21 }
 0x4df   : > { %v6683_v9 = vpop.permute.xlu0 %1926  ;;  %v6685_v1 = vpop.permute.xlu1 %1830 }
 0x4e0   : > { %9442 = vst [vmem:[#allocation10_spill] sm:$0xff] %v6683_v9  ;;  %9443 = vst [vmem:[#allocation7_spill] sm:$0xff] %v6685_v1 }
 0x4e1   : > { %2264 = vrot.lane.b32.xlu0 %v6441_v11, %s5198_s21  ;;  %2308 = vrot.lane.b32.xlu1 %v6416_v0, %s5198_s21 }
 0x4e3   : > { %v6691_v2 = vpop.permute.xlu0 %1744  ;;  %v6693_v6 = vpop.permute.xlu1 %1602 }
 0x4e5   : > { %2216 = vrot.lane.b32.xlu0 %v6431_v61, %s5198_s21  ;;  %2166 = vrot.lane.b32.xlu1 %v1613_v24, %s5198_s21  ;;  %v1797_v24 = vsel %vm692_vm13, %v6437_v25, %v6409_v63 }
 0x4e7   : > { %v6701_v9 = vpop.permute.xlu0 %1928  ;;  %v6703_v1 = vpop.permute.xlu1 %1698 }
 0x4e8   : > { %9444 = vst [vmem:[#allocation8_spill] sm:$0xff] %v6701_v9  ;;  %v1709_v9 = vsel %vm646_vm11, %v6411_v57, %v6441_v11 }
 0x4e9   : > { %2312 = vrot.lane.b32.xlu0 %v6443_v3, %s5198_s21  ;;  %2164 = vrot.lane.b32.xlu1 %v1612_v55, %s5198_s21  ;;  %v1708_v55 = vsel %vm646_vm11, %v6441_v11, %v6411_v57  ;;  %v1615_v11 = vsel %vm596_vm0, %v6464_v49, %v6468_v40 }
 0x4eb   : > { %v6711_v13 = vpop.permute.xlu0 %1600  ;;  %v6713_v5 = vpop.permute.xlu1 %1650 }
 0x4ed   : > { %2360 = vrot.lane.b32.xlu0 %v1797_v24, %s5198_s21  ;;  %2262 = vrot.lane.b32.xlu1 %v1709_v9, %s5198_s21  ;;  %v1661_v9 = vsel %vm621_vm14, %v6403_v16, %v6431_v61 }
 0x4ef   : > { %v6723_v15 = vpop.permute.xlu0 %1696  ;;  %v6725_v27 = vpop.permute.xlu1 %1784 }
 0x4f1   : > { %2362 = vrot.lane.b32.xlu0 %v6483_v52, %s5198_s21  ;;  %2260 = vrot.lane.b32.xlu1 %v1708_v55, %s5198_s21  ;;  %v1660_v55 = vsel %vm621_vm14, %v6431_v61, %v6403_v16 }
 0x4f3   : > { %v6733_v62 = vpop.permute.xlu0 %1648  ;;  %v6735_v23 = vpop.permute.xlu1 %2154 }
 0x4f4   : > { %9445 = vst [vmem:[#allocation5_spill] sm:$0xff] %v6735_v23 }
 0x4f5   : > { %2314 = vrot.lane.b32.xlu0 %v6462_v22, %s5198_s21  ;;  %2214 = vrot.lane.b32.xlu1 %v1661_v9, %s5198_s21  ;;  %v1614_v9 = vsel %vm596_vm0, %v6468_v40, %v6464_v49  ;;  %v1756_v49 = vsel %vm671_vm1, %v6416_v0, %v6443_v3  ;;  %v1663_v3 = vsel %vm621_vm14, %v6477_v33, %v6481_v10 }
 0x4f7   : > { %v6743_v24 = vpop.permute.xlu0 %1786  ;;  %v6745_v57 = vpop.permute.xlu1 %1880 }
 0x4f9   : > { %2172 = vrot.lane.b32.xlu0 %v1615_v11, %s5198_s21  ;;  %2212 = vrot.lane.b32.xlu1 %v1660_v55, %s5198_s21  ;;  %v1711_v11 = vsel %vm646_vm11, %v6470_v43, %v6475_v21 }
 0x4fb   : > { %v6755_v23 = vpop.permute.xlu0 %2152  ;;  %v6757_v47 = vpop.permute.xlu1 %1832 }
 0x4fc   : > { %9446 = vst [vmem:[#allocation6_spill] sm:$0xff] %v6755_v23  ;;  %9447 = vst [vmem:[#allocation46_spill] sm:$0xff] %v6757_v47 }
 0x4fd   : > { %2170 = vrot.lane.b32.xlu0 %v1614_v9, %s5198_s21  ;;  %2358 = vrot.lane.b32.xlu1 %v1796_v19, %s5198_s21  ;;  %v1710_v19 = vsel %vm646_vm11, %v6475_v21, %v6470_v43 }
 0x4ff   : > { %v6767_v16 = vpop.permute.xlu0 %1882  ;;  %v6769_v61 = vpop.permute.xlu1 %1746 }
 0x501   : > { %2268 = vrot.lane.b32.xlu0 %v1711_v11, %s5198_s21  ;;  %2310 = vrot.lane.b32.xlu1 %v1756_v49, %s5198_s21 }
 0x503   : > { %v6779_v63 = vpop.permute.xlu0 %1834  ;;  %v6781_v25 = vpop.permute.xlu1 %1930 }
 0x504   : > { %9448 = vst [vmem:[#allocation47_spill] sm:$0xff] %v6779_v63  ;;  %9449 = vst [vmem:[#allocation48_spill] sm:$0xff] %v6781_v25 }
 0x505   : > { %2266 = vrot.lane.b32.xlu0 %v1710_v19, %s5198_s21  ;;  %2174 = vrot.lane.b32.xlu1 %v6468_v40, %s5198_s21  ;;  %v1662_v40 = vsel %vm621_vm14, %v6481_v10, %v6477_v33 }
 0x507   : > { %v6789_v55 = vpop.permute.xlu0 %1788  ;;  %v6791_v0 = vpop.permute.xlu1 %1606 }
 0x509   : > { %2220 = vrot.lane.b32.xlu0 %v1663_v3, %s5198_s21  ;;  %2270 = vrot.lane.b32.xlu1 %v6475_v21, %s5198_s21  ;;  %v1798_v21 = vsel %vm692_vm13, %v6483_v52, %v6487_v38  ;;  %v1799_v3 = vsel %vm692_vm13, %v6487_v38, %v6483_v52 }
 0x50b   : > { %v6799_v9 = vpop.permute.xlu0 %1748  ;;  %v6801_v43 = vpop.permute.xlu1 %1702 }
 0x50d   : > { %2218 = vrot.lane.b32.xlu0 %v1662_v40, %s5198_s21  ;;  %2222 = vrot.lane.b32.xlu1 %v6481_v10, %s5198_s21  ;;  %v1757_v10 = vsel %vm671_vm1, %v6462_v22, %v6514_v8 }
 0x50f   : > { %v6809_v11 = vpop.permute.xlu0 %1884  ;;  %v6811_v49 = vpop.permute.xlu1 %1654 }
 0x511   : > { %2364 = vrot.lane.b32.xlu0 %v1798_v21, %s5198_s21  ;;  %2318 = vrot.lane.b32.xlu1 %v6514_v8, %s5198_s21  ;;  %v1617_v8 = vsel %vm596_vm0, %v6521_v46, %v6545_v4 }
 0x513   : > { %v6819_v19 = vpop.permute.xlu0 %1836  ;;  %v6821_v33 = vpop.permute.xlu1 %2158 }
 0x514   : > { %9450 = vst [vmem:[#allocation49_spill] sm:$0xff] %v6819_v19  ;;  %9451 = vst [vmem:[#allocation50_spill] sm:$0xff] %v6821_v33  ;;  %v1616_v33 = vsel %vm596_vm0, %v6545_v4, %v6521_v46  ;;  %v1800_v19 = vsel %vm692_vm13, %v6519_v56, %v6553_v41 }
 0x515   : > { %2316 = vrot.lane.b32.xlu0 %v1757_v10, %s5198_s21  ;;  %2366 = vrot.lane.b32.xlu1 %v1799_v3, %s5198_s21 }
 0x517   : > { %v6831_v40 = vpop.permute.xlu0 %1604  ;;  %v6833_v21 = vpop.permute.xlu1 %1932 }
 0x518   : > { %9452 = vst [vmem:[#allocation51_spill] sm:$0xff] %v6833_v21 }
 0x519   : > { %2180 = vrot.lane.b32.xlu0 %v6545_v4, %s5198_s21  ;;  %2368 = vrot.lane.b32.xlu1 %v6519_v56, %s5198_s21 }
 0x51b   : > { %v6839_v23 = vpop.permute.xlu0 %1700  ;;  %v6841_v22 = vpop.permute.xlu1 %1790 }
 0x51d   : > { %2276 = vrot.lane.b32.xlu0 %v6551_v7, %s5198_s21  ;;  %2320 = vrot.lane.b32.xlu1 %v6525_v18, %s5198_s21 }
 0x51f   : > { %v6847_v52 = vpop.permute.xlu0 %1652  ;;  %v6849_v38 = vpop.permute.xlu1 %1750 }
 0x521   : > { %2228 = vrot.lane.b32.xlu0 %v6557_v37, %s5198_s21  ;;  %2178 = vrot.lane.b32.xlu1 %v1617_v8, %s5198_s21  ;;  %v1801_v8 = vsel %vm692_vm13, %v6553_v41, %v6519_v56 }
 0x523   : > { %v6857_v10 = vpop.permute.xlu0 %2156  ;;  %v6859_v3 = vpop.permute.xlu1 %1886 }
 0x524   : > { %9453 = vst [vmem:[#allocation52_spill] sm:$0xff] %v6857_v10  ;;  %v1713_v10 = vsel %vm646_vm11, %v6527_v45, %v6551_v7 }
 0x525   : > { %2324 = vrot.lane.b32.xlu0 %v6559_v36, %s5198_s21  ;;  %2176 = vrot.lane.b32.xlu1 %v1616_v33, %s5198_s21  ;;  %v1712_v33 = vsel %vm646_vm11, %v6551_v7, %v6527_v45  ;;  %v1619_v7 = vsel %vm596_vm0, %v6580_v32, %v6591_v28 }
 0x527   : > { %v6867_v25 = vpop.permute.xlu0 %1934  ;;  %v6869_v21 = vpop.permute.xlu1 %1838 }
 0x528   : > { %9454 = vst [vmem:[#allocation53_spill] sm:$0xff] %v6867_v25 }
 0x529   : > { %2372 = vrot.lane.b32.xlu0 %v1801_v8, %s5198_s21  ;;  %2274 = vrot.lane.b32.xlu1 %v1713_v10, %s5198_s21  ;;  %v1665_v10 = vsel %vm621_vm14, %v6534_v17, %v6557_v37 }
 0x52b   : > { %v6879_v46 = vpop.permute.xlu0 %1752  ;;  %v6881_v4 = vpop.permute.xlu1 %1610 }
 0x52d   : > { %2374 = vrot.lane.b32.xlu0 %v6599_v59, %s5198_s21  ;;  %2272 = vrot.lane.b32.xlu1 %v1712_v33, %s5198_s21  ;;  %v1664_v33 = vsel %vm621_vm14, %v6557_v37, %v6534_v17 }
 0x52f   : > { %v6889_v25 = vpop.permute.xlu0 %1936  ;;  %v6891_v47 = vpop.permute.xlu1 %1706 }
 0x530   : > { %9455 = vst [vmem:[#allocation54_spill] sm:$0xff] %v6889_v25 }
 0x531   : > { %2326 = vrot.lane.b32.xlu0 %v6578_v48, %s5198_s21  ;;  %2226 = vrot.lane.b32.xlu1 %v1665_v10, %s5198_s21  ;;  %v1618_v10 = vsel %vm596_vm0, %v6591_v28, %v6580_v32  ;;  %v1758_v32 = vsel %vm671_vm1, %v6525_v18, %v6559_v36  ;;  %v1667_v36 = vsel %vm621_vm14, %v6593_v53, %v6603_v42 }
 0x533   : > { %v6899_v8 = vpop.permute.xlu0 %1608  ;;  %v6901_v45 = vpop.permute.xlu1 %1658 }
 0x535   : > { %2184 = vrot.lane.b32.xlu0 %v1619_v7, %s5198_s21  ;;  %2224 = vrot.lane.b32.xlu1 %v1664_v33, %s5198_s21  ;;  %v1715_v7 = vsel %vm646_vm11, %v6586_v51, %v6597_v44 }
 0x537   : > { %v6911_v63 = vpop.permute.xlu0 %1704  ;;  %v6913_v25 = vpop.permute.xlu1 %1792 }
 0x539   : > { %2182 = vrot.lane.b32.xlu0 %v1618_v10, %s5198_s21  ;;  %2370 = vrot.lane.b32.xlu1 %v1800_v19, %s5198_s21  ;;  %v1714_v19 = vsel %vm646_vm11, %v6597_v44, %v6586_v51 }
 0x53b   : > { %v6923_v17 = vpop.permute.xlu0 %1656  ;;  %v6925_v37 = vpop.permute.xlu1 %2162 }
 0x53d   : > { %2280 = vrot.lane.b32.xlu0 %v1715_v7, %s5198_s21  ;;  %2322 = vrot.lane.b32.xlu1 %v1758_v32, %s5198_s21 }
 0x53f   : > { %v6935_v56 = vpop.permute.xlu0 %1794  ;;  %v6937_v41 = vpop.permute.xlu1 %1888 }
 0x541   : > { %2278 = vrot.lane.b32.xlu0 %v1714_v19, %s5198_s21  ;;  %2186 = vrot.lane.b32.xlu1 %v6591_v28, %s5198_s21  ;;  %v1666_v28 = vsel %vm621_vm14, %v6603_v42, %v6593_v53 }
 0x543   : > { %v6945_v33 = vpop.permute.xlu0 %2160  ;;  %v6947_v18 = vpop.permute.xlu1 %1840 }
 0x545   : > { %2232 = vrot.lane.b32.xlu0 %v1667_v36, %s5198_s21  ;;  %2282 = vrot.lane.b32.xlu1 %v6597_v44, %s5198_s21  ;;  %v1802_v44 = vsel %vm692_vm13, %v6599_v59, %v6609_v30  ;;  %v1803_v36 = vsel %vm692_vm13, %v6609_v30, %v6599_v59  ;;  %v1621_v30 = vsel %vm596_vm0, %v6635_v58, %v6657_v34 }
 0x547   : > { %v6955_v10 = vpop.permute.xlu0 %1890  ;;  %v6957_v51 = vpop.permute.xlu1 %1754 }
 0x549   : > { %2230 = vrot.lane.b32.xlu0 %v1666_v28, %s5198_s21  ;;  %2234 = vrot.lane.b32.xlu1 %v6603_v42, %s5198_s21  ;;  %v1759_v42 = vsel %vm671_vm1, %v6578_v48, %v6623_v54 }
 0x54b   : > { %v6965_v7 = vpop.permute.xlu0 %1842  ;;  %v6967_v32 = vpop.permute.xlu1 %1938 }
 0x54d   : > { %2376 = vrot.lane.b32.xlu0 %v1802_v44, %s5198_s21  ;;  %2330 = vrot.lane.b32.xlu1 %v6623_v54, %s5198_s21 }
 0x54f   : > { %v6975_v19 = vpop.permute.xlu0 %2168  ;;  %v6977_v53 = vpop.permute.xlu1 %2356 }
 0x550   : > { %9456 = vst [vmem:[#allocation55_spill] sm:$0xff] %v6977_v53 }
 0x551   : > { %2328 = vrot.lane.b32.xlu0 %v1759_v42, %s5198_s21  ;;  %2378 = vrot.lane.b32.xlu1 %v1803_v36, %s5198_s21 }
 0x553   : > { %v6987_v28 = vpop.permute.xlu0 %2264  ;;  %v6989_v44 = vpop.permute.xlu1 %2308 }
 0x554   : > { %9457 = vst [vmem:[#allocation56_spill] sm:$0xff] %v6987_v28  ;;  %9458 = vst [vmem:[#allocation57_spill] sm:$0xff] %v6989_v44 }
 0x555   : > { %2192 = vrot.lane.b32.xlu0 %v6657_v34, %s5198_s21  ;;  %2380 = vrot.lane.b32.xlu1 %v6633_v12, %s5198_s21 }
 0x557   : > { %v6995_v53 = vpop.permute.xlu0 %2216  ;;  %v6997_v54 = vpop.permute.xlu1 %2166 }
 0x558   : > { %9459 = vst [vmem:[#allocation58_spill] sm:$0xff] %v6995_v53  ;;  %v1620_v53 = vsel %vm596_vm0, %v6657_v34, %v6635_v58 }
 0x559   : > { %2288 = vrot.lane.b32.xlu0 %v6663_v60, %s5198_s21  ;;  %2332 = vrot.lane.b32.xlu1 %v6639_v39, %s5198_s21 }
 0x55b   : > { %v7003_v48 = vpop.permute.xlu0 %2312  ;;  %v7005_v59 = vpop.permute.xlu1 %2164 }
 0x55c   : > { %9460 = vst [vmem:[#allocation59_spill] sm:$0xff] %v7003_v48 }
 0x55d   : > { %2240 = vrot.lane.b32.xlu0 %v6669_v26, %s5198_s21  ;;  %2190 = vrot.lane.b32.xlu1 %v1621_v30, %s5198_s21  ;;  %v1805_v30 = vsel %vm692_vm13, %v6665_v20, %v6633_v12 }
 0x55f   : > { %v7013_v42 = vpop.permute.xlu0 %2360  ;;  %v7015_v36 = vpop.permute.xlu1 %2262 }
 0x560   : > { %9461 = vst [vmem:[#allocation60_spill] sm:$0xff] %v7015_v36  ;;  %v1717_v36 = vsel %vm646_vm11, %v6641_v50, %v6663_v60 }
 0x561   : > { %2336 = vrot.lane.b32.xlu0 %v6671_v29, %s5198_s21  ;;  %2188 = vrot.lane.b32.xlu1 %v1620_v53, %s5198_s21  ;;  %v1716_v53 = vsel %vm646_vm11, %v6663_v60, %v6641_v50  ;;  %v1623_v60 = vsel %vm596_vm0, %v6693_v6, %v6711_v13 }
 0x563   : > { %v7023_v44 = vpop.permute.xlu0 %2362  ;;  %v7025_v48 = vpop.permute.xlu1 %2260 }
 0x564   : > { %9462 = vst [vmem:[#allocation61_spill] sm:$0xff] %v7025_v48 }
 0x565   : > { %2384 = vrot.lane.b32.xlu0 %v1805_v30, %s5198_s21  ;;  %2286 = vrot.lane.b32.xlu1 %v1717_v36, %s5198_s21  ;;  %v1669_v36 = vsel %vm621_vm14, %v6647_v14, %v6669_v26 }
 0x567   : > { %v7035_v34 = vpop.permute.xlu0 %2314  ;;  %v7037_v58 = vpop.permute.xlu1 %2214 }
 0x568   : > { %9463 = vst [vmem:[#allocation62_spill] sm:$0xff] %v7035_v34  ;;  %9464 = vst [vmem:[#allocation63_spill] sm:$0xff] %v7037_v58  ;;  %v1804_v34 = vsel %vm692_vm13, %v6633_v12, %v6665_v20 }
 0x569   : > { %2386 = vrot.lane.b32.xlu0 %v6725_v27, %s5198_s21  ;;  %2284 = vrot.lane.b32.xlu1 %v1716_v53, %s5198_s21  ;;  %v1668_v53 = vsel %vm621_vm14, %v6669_v26, %v6647_v14 }
 0x56b   : > { %v7045_v48 = vpop.permute.xlu0 %2172  ;;  %v7047_v28 = vpop.permute.xlu1 %2212 }
 0x56c   : > { %9465 = vst [vmem:[#allocation64_spill] sm:$0xff] %v7047_v28 }
 0x56d   : > { %2338 = vrot.lane.b32.xlu0 %v6691_v2, %s5198_s21  ;;  %2238 = vrot.lane.b32.xlu1 %v1669_v36, %s5198_s21  ;;  %v1622_v36 = vsel %vm596_vm0, %v6711_v13, %v6693_v6  ;;  %v1760_v6 = vsel %vm671_vm1, %v6639_v39, %v6671_v29  ;;  %v1671_v39 = vsel %vm621_vm14, %v6713_v5, %v6733_v62 }
 0x56f   : > { %v7055_v30 = vpop.permute.xlu0 %2170  ;;  %v7057_v50 = vpop.permute.xlu1 %2358 }
 0x571   : > { %2196 = vrot.lane.b32.xlu0 %v1623_v60, %s5198_s21  ;;  %2236 = vrot.lane.b32.xlu1 %v1668_v53, %s5198_s21  ;;  %v1719_v60 = vsel %vm646_vm11, %v6703_v1, %v6723_v15 }
 0x573   : > { %v7067_v28 = vpop.permute.xlu0 %2268  ;;  %v7069_v58 = vpop.permute.xlu1 %2310 }
 0x574   : > { %9466 = vst [vmem:[#allocation65_spill] sm:$0xff] %v7067_v28  ;;  %9467 = vst [vmem:[#allocation66_spill] sm:$0xff] %v7069_v58  ;;  %v1809_v58 = vsel %vm692_vm13, %v6841_v22, %v6789_v55 }
 0x575   : > { %2194 = vrot.lane.b32.xlu0 %v1622_v36, %s5198_s21  ;;  %2382 = vrot.lane.b32.xlu1 %v1804_v34, %s5198_s21  ;;  %v1718_v34 = vsel %vm646_vm11, %v6723_v15, %v6703_v1 }
 0x577   : > { %v7079_v14 = vpop.permute.xlu0 %2266  ;;  %v7081_v26 = vpop.permute.xlu1 %2174 }
 0x578   : > { %9468 = vst [vmem:[#allocation67_spill] sm:$0xff] %v7079_v14 }
 0x579   : > { %2292 = vrot.lane.b32.xlu0 %v1719_v60, %s5198_s21  ;;  %2334 = vrot.lane.b32.xlu1 %v1760_v6, %s5198_s21 }
 0x57b   : > { %v7091_v20 = vpop.permute.xlu0 %2220  ;;  %v7093_v12 = vpop.permute.xlu1 %2270 }
 0x57c   : > { %9469 = vst [vmem:[#allocation68_spill] sm:$0xff] %v7091_v20  ;;  %9470 = vst [vmem:[#allocation69_spill] sm:$0xff] %v7093_v12  ;;  %v1625_v20 = vsel %vm596_vm0, %v6791_v0, %v6831_v40  ;;  %v1808_v12 = vsel %vm692_vm13, %v6789_v55, %v6841_v22 }
 0x57d   : > { %2290 = vrot.lane.b32.xlu0 %v1718_v34, %s5198_s21  ;;  %2198 = vrot.lane.b32.xlu1 %v6711_v13, %s5198_s21  ;;  %v1670_v13 = vsel %vm621_vm14, %v6733_v62, %v6713_v5 }
 0x57f   : > { %v7101_v53 = vpop.permute.xlu0 %2218  ;;  %v7103_v29 = vpop.permute.xlu1 %2222 }
 0x580   : > { %9471 = vst [vmem:[#allocation70_spill] sm:$0xff] %v7101_v53  ;;  %9472 = vst [vmem:[#allocation71_spill] sm:$0xff] %v7103_v29  ;;  %v1902_v53 = vsel %vm742_vm10, %v6745_v57, %v6767_v16 }
 0x581   : > { %2244 = vrot.lane.b32.xlu0 %v1671_v39, %s5198_s21  ;;  %2294 = vrot.lane.b32.xlu1 %v6723_v15, %s5198_s21  ;;  %v1806_v15 = vsel %vm692_vm13, %v6725_v27, %v6743_v24  ;;  %v1807_v39 = vsel %vm692_vm13, %v6743_v24, %v6725_v27 }
 0x583   : > { %v7111_v36 = vpop.permute.xlu0 %2364  ;;  %v7113_v1 = vpop.permute.xlu1 %2318 }
 0x584   : > { %9473 = vst [vmem:[#allocation72_spill] sm:$0xff] %v7113_v1 }
 0x585   : > { %2242 = vrot.lane.b32.xlu0 %v1670_v13, %s5198_s21  ;;  %2246 = vrot.lane.b32.xlu1 %v6733_v62, %s5198_s21  ;;  %v1761_v62 = vsel %vm671_vm1, %v6691_v2, %v6769_v61  ;;  %v1903_v2 = vsel %vm742_vm10, %v6767_v16, %v6745_v57 }
 0x587   : > { %v7121_v60 = vpop.permute.xlu0 %2316  ;;  %v7123_v6 = vpop.permute.xlu1 %2366 }
 0x588   : > { %9474 = vst [vmem:[#allocation73_spill] sm:$0xff] %v7121_v60  ;;  %v1624_v60 = vsel %vm596_vm0, %v6831_v40, %v6791_v0 }
 0x589   : > { %2388 = vrot.lane.b32.xlu0 %v1806_v15, %s5198_s21  ;;  %2342 = vrot.lane.b32.xlu1 %v6769_v61, %s5198_s21 }
 0x58b   : > { %v7131_v34 = vpop.permute.xlu0 %2180  ;;  %v7133_v5 = vpop.permute.xlu1 %2368 }
 0x58d   : > { %2340 = vrot.lane.b32.xlu0 %v1761_v62, %s5198_s21  ;;  %2390 = vrot.lane.b32.xlu1 %v1807_v39, %s5198_s21 }
 0x58f   : > { %v7143_v13 = vpop.permute.xlu0 %2276  ;;  %v7145_v15 = vpop.permute.xlu1 %2320 }
 0x590   : > { %9475 = vst [vmem:[#allocation74_spill] sm:$0xff] %v7143_v13  ;;  %9476 = vst [vmem:[#allocation75_spill] sm:$0xff] %v7145_v15 }
 0x591   : > { %2484 = vrot.lane.b32.xlu0 %v1902_v53, %s5198_s21  ;;  %2486 = vrot.lane.b32.xlu1 %v1903_v2, %s5198_s21 }
 0x593   : > { %v7155_v27 = vpop.permute.xlu0 %2228  ;;  %v7157_v24 = vpop.permute.xlu1 %2178 }
 0x594   : > { %9477 = vst [vmem:[#allocation76_spill] sm:$0xff] %v7155_v27 }
 0x595   : > { %2204 = vrot.lane.b32.xlu0 %v6831_v40, %s5198_s21  ;;  %2392 = vrot.lane.b32.xlu1 %v6789_v55, %s5198_s21 }
 0x597   : > { %v7163_v61 = vpop.permute.xlu0 %2324  ;;  %v7165_v62 = vpop.permute.xlu1 %2176 }
 0x598   : > { %9478 = vst [vmem:[#allocation77_spill] sm:$0xff] %v7163_v61 }
 0x599   : > { %2300 = vrot.lane.b32.xlu0 %v6839_v23, %s5198_s21  ;;  %2344 = vrot.lane.b32.xlu1 %v6799_v9, %s5198_s21 }
 0x59b   : > { %v7171_v16 = vpop.permute.xlu0 %2372  ;;  %v7173_v53 = vpop.permute.xlu1 %2274 }
 0x59c   : > { %9479 = vst [vmem:[#allocation78_spill] sm:$0xff] %v7173_v53 }
 0x59d   : > { %2252 = vrot.lane.b32.xlu0 %v6847_v52, %s5198_s21  ;;  %2488 = vrot.lane.b32.xlu1 %v6809_v11, %s5198_s21 }
 0x59f   : > { %v7179_v39 = vpop.permute.xlu0 %2374  ;;  %v7181_v2 = vpop.permute.xlu1 %2272 }
 0x5a0   : > { %9480 = vst [vmem:[#allocation79_spill] sm:$0xff] %v7181_v2  ;;  %v9514_v2 = vld [vmem:[#allocation23_spill] sm:$0xff] }
 0x5a1   : > { %2348 = vrot.lane.b32.xlu0 %v6849_v38, %s5198_s21  ;;  %2202 = vrot.lane.b32.xlu1 %v1625_v20, %s5198_s21  ;;  %v1905_v20 = vsel %vm742_vm10, %v6859_v3, %v6809_v11 }
 0x5a3   : > { %v7189_v29 = vpop.permute.xlu0 %2326  ;;  %v7191_v27 = vpop.permute.xlu1 %2226 }
 0x5a4   : > { %9481 = vst [vmem:[#allocation80_spill] sm:$0xff] %v7189_v29  ;;  %9482 = vst [vmem:[#allocation81_spill] sm:$0xff] %v7191_v27  ;;  %v1721_v27 = vsel %vm646_vm11, %v6801_v43, %v6839_v23 }
 0x5a5   : > { %2396 = vrot.lane.b32.xlu0 %v1809_v58, %s5198_s21  ;;  %2200 = vrot.lane.b32.xlu1 %v1624_v60, %s5198_s21  ;;  %v1720_v58 = vsel %vm646_vm11, %v6839_v23, %v6801_v43  ;;  %v1672_v43 = vsel %vm621_vm14, %v6847_v52, %v6811_v49 }
 0x5a7   : > { %v7201_v1 = vpop.permute.xlu0 %2184  ;;  %v7203_v14 = vpop.permute.xlu1 %2224 }
 0x5a8   : > { %9483 = vst [vmem:[#allocation82_spill] sm:$0xff] %v7203_v14 }
 0x5a9   : > { %2492 = vrot.lane.b32.xlu0 %v1905_v20, %s5198_s21  ;;  %2298 = vrot.lane.b32.xlu1 %v1721_v27, %s5198_s21  ;;  %v1673_v27 = vsel %vm621_vm14, %v6811_v49, %v6847_v52 }
 0x5ab   : > { %v7213_v0 = vpop.permute.xlu0 %2182  ;;  %v7215_v40 = vpop.permute.xlu1 %2370 }
 0x5ad   : > { %2398 = vrot.lane.b32.xlu0 %v6913_v25, %s5198_s21  ;;  %2296 = vrot.lane.b32.xlu1 %v1720_v58, %s5198_s21 }
 0x5af   : > { %v7223_v60 = vpop.permute.xlu0 %2280  ;;  %v7225_v14 = vpop.permute.xlu1 %2322 }
 0x5b0   : > { %9484 = vst [vmem:[#allocation83_spill] sm:$0xff] %v7223_v60  ;;  %9485 = vst [vmem:[#allocation84_spill] sm:$0xff] %v7225_v14  ;;  %v9510_v14 = vld [vmem:[#allocation19_spill] sm:$0xff] }
 0x5b1   : > { %2350 = vrot.lane.b32.xlu0 %v6879_v46, %s5198_s21  ;;  %2250 = vrot.lane.b32.xlu1 %v1673_v27, %s5198_s21  ;;  %v1627_v27 = vsel %vm596_vm0, %v6881_v4, %v6899_v8 }
 0x5b3   : > { %v7233_v20 = vpop.permute.xlu0 %2278  ;;  %v7235_v23 = vpop.permute.xlu1 %2186 }
 0x5b4   : > { %9486 = vst [vmem:[#allocation85_spill] sm:$0xff] %v7233_v20  ;;  %v9529_v20 = vld [vmem:[#allocation51_spill] sm:$0xff] }
 0x5b5   : > { %2494 = vrot.lane.b32.xlu0 %v6937_v41, %s5198_s21  ;;  %2248 = vrot.lane.b32.xlu1 %v1672_v43, %s5198_s21  ;;  %v1626_v43 = vsel %vm596_vm0, %v6899_v8, %v6881_v4  ;;  %v1904_v4 = vsel %vm742_vm10, %v6809_v11, %v6859_v3  ;;  %v1675_v3 = vsel %vm621_vm14, %v6901_v45, %v6923_v17 }
 0x5b7   : > { %v7243_v58 = vpop.permute.xlu0 %2232  ;;  %v7245_v28 = vpop.permute.xlu1 %2282 }
 0x5b8   : > { %9487 = vst [vmem:[#allocation86_spill] sm:$0xff] %v7243_v58  ;;  %9488 = vst [vmem:[#allocation87_spill] sm:$0xff] %v7245_v28  ;;  %v1762_v58 = vsel %vm671_vm1, %v6799_v9, %v6849_v38 }
 0x5b9   : > { %2208 = vrot.lane.b32.xlu0 %v1627_v27, %s5198_s21  ;;  %2394 = vrot.lane.b32.xlu1 %v1808_v12, %s5198_s21  ;;  %v1723_v12 = vsel %vm646_vm11, %v6891_v47, %v6911_v63 }
 0x5bb   : > { %v7255_v49 = vpop.permute.xlu0 %2230  ;;  %v7257_v52 = vpop.permute.xlu1 %2234 }
 0x5bc   : > { %9489 = vst [vmem:[#allocation88_spill] sm:$0xff] %v7255_v49  ;;  %9490 = vst [vmem:[#allocation89_spill] sm:$0xff] %v7257_v52  ;;  %v1906_v49 = vsel %vm742_vm10, %v6937_v41, %v6955_v10 }
 0x5bd   : > { %2206 = vrot.lane.b32.xlu0 %v1626_v43, %s5198_s21  ;;  %2346 = vrot.lane.b32.xlu1 %v1762_v58, %s5198_s21  ;;  %v1722_v58 = vsel %vm646_vm11, %v6911_v63, %v6891_v47 }
 0x5bf   : > { %v7267_v55 = vpop.permute.xlu0 %2376  ;;  %v7269_v22 = vpop.permute.xlu1 %2330 }
 0x5c0   : > { %9491 = vst [vmem:[#allocation90_spill] sm:$0xff] %v7269_v22 }
 0x5c1   : > { %2304 = vrot.lane.b32.xlu0 %v1723_v12, %s5198_s21  ;;  %2490 = vrot.lane.b32.xlu1 %v1904_v4, %s5198_s21 }
 0x5c3   : > { %v7279_v9 = vpop.permute.xlu0 %2328  ;;  %v7281_v38 = vpop.permute.xlu1 %2378 }
 0x5c4   : > { %9492 = vst [vmem:[#allocation91_spill] sm:$0xff] %v7279_v9  ;;  %v1957_v9 = vld [vmem:[%s9210_s7 + $0x8] sm:$0xff] }
 0x5c5   : > { %2302 = vrot.lane.b32.xlu0 %v1722_v58, %s5198_s21  ;;  %2210 = vrot.lane.b32.xlu1 %v6899_v8, %s5198_s21  ;;  %v1674_v8 = vsel %vm621_vm14, %v6923_v17, %v6901_v45 }
 0x5c6   : > { %2949 = vmatprep.mubr.f32.mxu0 %v1957_v9 }
 0x5c7   : > { %v7289_v27 = vpop.permute.xlu0 %2192  ;;  %v7291_v11 = vpop.permute.xlu1 %2380 }
 0x5c9   : > { %2256 = vrot.lane.b32.xlu0 %v1675_v3, %s5198_s21  ;;  %2306 = vrot.lane.b32.xlu1 %v6911_v63, %s5198_s21  ;;  %v1811_v63 = vsel %vm692_vm13, %v6935_v56, %v6913_v25  ;;  %v1810_v3 = vsel %vm692_vm13, %v6913_v25, %v6935_v56 }
 0x5cb   : > { %v7299_v43 = vpop.permute.xlu0 %2288  ;;  %v7301_v47 = vpop.permute.xlu1 %2332 }
 0x5cc   : > { %9493 = vst [vmem:[#allocation92_spill] sm:$0xff] %v7299_v43  ;;  %9494 = vst [vmem:[#allocation93_spill] sm:$0xff] %v7301_v47  ;;  %v9531_v47 = vld [vmem:[#allocation17_spill] sm:$0xff] }
 0x5cd   : > { %2254 = vrot.lane.b32.xlu0 %v1674_v8, %s5198_s21  ;;  %2258 = vrot.lane.b32.xlu1 %v6923_v17, %s5198_s21  ;;  %v1763_v17 = vsel %vm671_vm1, %v6879_v46, %v6957_v51  ;;  %v1907_v46 = vsel %vm742_vm10, %v6955_v10, %v6937_v41  ;;  %v1901_v10 = vsel %vm742_vm10, %v6677_v35, %v6645_v31 }
 0x5cf   : > { %v7309_v12 = vpop.permute.xlu0 %2240  ;;  %v7311_v4 = vpop.permute.xlu1 %2190 }
 0x5d0   : > { %9495 = vst [vmem:[#allocation94_spill] sm:$0xff] %v7309_v12 }
 0x5d1   : > { %2402 = vrot.lane.b32.xlu0 %v1811_v63, %s5198_s21  ;;  %2354 = vrot.lane.b32.xlu1 %v6957_v51, %s5198_s21  ;;  %v1900_v51 = vsel %vm742_vm10, %v6645_v31, %v6677_v35 }
 0x5d3   : > { %v7319_v58 = vpop.permute.xlu0 %2336  ;;  %v7321_v45 = vpop.permute.xlu1 %2188 }
 0x5d4   : > { %9496 = vst [vmem:[#allocation95_spill] sm:$0xff] %v7319_v58 }
 0x5d5   : > { %2352 = vrot.lane.b32.xlu0 %v1763_v17, %s5198_s21  ;;  %2400 = vrot.lane.b32.xlu1 %v1810_v3, %s5198_s21 }
 0x5d7   : > { %v7331_v8 = vpop.permute.xlu0 %2384  ;;  %v7333_v63 = vpop.permute.xlu1 %2286 }
 0x5d8   : > { %9497 = vst [vmem:[#allocation96_spill] sm:$0xff] %v7333_v63  ;;  %v9537_v63 = vld [vmem:[#allocation33_spill] sm:$0xff] }
 0x5d9   : > { %2496 = vrot.lane.b32.xlu0 %v1906_v49, %s5198_s21  ;;  %2498 = vrot.lane.b32.xlu1 %v1907_v46, %s5198_s21  ;;  %v9503_v46 = vld [vmem:[#allocation37_spill] sm:$0xff] }
 0x5db   : > { %v7343_v25 = vpop.permute.xlu0 %2386  ;;  %v7345_v56 = vpop.permute.xlu1 %2284 }
 0x5dc   : > { %9498 = vst [vmem:[#allocation97_spill] sm:$0xff] %v7345_v56 }
 0x5dd   : > { %2482 = vrot.lane.b32.xlu0 %v6745_v57, %s5198_s21  ;;  %2478 = vrot.lane.b32.xlu1 %v1900_v51, %s5198_s21  ;;  %v9502_v57 = vld [vmem:[#allocation28_spill] sm:$0xff] }
 0x5de   : > { %v1898_v51 = vsel %vm742_vm10, %v9503_v46, %v9502_v57  ;;  %v1899_v52 = vsel %vm742_vm10, %v9502_v57, %v9503_v46 }
 0x5df   : > { %v7353_v17 = vpop.permute.xlu0 %2338  ;;  %v7355_v41 = vpop.permute.xlu1 %2238 }
 0x5e0   : > { %9499 = vst [vmem:[#allocation98_spill] sm:$0xff] %v7353_v17  ;;  %9500 = vst [vmem:[#allocation99_spill] sm:$0xff] %v7355_v41  ;;  %v9505_v41 = vld [vmem:[#allocation36_spill] sm:$0xff] }
 0x5e1   : > { %2480 = vrot.lane.b32.xlu0 %v1901_v10, %s5198_s21  ;;  %2476 = vrot.lane.b32.xlu1 %v6645_v31, %s5198_s21  ;;  %v9504_v31 = vld [vmem:[#allocation26_spill] sm:$0xff]  ;;  %v9541_v17 = vld [vmem:[#allocation12_spill] sm:$0xff] }
 0x5e3   : > { %v7363_v49 = vpop.permute.xlu0 %2196  ;;  %v7365_v3 = vpop.permute.xlu1 %2236 }
 0x5e4   : > { %9501 = vst [vmem:[#allocation100_spill] sm:$0xff] %v7365_v3  ;;  %v1896_v3 = vsel %vm742_vm10, %v9505_v41, %v9504_v31 }
 0x5e5   : > { %2472 = vrot.lane.b32.xlu0 %v1898_v51, %s5198_s21  ;;  %2474 = vrot.lane.b32.xlu1 %v1899_v52, %s5198_s21  ;;  %v1897_v52 = vsel %vm742_vm10, %v9504_v31, %v9505_v41 }
 0x5e7   : > { %v7375_v35 = vpop.permute.xlu0 %2194  ;;  %v7377_v10 = vpop.permute.xlu1 %2382 }
 0x5e9   : > { %2470 = vrot.lane.b32.xlu0 %v9503_v46, %s5198_s21  ;;  %2466 = vrot.lane.b32.xlu1 %v1896_v3, %s5198_s21  ;;  %v9509_v46 = vld [vmem:[#allocation25_spill] sm:$0xff] }
 0x5ea   : > { %v1894_v3 = vsel %vm742_vm10, %v9510_v14, %v9509_v46  ;;  %v1895_v61 = vsel %vm742_vm10, %v9509_v46, %v9510_v14 }
 0x5eb   : > { %v7385_v12 = vpop.permute.xlu0 %2292  ;;  %v7387_v57 = vpop.permute.xlu1 %2334 }
 0x5ec   : > { %9506 = vst [vmem:[#allocation28_spill] sm:$0xff] %v7385_v12  ;;  %9507 = vst [vmem:[#allocation37_spill] sm:$0xff] %v7387_v57  ;;  %v9534_v57 = vld [vmem:[#allocation8_spill] sm:$0xff] }
 0x5ed   : > { %2468 = vrot.lane.b32.xlu0 %v1897_v52, %s5198_s21  ;;  %2464 = vrot.lane.b32.xlu1 %v9505_v41, %s5198_s21  ;;  %v9513_v41 = vld [vmem:[#allocation43_spill] sm:$0xff] }
 0x5ee   : > { %v1892_v53 = vsel %vm742_vm10, %v9514_v2, %v9513_v41 }
 0x5ef   : > { %v7395_v51 = vpop.permute.xlu0 %2290  ;;  %v7397_v15 = vpop.permute.xlu1 %2198 }
 0x5f0   : > { %9508 = vst [vmem:[#allocation26_spill] sm:$0xff] %v7395_v51  ;;  %v9546_v51 = vld [vmem:[#allocation35_spill] sm:$0xff] }
 0x5f1   : > { %2460 = vrot.lane.b32.xlu0 %v1894_v3, %s5198_s21  ;;  %2462 = vrot.lane.b32.xlu1 %v1895_v61, %s5198_s21  ;;  %v1893_v61 = vsel %vm742_vm10, %v9513_v41, %v9514_v2  ;;  %vm2836_vm10 = vcmask 523264  }
 0x5f3   : > { %v7407_v31 = vpop.permute.xlu0 %2244  ;;  %v7409_v52 = vpop.permute.xlu1 %2294 }
 0x5f4   : > { %9511 = vst [vmem:[#allocation36_spill] sm:$0xff] %v7407_v31  ;;  %9512 = vst [vmem:[#allocation25_spill] sm:$0xff] %v7409_v52 }
 0x5f5   : > { %2458 = vrot.lane.b32.xlu0 %v9510_v14, %s5198_s21  ;;  %2454 = vrot.lane.b32.xlu1 %v1892_v53, %s5198_s21  ;;  %v1858_v14 = vsel %vm717_vm12, %v6947_v18, %v6965_v7  ;;  %v1859_v53 = vsel %vm717_vm12, %v6965_v7, %v6947_v18 }
 0x5f7   : > { %v7417_v13 = vpop.permute.xlu0 %2242  ;;  %v7419_v46 = vpop.permute.xlu1 %2246 }
 0x5f8   : > { %9515 = vst [vmem:[#allocation19_spill] sm:$0xff] %v7417_v13  ;;  %9516 = vst [vmem:[#allocation43_spill] sm:$0xff] %v7419_v46 }
 0x5f9   : > { %2456 = vrot.lane.b32.xlu0 %v1893_v61, %s5198_s21  ;;  %2452 = vrot.lane.b32.xlu1 %v9514_v2, %s5198_s21  ;;  %v9519_v2 = vld [vmem:[#allocation49_spill] sm:$0xff] }
 0x5fa   : > { %v1856_v13 = vsel %vm717_vm12, %v9519_v2, %v6869_v21 }
 0x5fb   : > { %v7427_v3 = vpop.permute.xlu0 %2388  ;;  %v7429_v31 = vpop.permute.xlu1 %2342 }
 0x5fc   : > { %9517 = vst [vmem:[#allocation23_spill] sm:$0xff] %v7429_v31  ;;  %v9543_v31 = vld [vmem:[#allocation32_spill] sm:$0xff] }
 0x5fd   : > { %2448 = vrot.lane.b32.xlu0 %v1858_v14, %s5198_s21  ;;  %2450 = vrot.lane.b32.xlu1 %v1859_v53, %s5198_s21  ;;  %v1857_v14 = vsel %vm717_vm12, %v6869_v21, %v9519_v2  ;;  %v9522_v53 = vld [vmem:[#allocation54_spill] sm:$0xff] }
 0x5fe   : > { %v1954_v29 = vsel %vm767_vm15, %v9522_v53, %v6967_v32  ;;  %v1955_v21 = vsel %vm767_vm15, %v6967_v32, %v9522_v53 }
 0x5ff   : > { %v7439_v41 = vpop.permute.xlu0 %2340  ;;  %v7441_v61 = vpop.permute.xlu1 %2390 }
 0x600   : > { %9518 = vst [vmem:[#allocation101_spill] sm:$0xff] %v7439_v41 }
 0x601   : > { %2446 = vrot.lane.b32.xlu0 %v6947_v18, %s5198_s21  ;;  %2442 = vrot.lane.b32.xlu1 %v1856_v13, %s5198_s21 }
 0x603   : > { %v7449_v46 = vpop.permute.xlu0 %2484  ;;  %v7451_v7 = vpop.permute.xlu1 %2486 }
 0x604   : > { %9520 = vst [vmem:[#allocation49_spill] sm:$0xff] %v7449_v46  ;;  %9521 = vst [vmem:[#allocation102_spill] sm:$0xff] %v7451_v7 }
 0x605   : > { %2444 = vrot.lane.b32.xlu0 %v1857_v14, %s5198_s21  ;;  %2544 = vrot.lane.b32.xlu1 %v1954_v29, %s5198_s21  ;;  %v9524_v14 = vld [vmem:[#allocation47_spill] sm:$0xff]  ;;  %v9525_v29 = vld [vmem:[#allocation46_spill] sm:$0xff] }
 0x606   : > { %v1854_v9 = vsel %vm717_vm12, %v9525_v29, %v9524_v14 }
 0x607   : > { %v7464_v18 = vpop.permute.xlu0 %2204  ;;  %v7466_v13 = vpop.permute.xlu1 %2392 }
 0x609   : > { %2546 = vrot.lane.b32.xlu0 %v1955_v21, %s5198_s21  ;;  %2440 = vrot.lane.b32.xlu1 %v9519_v2, %s5198_s21  ;;  %v1855_v2 = vsel %vm717_vm12, %v9524_v14, %v9525_v29  ;;  %v9528_v21 = vld [vmem:[#allocation53_spill] sm:$0xff] }
 0x60a   : > { %v1952_v60 = vsel %vm767_vm15, %v9529_v20, %v9528_v21 }
 0x60b   : > { %v7474_v46 = vpop.permute.xlu0 %2300  ;;  %v7476_v7 = vpop.permute.xlu1 %2344 }
 0x60c   : > { %9523 = vst [vmem:[#allocation54_spill] sm:$0xff] %v7476_v7 }
 0x60d   : > { %2542 = vrot.lane.b32.xlu0 %v9522_v53, %s5198_s21  ;;  %2436 = vrot.lane.b32.xlu1 %v1854_v9, %s5198_s21  ;;  %v1953_v9 = vsel %vm767_vm15, %v9528_v21, %v9529_v20 }
 0x60f   : > { %v7484_v22 = vpop.permute.xlu0 %2252  ;;  %v7486_v32 = vpop.permute.xlu1 %2488 }
 0x610   : > { %9526 = vst [vmem:[#allocation47_spill] sm:$0xff] %v7484_v22  ;;  %9527 = vst [vmem:[#allocation46_spill] sm:$0xff] %v7486_v32  ;;  %v9530_v22 = vld [vmem:[#allocation7_spill] sm:$0xff] }
 0x611   : > { %2438 = vrot.lane.b32.xlu0 %v1855_v2, %s5198_s21  ;;  %2538 = vrot.lane.b32.xlu1 %v1952_v60, %s5198_s21  ;;  %v1852_v2 = vsel %vm717_vm12, %v9531_v47, %v9530_v22 }
 0x613   : > { %v7496_v28 = vpop.permute.xlu0 %2348  ;;  %v2203_v53 = vpop.permute.xlu1 %2202 }
 0x615   : > { %2540 = vrot.lane.b32.xlu0 %v1953_v9, %s5198_s21  ;;  %2434 = vrot.lane.b32.xlu1 %v9525_v29, %s5198_s21  ;;  %v1853_v29 = vsel %vm717_vm12, %v9530_v22, %v9531_v47  ;;  %v9533_v9 = vld [vmem:[#allocation48_spill] sm:$0xff] }
 0x616   : > { %v1950_v58 = vsel %vm767_vm15, %v9534_v57, %v9533_v9 }
 0x617   : > { %v7504_v14 = vpop.permute.xlu0 %2396  ;;  %v2201_v32 = vpop.permute.xlu1 %2200 }
 0x619   : > { %2536 = vrot.lane.b32.xlu0 %v9529_v20, %s5198_s21  ;;  %2430 = vrot.lane.b32.xlu1 %v1852_v2, %s5198_s21  ;;  %v1951_v2 = vsel %vm767_vm15, %v9533_v9, %v9534_v57 }
 0x61b   : > { %v7512_v60 = vpop.permute.xlu0 %2492  ;;  %v7514_v21 = vpop.permute.xlu1 %2298 }
 0x61c   : > { %9532 = vst [vmem:[#allocation53_spill] sm:$0xff] %v7512_v60 }
 0x61d   : > { %2432 = vrot.lane.b32.xlu0 %v1853_v29, %s5198_s21  ;;  %2532 = vrot.lane.b32.xlu1 %v1950_v58, %s5198_s21  ;;  %v9536_v29 = vld [vmem:[#allocation16_spill] sm:$0xff] }
 0x61e   : > { %v1850_v58 = vsel %vm717_vm12, %v9537_v63, %v9536_v29 }
 0x61f   : > { %v7524_v56 = vpop.permute.xlu0 %2398  ;;  %v7526_v20 = vpop.permute.xlu1 %2296 }
 0x621   : > { %2534 = vrot.lane.b32.xlu0 %v1951_v2, %s5198_s21  ;;  %2428 = vrot.lane.b32.xlu1 %v9531_v47, %s5198_s21  ;;  %v1851_v47 = vsel %vm717_vm12, %v9536_v29, %v9537_v63  ;;  %v9540_v2 = vld [vmem:[#allocation10_spill] sm:$0xff] }
 0x623   : > { %v7534_v22 = vpop.permute.xlu0 %2350  ;;  %v7536_v60 = vpop.permute.xlu1 %2250 }
 0x624   : > { %9535 = vst [vmem:[#allocation51_spill] sm:$0xff] %v7536_v60  ;;  %v1948_v60 = vsel %vm767_vm15, %v9541_v17, %v9540_v2 }
 0x625   : > { %2530 = vrot.lane.b32.xlu0 %v9534_v57, %s5198_s21  ;;  %2424 = vrot.lane.b32.xlu1 %v1850_v58, %s5198_s21  ;;  %v1949_v58 = vsel %vm767_vm15, %v9540_v2, %v9541_v17 }
 0x627   : > { %v7544_v43 = vpop.permute.xlu0 %2494  ;;  %v7546_v9 = vpop.permute.xlu1 %2248 }
 0x628   : > { %9538 = vst [vmem:[#allocation7_spill] sm:$0xff] %v7544_v43  ;;  %9539 = vst [vmem:[#allocation17_spill] sm:$0xff] %v7546_v9  ;;  %v9542_v43 = vld [vmem:[#allocation42_spill] sm:$0xff] }
 0x629   : > { %2426 = vrot.lane.b32.xlu0 %v1851_v47, %s5198_s21  ;;  %2526 = vrot.lane.b32.xlu1 %v1948_v60, %s5198_s21  ;;  %v1848_v47 = vsel %vm717_vm12, %v9543_v31, %v9542_v43 }
 0x62b   : > { %v2209_v41 = vpop.permute.xlu0 %2208  ;;  %v7556_v57 = vpop.permute.xlu1 %2394 }
 0x62d   : > { %2528 = vrot.lane.b32.xlu0 %v1949_v58, %s5198_s21  ;;  %2422 = vrot.lane.b32.xlu1 %v9537_v63, %s5198_s21  ;;  %v1849_v63 = vsel %vm717_vm12, %v9542_v43, %v9543_v31  ;;  %v9545_v58 = vld [vmem:[#allocation27_spill] sm:$0xff] }
 0x62e   : > { %v1946_v12 = vsel %vm767_vm15, %v9546_v51, %v9545_v58 }
 0x62f   : > { %v2207_v29 = vpop.permute.xlu0 %2206  ;;  %v7564_v9 = vpop.permute.xlu1 %2346 }
 0x630   : > { %v2578_v43 = vsel %vm1056_vm2, %v2207_v29, %v2209_v41  ;;  %v2575_v29 = vsel %vm1056_vm2, %v7363_v49, %v7397_v15  ;;  %v2572_v15 = vsel %vm1056_vm2, %v7321_v45, %v7311_v4 }
 0x631   : > { %2524 = vrot.lane.b32.xlu0 %v9541_v17, %s5198_s21  ;;  %2418 = vrot.lane.b32.xlu1 %v1848_v47, %s5198_s21  ;;  %v1947_v47 = vsel %vm767_vm15, %v9545_v58, %v9546_v51  ;;  %v2576_v58 = vsel %vm1056_vm2, %v2201_v32, %v2203_v53 }
 0x633   : > { %v7572_v60 = vpop.permute.xlu0 %2304  ;;  %v7574_v2 = vpop.permute.xlu1 %2490 }
 0x634   : > { %9544 = vst [vmem:[#allocation48_spill] sm:$0xff] %v7574_v2 }
 0x635   : > { %2420 = vrot.lane.b32.xlu0 %v1849_v63, %s5198_s21  ;;  %2520 = vrot.lane.b32.xlu1 %v1946_v12, %s5198_s21  ;;  %v2577_v12 = vsel %vm1056_vm2, %v2203_v53, %v7464_v18  ;;  %v2574_v18 = vsel %vm1056_vm2, %v7375_v35, %v7363_v49  ;;  %v9549_v35 = vld [vmem:[#allocation15_spill] sm:$0xff] }
 0x637   : > { %v7584_v52 = vpop.permute.xlu0 %2302  ;;  %v2211_v17 = vpop.permute.xlu1 %2210 }
 0x638   : > { %v2579_v2 = vsel %vm1056_vm2, %v2209_v41, %v2211_v17  ;;  %v9547_v17 = vld [vmem:[#allocation41_spill] sm:$0xff] }
 0x639   : > { %2522 = vrot.lane.b32.xlu0 %v1947_v47, %s5198_s21  ;;  %2416 = vrot.lane.b32.xlu1 %v9543_v31, %s5198_s21  ;;  %v9548_v31 = vld [vmem:[#allocation14_spill] sm:$0xff] }
 0x63a   : > { %2885 = vmatprep.subr.mxu0 %v2579_v2  ;;  %v1846_v41 = vsel %vm717_vm12, %v9548_v31, %v9547_v17  ;;  %v1847_v49 = vsel %vm717_vm12, %v9547_v17, %v9548_v31  ;;  %v9550_v2 = vld [vmem:[#allocation22_spill] sm:$0xff] }
 0x63b   : > { %2886 = vmatpush1.msra.mxu0 %v2578_v43  ;;  %v7594_v63 = vpop.permute.xlu0 %2256  ;;  %v7598_v7 = vpop.permute.xlu1 %2306  ;;  %v1944_v47 = vsel %vm767_vm15, %v9550_v2, %v9549_v35  ;;  %v2569_v43 = vsel %vm1056_vm2, %v7157_v24, %v7131_v34  ;;  %v2566_v34 = vsel %vm1056_vm2, %v7055_v30, %v7045_v48  ;;  %v9552_v30 = vld [vmem:[#allocation13_spill] sm:$0xff] }
 0x63c   : > { %2887 = vmatprep.subr.mxu0 %v2577_v12 }
 0x63d   : > { %2888 = vmatpush1.msra.mxu0 %v2576_v58  ;;  %2518 = vrot.lane.b32.xlu0 %v9546_v51, %s5198_s21  ;;  %v2573_v51 = vsel %vm1056_vm2, %v7311_v4, %v7289_v27  ;;  %v2571_v27 = vsel %vm1056_vm2, %v7201_v1, %v7235_v23  ;;  %v2570_v4 = vsel %vm1056_vm2, %v7213_v0, %v7201_v1 }
 0x63e   : > { %2412 = vrot.lane.b32.xlu1 %v1846_v41, %s5198_s21  ;;  %2889 = vmatprep.subr.mxu0 %v2575_v29  ;;  %v2568_v58 = vsel %vm1056_vm2, %v7165_v62, %v7157_v24  ;;  %v1945_v1 = vsel %vm767_vm15, %v9549_v35, %v9550_v2  ;;  %v2567_v0 = vsel %vm1056_vm2, %v7045_v48, %v7081_v26  ;;  %v9551_v48 = vld [vmem:[#allocation34_spill] sm:$0xff]  ;;  %v9553_v29 = vld [vmem:[#allocation52_spill] sm:$0xff] }
 0x63f   : > { %2890 = vmatpush1.msra.mxu0 %v2574_v18  ;;  %v7613_v32 = vpop.permute.xlu0 %2254  ;;  %v7618_v53 = vpop.permute.xlu1 %2258  ;;  %v2565_v62 = vsel %vm1056_vm2, %v6997_v54, %v6975_v19  ;;  %v2564_v26 = vsel %vm1056_vm2, %v7005_v59, %v6997_v54  ;;  %v2563_v19 = vsel %vm1056_vm2, %v6925_v37, %v6945_v33  ;;  %v2562_v54 = vsel %vm1056_vm2, %v6945_v33, %v6925_v37  ;;  %v9554_v18 = vld [vmem:[#allocation50_spill] sm:$0xff]  ;;  %v9555_v35 = vld [vmem:[#allocation44_spill] sm:$0xff] }
 0x640   : > { %2891 = vmatprep.subr.mxu0 %v2573_v51  ;;  %v2561_v51 = vsel %vm1056_vm2, %v9554_v18, %v9553_v29  ;;  %v2560_v37 = vsel %vm1056_vm2, %v9553_v29, %v9554_v18  ;;  %v2640_v33 = vsel %vm1056_vm2, %v7466_v13, %v7556_v57  ;;  %v2639_v13 = vsel %vm1056_vm2, %v7427_v3, %v7441_v61  ;;  %v9565_v18 = vld [vmem:[#allocation31_spill] sm:$0xff] }
 0x641   : > { %2892 = vmatpush1.msra.mxu0 %v2572_v15  ;;  %2414 = vrot.lane.b32.xlu0 %v1847_v49, %s5198_s21  ;;  %v1845_v49 = vsel %vm717_vm12, %v9551_v48, %v9552_v30  ;;  %v2637_v61 = vsel %vm1056_vm2, %v7377_v10, %v7331_v8 }
 0x642   : > { %2514 = vrot.lane.b32.xlu1 %v1944_v47, %s5198_s21  ;;  %2893 = vmatprep.subr.mxu0 %v2571_v27  ;;  %v9557_v47 = vld [vmem:[#allocation6_spill] sm:$0xff]  ;;  %v9558_v27 = vld [vmem:[#allocation5_spill] sm:$0xff] }
 0x643   : > { %2894 = vmatpush1.msra.mxu0 %v2570_v4  ;;  %v2403_v45 = vpop.permute.xlu0 %2402  ;;  %v7640_v12 = vpop.permute.xlu1 %2354  ;;  %v2559_v4 = vsel %vm1056_vm2, %v9558_v27, %v9557_v47 }
 0x644   : > { %2895 = vmatprep.subr.mxu0 %v2569_v43 }
 0x645   : > { %2896 = vmatpush1.msra.mxu0 %v2568_v58  ;;  %2516 = vrot.lane.b32.xlu0 %v1945_v1, %s5198_s21  ;;  %v2638_v58 = vsel %vm1056_vm2, %v7343_v25, %v7427_v3  ;;  %v9559_v1 = vld [vmem:[#allocation9_spill] sm:$0xff]  ;;  %v2636_v25 = vsel %vm1056_vm2, %v7291_v11, %v7377_v10  ;;  %v2635_v11 = vsel %vm1056_vm2, %v7267_v55, %v7281_v38 }
 0x646   : > { %2410 = vrot.lane.b32.xlu1 %v9548_v31, %s5198_s21  ;;  %2897 = vmatprep.subr.mxu0 %v2567_v0  ;;  %v1844_v31 = vsel %vm717_vm12, %v9552_v30, %v9551_v48  ;;  %v9560_v0 = vld [vmem:[#allocation11_spill] sm:$0xff]  ;;  %v2633_v38 = vsel %vm1056_vm2, %v7215_v40, %v7171_v16  ;;  %v9566_v16 = vld [vmem:[#allocation40_spill] sm:$0xff] }
 0x647   : > { %2898 = vmatpush1.msra.mxu0 %v2566_v34  ;;  %v7657_v24 = vpop.permute.xlu0 %2352  ;;  %v2401_v23 = vpop.permute.xlu1 %2400  ;;  %v2557_v34 = vsel %vm1056_vm2, %v9560_v0, %v9559_v1 }
 0x648   : > { %2899 = vmatprep.subr.mxu0 %v2565_v62  ;;  %v2643_v17 = vsel %vm1056_vm2, %v2401_v23, %v2403_v45  ;;  %v2642_v41 = vsel %vm1056_vm2, %v7524_v56, %v2401_v23  ;;  %v2641_v56 = vsel %vm1056_vm2, %v7556_v57, %v7504_v14  ;;  %v2558_v57 = vsel %vm1056_vm2, %v9557_v47, %v9558_v27  ;;  %v9561_v23 = vld [vmem:[#allocation24_spill] sm:$0xff] }
 0x649   : > { %2900 = vmatpush1.msra.mxu0 %v2564_v26  ;;  %2512 = vrot.lane.b32.xlu0 %v9550_v2, %s5198_s21  ;;  %v9556_v2 = vld [vmem:[#allocation39_spill] sm:$0xff]  ;;  %v2556_v62 = vsel %vm1056_vm2, %v9559_v1, %v9560_v0  ;;  %v9562_v26 = vld [vmem:[#allocation45_spill] sm:$0xff] }
 0x64a   : > { %2406 = vrot.lane.b32.xlu1 %v1844_v31, %s5198_s21  ;;  %2901 = vmatprep.subr.mxu0 %v2563_v19  ;;  %v1942_v14 = vsel %vm767_vm15, %v9556_v2, %v9555_v35  ;;  %v1943_v3 = vsel %vm767_vm15, %v9555_v35, %v9556_v2  ;;  %v2555_v8 = vsel %vm1056_vm2, %v9562_v26, %v9561_v23  ;;  %v9563_v19 = vld [vmem:[#allocation20_spill] sm:$0xff]  ;;  %v9569_v35 = vld [vmem:[#allocation38_spill] sm:$0xff] }
 0x64b   : > { %3046 = vmatprep.subr.mxu1 %v2643_v17  ;;  %2902 = vmatpush1.msra.mxu0 %v2562_v54  ;;  %v7680_v59 = vpop.permute.xlu0 %2496  ;;  %v7685_v15 = vpop.permute.xlu1 %2498  ;;  %v2554_v10 = vsel %vm1056_vm2, %v9561_v23, %v9562_v26  ;;  %v2634_v31 = vsel %vm1056_vm2, %v7179_v39, %v7267_v55  ;;  %v2632_v39 = vsel %vm1056_vm2, %v7133_v5, %v7215_v40 }
 0x64c   : > { %3047 = vmatpush1.msra.mxu1 %v2642_v41  ;;  %2903 = vmatprep.subr.mxu0 %v2561_v51  ;;  %v9564_v41 = vld [vmem:[#allocation30_spill] sm:$0xff]  ;;  %v1940_v51 = vsel %vm767_vm15, %v9566_v16, %v9565_v18  ;;  %v2631_v5 = vsel %vm1056_vm2, %v7111_v36, %v7123_v6  ;;  %v2629_v6 = vsel %vm1056_vm2, %v7057_v50, %v7013_v42 }
 0x64d   : > { %3048 = vmatprep.subr.mxu1 %v2641_v56  ;;  %2904 = vmatpush1.msra.mxu0 %v2560_v37  ;;  %v2553_v54 = vsel %vm1056_vm2, %v9564_v41, %v9563_v19  ;;  %v9567_v56 = vld [vmem:[#allocation21_spill] sm:$0xff]  ;;  %v2611_v42 = vsel %vm1056_vm2, %v7572_v60, %v7598_v7  ;;  %v2609_v7 = vsel %vm1056_vm2, %v7514_v21, %v7474_v46  ;;  %v2037_v46 = vld [vmem:[%s9211_s8 + $0x8] sm:$0xff] }
 0x64e   : > { %3049 = vmatpush1.msra.mxu1 %v2640_v33  ;;  %2408 = vrot.lane.b32.xlu0 %v1845_v49, %s5198_s21  ;;  %v9568_v37 = vld [vmem:[#allocation29_spill] sm:$0xff]  ;;  %v2630_v49 = vsel %vm1056_vm2, %v7023_v44, %v7111_v36  ;;  %v9571_v44 = vld [vmem:[#allocation55_spill] sm:$0xff] }
 0x64f   : > { %2508 = vrot.lane.b32.xlu1 %v1942_v14, %s5198_s21  ;;  %2905 = vmatprep.subr.mxu0 %v2559_v4  ;;  %v7713_v45 = vpop.permute.xlu0 %2482  ;;  %v7715_v43 = vpop.permute.xlu1 %2478  ;;  %v2551_v33 = vsel %vm1056_vm2, %v9568_v37, %v9567_v56  ;;  %v2550_v40 = vsel %vm1056_vm2, %v9567_v56, %v9568_v37  ;;  %v2628_v36 = vsel %vm1056_vm2, %v9571_v44, %v7057_v50  ;;  %v9585_v56 = vld [vmem:[#allocation87_spill] sm:$0xff] }
 0x650   : > { %3050 = vmatprep.subr.mxu1 %v2639_v13  ;;  %2906 = vmatpush1.msra.mxu0 %v2558_v57  ;;  %v1941_v13 = vsel %vm767_vm15, %v9565_v18, %v9566_v16  ;;  %v2610_v57 = vsel %vm1056_vm2, %v7584_v52, %v7572_v60  ;;  %v2627_v50 = vsel %vm1056_vm2, %v7657_v24, %v7640_v12  ;;  %v2036_v52 = vld [vmem:[%s9211_s8] sm:$0xff]  ;;  %v2039_v18 = vld [vmem:[%s9211_s8 + $0x18] sm:$0xff] }
 0x651   : > { %3051 = vmatpush1.msra.mxu1 %v2638_v58  ;;  %2907 = vmatprep.subr.mxu0 %v2557_v34  ;;  %v2626_v58 = vsel %vm1056_vm2, %v7534_v22, %v7657_v24  ;;  %v2608_v12 = vsel %vm1056_vm2, %v7526_v20, %v7514_v21  ;;  %v2625_v22 = vsel %vm1056_vm2, %v7564_v9, %v7496_v28  ;;  %v9572_v24 = vld [vmem:[#allocation54_spill] sm:$0xff]  ;;  %v9573_v34 = vld [vmem:[#allocation25_spill] sm:$0xff]  ;;  %v9574_v21 = vld [vmem:[#allocation28_spill] sm:$0xff] }
 0x652   : > { %3052 = vmatprep.subr.mxu1 %v2637_v61  ;;  %2908 = vmatpush1.msra.mxu0 %v2556_v62  ;;  %v2624_v0 = vsel %vm1056_vm2, %v9572_v24, %v7564_v9  ;;  %v2607_v20 = vsel %vm1056_vm2, %v9574_v21, %v9573_v34  ;;  %v9575_v61 = vld [vmem:[#allocation26_spill] sm:$0xff]  ;;  %v9576_v62 = vld [vmem:[#allocation23_spill] sm:$0xff] }
 0x653   : > { %3053 = vmatpush1.msra.mxu1 %v2636_v25  ;;  %2510 = vrot.lane.b32.xlu0 %v1943_v3, %s5198_s21  ;;  %v7739_v17 = vpop.permute.xlu0 %2480  ;;  %v7741_v48 = vpop.permute.xlu1 %2476  ;;  %v2606_v28 = vsel %vm1056_vm2, %v9575_v61, %v9574_v21  ;;  %v9577_v25 = vld [vmem:[#allocation101_spill] sm:$0xff]  ;;  %v9578_v9 = vld [vmem:[#allocation98_spill] sm:$0xff]  ;;  %v9586_v37 = vld [vmem:[#allocation83_spill] sm:$0xff] }
 0x654   : > { %2404 = vrot.lane.b32.xlu1 %v9552_v30, %s5198_s21  ;;  %2909 = vmatprep.subr.mxu0 %v2555_v8  ;;  %v2552_v30 = vsel %vm1056_vm2, %v9563_v19, %v9564_v41  ;;  %v2623_v3 = vsel %vm1056_vm2, %v9577_v25, %v9576_v62  ;;  %v2622_v8 = vsel %vm1056_vm2, %v9578_v9, %v9577_v25  ;;  %v2038_v19 = vld [vmem:[%s9211_s8 + $0x10] sm:$0xff]  ;;  %v9600_v25 = vld [vmem:[#allocation72_spill] sm:$0xff] }
 0x655   : > { %3054 = vmatprep.subr.mxu1 %v2635_v11  ;;  %2910 = vmatpush1.msra.mxu0 %v2554_v10  ;;  %v9579_v11 = vld [vmem:[#allocation92_spill] sm:$0xff]  ;;  %v9581_v41 = vld [vmem:[#allocation97_spill] sm:$0xff] }
 0x656   : > { %3055 = vmatpush1.msra.mxu1 %v2634_v31  ;;  %2911 = vmatprep.subr.mxu0 %v2553_v54  ;;  %v9580_v10 = vld [vmem:[#allocation96_spill] sm:$0xff]  ;;  %v9597_v21 = vld [vmem:[#allocation69_spill] sm:$0xff] }
 0x657   : > { %3056 = vmatprep.subr.mxu1 %v2633_v38  ;;  %2912 = vmatpush1.msra.mxu0 %v2552_v30  ;;  %v7766_v55 = vpop.permute.xlu0 %2472  ;;  %v7768_v29 = vpop.permute.xlu1 %2474  ;;  %v2605_v31 = vsel %vm1056_vm2, %v9580_v10, %v9579_v11  ;;  %v2604_v54 = vsel %vm1056_vm2, %v9581_v41, %v9580_v10  ;;  %v9582_v38 = vld [vmem:[#allocation95_spill] sm:$0xff]  ;;  %v9583_v30 = vld [vmem:[#allocation37_spill] sm:$0xff]  ;;  %v9603_v10 = vld [vmem:[#allocation56_spill] sm:$0xff] }
 0x658   : > { %3057 = vmatpush1.msra.mxu1 %v2632_v39  ;;  %2506 = vrot.lane.b32.xlu0 %v9556_v2, %s5198_s21  ;;  %v9570_v2 = vld [vmem:[#allocation18_spill] sm:$0xff]  ;;  %v2621_v39 = vsel %vm1056_vm2, %v9583_v30, %v9582_v38  ;;  %v2042_v41 = vld [vmem:[%s9211_s8 + $0x30] sm:$0xff] }
 0x659   : > { %2502 = vrot.lane.b32.xlu1 %v1940_v51, %s5198_s21  ;;  %2913 = vmatprep.subr.mxu0 %v2551_v33  ;;  %v2549_v14 = vsel %vm1056_vm2, %v9570_v2, %v9569_v35  ;;  %v2548_v47 = vsel %vm1056_vm2, %v9569_v35, %v9570_v2  ;;  %v2603_v33 = vsel %vm1056_vm2, %v9586_v37, %v9585_v56  ;;  %v9588_v2 = vld [vmem:[#allocation90_spill] sm:$0xff] }
 0x65a   : > { %3058 = vmatprep.subr.mxu1 %v2631_v5  ;;  %2914 = vmatpush1.msra.mxu0 %v2550_v40 }
 0x65b   : > { %3059 = vmatpush1.msra.mxu1 %v2630_v49  ;;  %2915 = vmatprep.subr.mxu0 %v2549_v14  ;;  %v7797_v27 = vpop.permute.xlu0 %2470  ;;  %v7799_v4 = vpop.permute.xlu1 %2466  ;;  %v9587_v49 = vld [vmem:[#allocation85_spill] sm:$0xff]  ;;  %v9589_v14 = vld [vmem:[#allocation91_spill] sm:$0xff] }
 0x65c   : > { %3060 = vmatprep.subr.mxu1 %v2629_v6  ;;  %2916 = vmatpush1.msra.mxu0 %v2548_v47  ;;  %v2602_v35 = vsel %vm1056_vm2, %v9587_v49, %v9586_v37  ;;  %v2619_v6 = vsel %vm1056_vm2, %v9589_v14, %v9588_v2  ;;  %v9590_v47 = vld [vmem:[#allocation80_spill] sm:$0xff]  ;;  %v9608_v37 = vld [vmem:[#allocation57_spill] sm:$0xff]  ;;  %v2595_v49 = vsel %vm1056_vm2, %v7594_v63, %v7618_v53 }
 0x65d   : > { %3061 = vmatpush1.msra.mxu1 %v2628_v36  ;;  %2504 = vrot.lane.b32.xlu0 %v1941_v13, %s5198_s21  ;;  %v2618_v44 = vsel %vm1056_vm2, %v9590_v47, %v9589_v14  ;;  %v9591_v36 = vld [vmem:[#allocation74_spill] sm:$0xff]  ;;  %v2675_v2 = vsel %vm1056_vm2, %v7680_v59, %v7685_v15  ;;  %v9609_v14 = vld [vmem:[#allocation7_spill] sm:$0xff]  ;;  %v9612_v15 = vld [vmem:[#allocation17_spill] sm:$0xff] }
 0x65e   : > { %2500 = vrot.lane.b32.xlu1 %v9566_v16, %s5198_s21  ;;  %2917 = vmatprep.subr.mxu0 %v2611_v42  ;;  %v9584_v16 = vld [vmem:[#allocation93_spill] sm:$0xff]  ;;  %v9592_v13 = vld [vmem:[#allocation78_spill] sm:$0xff]  ;;  %v9610_v47 = vld [vmem:[#allocation47_spill] sm:$0xff] }
 0x65f   : > { %3062 = vmatprep.subr.mxu1 %v2627_v50  ;;  %2918 = vmatpush2.msra.mxu0 %v2610_v57  ;;  %v7828_v60 = vpop.permute.xlu0 %2468  ;;  %v7830_v1 = vpop.permute.xlu1 %2464  ;;  %v2620_v51 = vsel %vm1056_vm2, %v9584_v16, %v9583_v30  ;;  %v2601_v42 = vsel %vm1056_vm2, %v9592_v13, %v9591_v36  ;;  %v2040_v57 = vld [vmem:[%s9211_s8 + $0x20] sm:$0xff]  ;;  %v2043_v16 = vld [vmem:[%s9211_s8 + $0x38] sm:$0xff] }
 0x660   : > { %3063 = vmatpush1.msra.mxu1 %v2626_v58  ;;  %2919 = vmatprep.subr.mxu0 %v2609_v7  ;;  %v9593_v50 = vld [vmem:[#allocation79_spill] sm:$0xff]  ;;  %v9594_v7 = vld [vmem:[#allocation77_spill] sm:$0xff] }
 0x661   : > { %3064 = vmatprep.subr.mxu1 %v2625_v22  ;;  %2920 = vmatpush2.msra.mxu0 %v2608_v12  ;;  %v2600_v58 = vsel %vm1056_vm2, %v9593_v50, %v9592_v13  ;;  %v2041_v22 = vld [vmem:[%s9211_s8 + $0x28] sm:$0xff]  ;;  %v9606_v30 = vld [vmem:[#allocation59_spill] sm:$0xff] }
 0x662   : > { %3065 = vmatpush1.msra.mxu1 %v2624_v0  ;;  %2054 = vperm.xlu0 %5042, %v2036_v52   ;;  %v9595_v52 = vld [vmem:[#allocation84_spill] sm:$0xff] }
 0x663   : > { %2059 = vperm.xlu1 %5043, %v2037_v46   ;;  %2921 = vmatprep.subr.mxu0 %v2607_v20  ;;  %v7853_v23 = vpop.permute.xlu0 %2460  ;;  %v7855_v26 = vpop.permute.xlu1 %2462  ;;  %v2617_v12 = vsel %vm1056_vm2, %v9595_v52, %v9594_v7  ;;  %v9596_v46 = vld [vmem:[#allocation75_spill] sm:$0xff]  ;;  %v9598_v20 = vld [vmem:[#allocation65_spill] sm:$0xff]  ;;  %v2045_v50 = vld [vmem:[%s9211_s8 + $0x48] sm:$0xff] }
 0x664   : > { %3066 = vmatprep.subr.mxu1 %v2623_v3  ;;  %2922 = vmatpush2.msra.mxu0 %v2606_v28  ;;  %v2616_v24 = vsel %vm1056_vm2, %v9596_v46, %v9595_v52  ;;  %v2599_v61 = vsel %vm1056_vm2, %v9598_v20, %v9597_v21  ;;  %v9599_v28 = vld [vmem:[#allocation67_spill] sm:$0xff]  ;;  %v9601_v3 = vld [vmem:[#allocation73_spill] sm:$0xff]  ;;  %v9619_v21 = vld [vmem:[#allocation102_spill] sm:$0xff] }
 0x665   : > { %3067 = vmatpush1.msra.mxu1 %v2622_v8  ;;  %2923 = vmatprep.subr.mxu0 %v2605_v31  ;;  %v2598_v62 = vsel %vm1056_vm2, %v9599_v28, %v9598_v20  ;;  %v2615_v9 = vsel %vm1056_vm2, %v9601_v3, %v9600_v25  ;;  %v9602_v8 = vld [vmem:[#allocation62_spill] sm:$0xff]  ;;  %v9604_v31 = vld [vmem:[#allocation60_spill] sm:$0xff]  ;;  %v9616_v52 = vld [vmem:[#allocation43_spill] sm:$0xff] }
 0x666   : > { %3068 = vmatprep.subr.mxu1 %v2621_v39  ;;  %2924 = vmatpush2.msra.mxu0 %v2604_v54  ;;  %v2614_v11 = vsel %vm1056_vm2, %v9602_v8, %v9601_v3  ;;  %v9605_v54 = vld [vmem:[#allocation61_spill] sm:$0xff]  ;;  %v9607_v39 = vld [vmem:[#allocation66_spill] sm:$0xff]  ;;  %v9618_v46 = vld [vmem:[#allocation19_spill] sm:$0xff] }
 0x667   : > { %3069 = vmatpush1.msra.mxu1 %v2620_v51  ;;  %2064 = vperm.xlu0 %5042, %v2038_v19   ;;  %v7881_v5 = vpop.permute.xlu0 %2458  ;;  %v7883_v40 = vpop.permute.xlu1 %2454  ;;  %v2597_v19 = vsel %vm1056_vm2, %v9604_v31, %v9603_v10  ;;  %v2596_v38 = vsel %vm1056_vm2, %v9605_v54, %v9604_v31  ;;  %v9620_v20 = vld [vmem:[#allocation49_spill] sm:$0xff]  ;;  %v9621_v3 = vld [vmem:[#allocation94_spill] sm:$0xff]  ;;  %v9623_v10 = vld [vmem:[#allocation100_spill] sm:$0xff] }
 0x668   : > { %2069 = vperm.xlu1 %5043, %v2039_v18   ;;  %2925 = vmatprep.subr.mxu0 %v2603_v33  ;;  %v2613_v18 = vsel %vm1056_vm2, %v9607_v39, %v9606_v30  ;;  %v2612_v33 = vsel %vm1056_vm2, %v9608_v37, %v9607_v39  ;;  %v2670_v25 = vsel %vm1056_vm2, %v7713_v45, %v9620_v20  ;;  %v9624_v54 = vld [vmem:[#allocation89_spill] sm:$0xff]  ;;  %v9627_v37 = vld [vmem:[#allocation76_spill] sm:$0xff] }
 0x669   : > { %3070 = vmatprep.subr.mxu1 %v2619_v6  ;;  %2926 = vmatpush2.msra.mxu0 %v2602_v35  ;;  %v2594_v35 = vsel %vm1056_vm2, %v7613_v32, %v7594_v63  ;;  %v2674_v6 = vsel %vm1056_vm2, %v9609_v14, %v7680_v59  ;;  %v2044_v63 = vld [vmem:[%s9211_s8 + $0x40] sm:$0xff]  ;;  %v9614_v59 = vld [vmem:[#allocation48_spill] sm:$0xff]  ;;  %v2669_v45 = vsel %vm1056_vm2, %v7715_v43, %v7739_v17 }
 0x66a   : > { %3071 = vmatpush1.msra.mxu1 %v2618_v44  ;;  %2927 = vmatprep.subr.mxu0 %v2601_v42  ;;  %v9611_v44 = vld [vmem:[#allocation51_spill] sm:$0xff]  ;;  %v9613_v42 = vld [vmem:[#allocation53_spill] sm:$0xff]  ;;  %v9626_v17 = vld [vmem:[#allocation88_spill] sm:$0xff] }
 0x66b   : > { %3072 = vmatprep.subr.mxu1 %v2617_v12  ;;  %2928 = vmatpush2.msra.mxu0 %v2600_v58  ;;  %v7912_v0 = vpop.permute.xlu0 %2456  ;;  %v7914_v34 = vpop.permute.xlu1 %2452  ;;  %v2593_v53 = vsel %vm1056_vm2, %v9611_v44, %v9610_v47  ;;  %v2592_v13 = vsel %vm1056_vm2, %v9612_v15, %v9611_v44  ;;  %v9615_v58 = vld [vmem:[#allocation46_spill] sm:$0xff]  ;;  %v9617_v12 = vld [vmem:[#allocation36_spill] sm:$0xff]  ;;  %v9630_v44 = vld [vmem:[#allocation71_spill] sm:$0xff] }
 0x66c   : > { %3073 = vmatpush1.msra.mxu1 %v2616_v24  ;;  %2074 = vperm.xlu0 %5042, %v2040_v57   ;;  %v2673_v57 = vsel %vm1056_vm2, %v9614_v59, %v9613_v42  ;;  %v2672_v7 = vsel %vm1056_vm2, %v9615_v58, %v9614_v59  ;;  %v2590_v24 = vsel %vm1056_vm2, %v9618_v46, %v9617_v12  ;;  %v9634_v42 = vld [vmem:[#allocation63_spill] sm:$0xff] }
 0x66d   : > { %2079 = vperm.xlu1 %5043, %v2041_v22   ;;  %2929 = vmatprep.subr.mxu0 %v2599_v61  ;;  %v2591_v22 = vsel %vm1056_vm2, %v9617_v12, %v9616_v52  ;;  %v2671_v61 = vsel %vm1056_vm2, %v9620_v20, %v9619_v21  ;;  %v2660_v12 = vsel %vm1056_vm2, %v7914_v34, %v7883_v40  ;;  %v1961_v21 = vld [vmem:[%s9210_s7 + $0x28] sm:$0xff] }
 0x66e   : > { %3074 = vmatprep.subr.mxu1 %v2615_v9  ;;  %2930 = vmatpush2.msra.mxu0 %v2598_v62  ;;  %v9622_v9 = vld [vmem:[#allocation99_spill] sm:$0xff] }
 0x66f   : > { %3075 = vmatpush1.msra.mxu1 %v2614_v11  ;;  %2931 = vmatprep.subr.mxu0 %v2597_v19  ;;  %v7943_v51 = vpop.permute.xlu0 %2448  ;;  %v7945_v56 = vpop.permute.xlu1 %2450  ;;  %v2589_v8 = vsel %vm1056_vm2, %v9622_v9, %v9621_v3  ;;  %v2046_v11 = vld [vmem:[%s9211_s8 + $0x50] sm:$0xff]  ;;  %v2588_v31 = vsel %vm1056_vm2, %v9623_v10, %v9622_v9  ;;  %v2047_v19 = vld [vmem:[%s9211_s8 + $0x58] sm:$0xff] }
 0x670   : > { %3076 = vmatprep.subr.mxu1 %v2613_v18  ;;  %2932 = vmatpush2.msra.mxu0 %v2596_v38  ;;  %v9625_v38 = vld [vmem:[#allocation86_spill] sm:$0xff]  ;;  %v2659_v46 = vsel %vm1056_vm2, %v7943_v51, %v7945_v56 }
 0x671   : > { %3077 = vmatpush1.msra.mxu1 %v2612_v33  ;;  %2084 = vperm.xlu0 %5042, %v2042_v41   ;;  %v2668_v41 = vsel %vm1056_vm2, %v7741_v48, %v7715_v43  ;;  %v2587_v30 = vsel %vm1056_vm2, %v9625_v38, %v9624_v54  ;;  %v2667_v43 = vsel %vm1056_vm2, %v7766_v55, %v7768_v29  ;;  %v9628_v33 = vld [vmem:[#allocation81_spill] sm:$0xff]  ;;  %v2049_v29 = vld [vmem:[%s9211_s8 + $0x68] sm:$0xff]  ;;  %v1959_v3 = vld [vmem:[%s9210_s7 + $0x18] sm:$0xff] }
 0x672   : > { %2089 = vperm.xlu1 %5043, %v2043_v16   ;;  %2933 = vmatprep.subr.mxu0 %v2595_v49  ;;  %v2586_v16 = vsel %vm1056_vm2, %v9626_v17, %v9625_v38  ;;  %v2666_v48 = vsel %vm1056_vm2, %v7797_v27, %v7766_v55  ;;  %v2585_v49 = vsel %vm1056_vm2, %v9628_v33, %v9627_v37  ;;  %v1971_v10 = vld [vmem:[%s9210_s7 + $0x78] sm:$0xff]  ;;  %v1976_v54 = vld [vmem:[%s9210_s7 + $0xa0] sm:$0xff] }
 0x673   : > { %3078 = vmatprep.subr.mxu1 %v2675_v2  ;;  %2934 = vmatpush2.msra.mxu0 %v2594_v35  ;;  %v7968_v32 = vpop.permute.xlu0 %2446  ;;  %v7970_v36 = vpop.permute.xlu1 %2442  ;;  %v2048_v35 = vld [vmem:[%s9211_s8 + $0x60] sm:$0xff]  ;;  %v9629_v2 = vld [vmem:[#allocation82_spill] sm:$0xff]  ;;  %v2665_v55 = vsel %vm1056_vm2, %v7799_v4, %v7828_v60  ;;  %v2664_v27 = vsel %vm1056_vm2, %v7830_v1, %v7799_v4  ;;  %v2663_v4 = vsel %vm1056_vm2, %v7853_v23, %v7855_v26 }
 0x674   : > { %3079 = vmatpush2.msra.mxu1 %v2674_v6  ;;  %2935 = vmatprep.subr.mxu0 %v2593_v53  ;;  %v2584_v14 = vsel %vm1056_vm2, %v9629_v2, %v9628_v33  ;;  %v9631_v53 = vld [vmem:[#allocation68_spill] sm:$0xff]  ;;  %v9632_v60 = vld [vmem:[#allocation70_spill] sm:$0xff]  ;;  %v2662_v1 = vsel %vm1056_vm2, %v7881_v5, %v7853_v23  ;;  %v2661_v23 = vsel %vm1056_vm2, %v7883_v40, %v7912_v0  ;;  %v1956_v5 = vld [vmem:[%s9210_s7] sm:$0xff] }
 0x675   : > { %3080 = vmatprep.subr.mxu1 %v2673_v57  ;;  %2936 = vmatpush2.msra.mxu0 %v2592_v13  ;;  %v2582_v15 = vsel %vm1056_vm2, %v9632_v60, %v9631_v53  ;;  %v9633_v13 = vld [vmem:[#allocation58_spill] sm:$0xff]  ;;  %v2050_v57 = vld [vmem:[%s9211_s8 + $0x70] sm:$0xff]  ;;  %v2658_v34 = vsel %vm1056_vm2, %v7968_v32, %v7943_v51 }
 0x676   : > { %3081 = vmatpush2.msra.mxu1 %v2672_v7  ;;  %2094 = vperm.xlu0 %5042, %v2044_v63   ;;  %v2583_v63 = vsel %vm1056_vm2, %v9631_v53, %v9630_v44  ;;  %v2581_v59 = vsel %vm1056_vm2, %v9634_v42, %v9633_v13  ;;  %v2051_v26 = vld [vmem:[%s9211_s8 + $0x78] sm:$0xff]  ;;  %v1962_v0 = vld [vmem:[%s9210_s7 + $0x30] sm:$0xff]  ;;  %v2001_v13 = vld [vmem:[%s9210_s7 + $0x168] sm:$0xff] }
 0x677   : > { %2099 = vperm.xlu1 %5043, %v2045_v50   ;;  %2937 = vmatprep.subr.mxu0 %v2591_v22  ;;  %v7993_v28 = vpop.permute.xlu0 %2444  ;;  %v7995_v62 = vpop.permute.xlu1 %2544  ;;  %v9635_v50 = vld [vmem:[#allocation64_spill] sm:$0xff]  ;;  %v1967_v51 = vld [vmem:[%s9210_s7 + $0x58] sm:$0xff] }
 0x678   : > { %3082 = vmatprep.subr.mxu1 %v2671_v61  ;;  %2938 = vmatpush2.msra.mxu0 %v2590_v24  ;;  %v2580_v58 = vsel %vm1056_vm2, %v9635_v50, %v9634_v42  ;;  %v2657_v56 = vsel %vm1056_vm2, %v7970_v36, %v7993_v28  ;;  %v1987_v37 = vld [vmem:[%s9210_s7 + $0xf8] sm:$0xff] }
 0x679   : > { %3083 = vmatpush2.msra.mxu1 %v2670_v25  ;;  %2939 = vmatprep.subr.mxu0 %v2589_v8  ;;  %v1972_v8 = vld [vmem:[%s9210_s7 + $0x80] sm:$0xff] }
 0x67a   : > { %3084 = vmatprep.subr.mxu1 %v2669_v45  ;;  %2940 = vmatpush2.msra.mxu0 %v2588_v31 }
 0x67b   : > { %3085 = vmatpush2.msra.mxu1 %v2668_v41  ;;  %2104 = vperm.xlu0 %5042, %v2046_v11   ;;  %v2547_v39 = vpop.permute.xlu0 %2546  ;;  %v2441_v18 = vpop.permute.xlu1 %2440 }
 0x67c   : > { %2109 = vperm.xlu1 %5043, %v2047_v19   ;;  %2941 = vmatprep.subr.mxu0 %v2587_v30  ;;  %v2691_v22 = vsel %vm1056_vm2, %v7995_v62, %v2547_v39  ;;  %v2656_v24 = vsel %vm1056_vm2, %v2441_v18, %v7970_v36  ;;  %v1966_v36 = vld [vmem:[%s9210_s7 + $0x50] sm:$0xff]  ;;  %v1977_v19 = vld [vmem:[%s9210_s7 + $0xa8] sm:$0xff] }
 0x67d   : > { %3086 = vmatprep.subr.mxu1 %v2667_v43  ;;  %2942 = vmatpush2.msra.mxu0 %v2586_v16  ;;  %v1982_v39 = vld [vmem:[%s9210_s7 + $0xd0] sm:$0xff]  ;;  %v1981_v16 = vld [vmem:[%s9210_s7 + $0xc8] sm:$0xff] }
 0x67e   : > { %3087 = vmatpush2.msra.mxu1 %v2666_v48  ;;  %2943 = vmatprep.subr.mxu0 %v2585_v49  ;;  %v1986_v49 = vld [vmem:[%s9210_s7 + $0xf0] sm:$0xff] }
 0x67f   : > { %3088 = vmatprep.subr.mxu1 %v2665_v55  ;;  %2944 = vmatpush2.msra.mxu0 %v2584_v14  ;;  %v2543_v6 = vpop.permute.xlu0 %2542  ;;  %v2437_v47 = vpop.permute.xlu1 %2436  ;;  %v1992_v14 = vld [vmem:[%s9210_s7 + $0x120] sm:$0xff] }
 0x680   : > { %3089 = vmatpush2.msra.mxu1 %v2664_v27  ;;  %2114 = vperm.xlu0 %5042, %v2048_v35   ;;  %v2690_v40 = vsel %vm1056_vm2, %v2543_v6, %v7995_v62 }
 0x681   : > { %2119 = vperm.xlu1 %5043, %v2049_v29   ;;  %2945 = vmatprep.subr.mxu0 %v2583_v63  ;;  %v1991_v29 = vld [vmem:[%s9210_s7 + $0x118] sm:$0xff]  ;;  %v1996_v63 = vld [vmem:[%s9210_s7 + $0x140] sm:$0xff] }
 0x682   : > { %3090 = vmatprep.subr.mxu1 %v2663_v4  ;;  %2946 = vmatpush2.msra.mxu0 %v2582_v15  ;;  %v2002_v4 = vld [vmem:[%s9210_s7 + $0x170] sm:$0xff] }
 0x683   : > { %3091 = vmatpush2.msra.mxu1 %v2662_v1  ;;  %2947 = vmatprep.subr.mxu0 %v2581_v59  ;;  %v2439_v7 = vpop.permute.xlu0 %2438  ;;  %v2539_v52 = vpop.permute.xlu1 %2538 }
 0x684   : > { %3092 = vmatprep.subr.mxu1 %v2661_v23  ;;  %2948 = vmatpush2.msra.mxu0 %v2580_v58  ;;  %v2655_v32 = vsel %vm1056_vm2, %v2437_v47, %v2439_v7  ;;  %v2006_v58 = vld [vmem:[%s9210_s7 + $0x190] sm:$0xff] }
 0x685   : > { %3093 = vmatpush2.msra.mxu1 %v2660_v12  ;;  %2124 = vperm.xlu0 %5042, %v2050_v57   ;;  %v2007_v57 = vld [vmem:[%s9210_s7 + $0x198] sm:$0xff] }
 0x686   : > { %2129 = vperm.xlu1 %5043, %v2051_v26   ;;  %2950 = vmatmul.mubr.f32.vlgmr.msra.gmra.mxu0 %v1956_v5  ;;  %v2012_v5 = vld [vmem:[%s9210_s7 + $0x1c0] sm:$0xff]  ;;  %v2011_v12 = vld [vmem:[%s9210_s7 + $0x1b8] sm:$0xff] }
 0x687   : > { %3094 = vmatprep.subr.mxu1 %v2659_v46  ;;  %2955 = vmatprep.mubr.f32.mxu0 %v1962_v0  ;;  %v2541_v20 = vpop.permute.xlu0 %2540  ;;  %v2435_v61 = vpop.permute.xlu1 %2434 }
 0x688   : > { %3095 = vmatpush2.msra.mxu1 %v2658_v34  ;;  %3223 = vmatprep.subr.mxu0 %v2691_v22  ;;  %v2654_v62 = vsel %vm1056_vm2, %v2435_v61, %v2437_v47  ;;  %v2689_v25 = vsel %vm1056_vm2, %v2539_v52, %v2541_v20  ;;  %v1997_v47 = vld [vmem:[%s9210_s7 + $0x148] sm:$0xff]  ;;  %v2016_v34 = vld [vmem:[%s9210_s7 + $0x1e0] sm:$0xff] }
 0x689   : > { %3096 = vmatprep.subr.mxu1 %v2657_v56  ;;  %3224 = vmatpush1.msra.mxu0 %v2690_v40  ;;  %v2017_v22 = vld [vmem:[%s9210_s7 + $0x1e8] sm:$0xff] }
 0x68a   : > { %2956 = vmatmul.mubr.f32.gmra.mxu0 %v1961_v21  ;;  %3097 = vmatpush2.msra.mxu1 %v2656_v24  ;;  %v2022_v21 = vld [vmem:[%s9210_s7 + $0x210] sm:$0xff]  ;;  %v2021_v56 = vld [vmem:[%s9210_s7 + $0x208] sm:$0xff] }
 0x68b   : > { %2961 = vmatprep.mubr.f32.mxu0 %v1967_v51  ;;  %3098 = vmatprep.subr.mxu1 %v2655_v32  ;;  %v2537_v28 = vpop.permute.xlu0 %2536  ;;  %v2431_v9 = vpop.permute.xlu1 %2430  ;;  %v2027_v32 = vld [vmem:[%s9210_s7 + $0x238] sm:$0xff] }
 0x68c   : > { %3099 = vmatpush2.msra.mxu1 %v2654_v62  ;;  %3225 = vmatprep.subr.mxu0 %v2689_v25  ;;  %v2688_v11 = vsel %vm1056_vm2, %v2537_v28, %v2539_v52 }
 0x68d   : > { %3226 = vmatpush1.msra.mxu0 %v2688_v11  ;;  %3110 = vmatprep.mubr.f32.mxu1 %v1959_v3 }
 0x68e   : > { %2962 = vmatmul.mubr.f32.gmra.mxu0 %v1966_v36  ;;  %v2026_v36 = vld [vmem:[%s9210_s7 + $0x230] sm:$0xff] }
 0x68f   : > { %2967 = vmatprep.mubr.f32.mxu0 %v1972_v8  ;;  %v2433_v31 = vpop.permute.xlu0 %2432  ;;  %v2533_v45 = vpop.permute.xlu1 %2532 }
 0x690   : > { %v2653_v41 = vsel %vm1056_vm2, %v2431_v9, %v2433_v31 }
 0x691   : > { %3100 = vmatprep.subr.mxu1 %v2653_v41  ;;  %v9636_v41 = vmov 0.0  }
 0x692   : > { %2968 = vmatmul.mubr.f32.gmra.mxu0 %v1971_v10  ;;  %v2031_v10 = vld [vmem:[%s9210_s7 + $0x258] sm:$0xff] }
 0x693   : > { %2973 = vmatprep.mubr.f32.mxu0 %v1977_v19  ;;  %v2535_v38 = vpop.permute.xlu0 %2534  ;;  %v2429_v30 = vpop.permute.xlu1 %2428 }
 0x694   : > { %v2652_v18 = vsel %vm1056_vm2, %v2429_v30, %v2431_v9  ;;  %v2687_v17 = vsel %vm1056_vm2, %v2533_v45, %v2535_v38  ;;  %v2032_v9 = vld [vmem:[%s9210_s7 + $0x260] sm:$0xff] }
 0x695   : > { %3101 = vmatpush2.msra.mxu1 %v2652_v18  ;;  %3227 = vmatprep.subr.mxu0 %v2687_v17  ;;  %v1964_v17 = vld [vmem:[%s9210_s7 + $0x40] sm:$0xff] }
 0x696   : > { %2974 = vmatmul.mubr.f32.gmra.mxu0 %v1976_v54 }
 0x697   : > { %2979 = vmatprep.mubr.f32.mxu0 %v1982_v39  ;;  %v2531_v43 = vpop.permute.xlu0 %2530  ;;  %v2425_v48 = vpop.permute.xlu1 %2424  ;;  %v1958_v39 = vld [vmem:[%s9210_s7 + $0x10] sm:$0xff] }
 0x698   : > { %v2686_v33 = vsel %vm1056_vm2, %v2531_v43, %v2533_v45  ;;  %v1963_v43 = vld [vmem:[%s9210_s7 + $0x38] sm:$0xff] }
 0x699   : > { %3228 = vmatpush1.msra.mxu0 %v2686_v33  ;;  %v1969_v33 = vld [vmem:[%s9210_s7 + $0x68] sm:$0xff] }
 0x69a   : > { %2980 = vmatmul.mubr.f32.gmra.mxu0 %v1981_v16 }
 0x69b   : > { %2985 = vmatprep.mubr.f32.mxu0 %v1987_v37  ;;  %v2427_v35 = vpop.permute.xlu0 %2426  ;;  %v2527_v2 = vpop.permute.xlu1 %2526 }
 0x69c   : > { %v2651_v55 = vsel %vm1056_vm2, %v2425_v48, %v2427_v35 }
 0x69d   : > { %3102 = vmatprep.subr.mxu1 %v2651_v55 }
 0x69e   : > { %2986 = vmatmul.mubr.f32.gmra.mxu0 %v1986_v49  ;;  %v1968_v49 = vld [vmem:[%s9210_s7 + $0x60] sm:$0xff] }
 0x69f   : > { %2991 = vmatprep.mubr.f32.mxu0 %v1992_v14  ;;  %v2529_v27 = vpop.permute.xlu0 %2528  ;;  %v2423_v6 = vpop.permute.xlu1 %2422 }
 0x6a0   : > { %v2650_v44 = vsel %vm1056_vm2, %v2423_v6, %v2425_v48  ;;  %v2685_v53 = vsel %vm1056_vm2, %v2527_v2, %v2529_v27  ;;  %v1973_v6 = vld [vmem:[%s9210_s7 + $0x88] sm:$0xff] }
 0x6a1   : > { %3103 = vmatpush2.msra.mxu1 %v2650_v44  ;;  %3229 = vmatprep.subr.mxu0 %v2685_v53  ;;  %v1965_v44 = vld [vmem:[%s9210_s7 + $0x48] sm:$0xff]  ;;  %v1978_v53 = vld [vmem:[%s9210_s7 + $0xb0] sm:$0xff] }
 0x6a2   : > { %2992 = vmatmul.mubr.f32.gmra.mxu0 %v1991_v29  ;;  %v1960_v29 = vld [vmem:[%s9210_s7 + $0x20] sm:$0xff] }
 0x6a3   : > { %2997 = vmatprep.mubr.f32.mxu0 %v1997_v47  ;;  %v2525_v60 = vpop.permute.xlu0 %2524  ;;  %v2419_v15 = vpop.permute.xlu1 %2418  ;;  %v1979_v47 = vld [vmem:[%s9210_s7 + $0xb8] sm:$0xff] }
 0x6a4   : > { %v2684_v1 = vsel %vm1056_vm2, %v2525_v60, %v2527_v2  ;;  %v1974_v2 = vld [vmem:[%s9210_s7 + $0x90] sm:$0xff] }
 0x6a5   : > { %3230 = vmatpush1.msra.mxu0 %v2684_v1  ;;  %v1970_v60 = vld [vmem:[%s9210_s7 + $0x70] sm:$0xff]  ;;  %v1975_v1 = vld [vmem:[%s9210_s7 + $0x98] sm:$0xff] }
 0x6a6   : > { %2998 = vmatmul.mubr.f32.gmra.mxu0 %v1996_v63  ;;  %v1984_v63 = vld [vmem:[%s9210_s7 + $0xe0] sm:$0xff] }
 0x6a7   : > { %3003 = vmatprep.mubr.f32.mxu0 %v2002_v4  ;;  %v2421_v42 = vpop.permute.xlu0 %2420  ;;  %v2521_v59 = vpop.permute.xlu1 %2520  ;;  %v1989_v4 = vld [vmem:[%s9210_s7 + $0x108] sm:$0xff] }
 0x6a8   : > { %v2649_v50 = vsel %vm1056_vm2, %v2419_v15, %v2421_v42  ;;  %v1994_v42 = vld [vmem:[%s9210_s7 + $0x130] sm:$0xff] }
 0x6a9   : > { %3104 = vmatprep.subr.mxu1 %v2649_v50  ;;  %v1999_v50 = vld [vmem:[%s9210_s7 + $0x158] sm:$0xff] }
 0x6aa   : > { %3004 = vmatmul.mubr.f32.gmra.mxu0 %v2001_v13  ;;  %v1988_v13 = vld [vmem:[%s9210_s7 + $0x100] sm:$0xff] }
 0x6ab   : > { %3009 = vmatprep.mubr.f32.mxu0 %v2007_v57  ;;  %v2523_v23 = vpop.permute.xlu0 %2522  ;;  %v2417_v26 = vpop.permute.xlu1 %2416  ;;  %v1993_v57 = vld [vmem:[%s9210_s7 + $0x128] sm:$0xff] }
 0x6ac   : > { %v2648_v7 = vsel %vm1056_vm2, %v2417_v26, %v2419_v15  ;;  %v2683_v52 = vsel %vm1056_vm2, %v2521_v59, %v2523_v23  ;;  %v1983_v15 = vld [vmem:[%s9210_s7 + $0xd8] sm:$0xff]  ;;  %v1998_v23 = vld [vmem:[%s9210_s7 + $0x150] sm:$0xff]  ;;  %v2004_v26 = vld [vmem:[%s9210_s7 + $0x180] sm:$0xff] }
 0x6ad   : > { %3105 = vmatpush2.msra.mxu1 %v2648_v7  ;;  %3231 = vmatprep.subr.mxu0 %v2683_v52  ;;  %v2003_v7 = vld [vmem:[%s9210_s7 + $0x178] sm:$0xff]  ;;  %v2009_v52 = vld [vmem:[%s9210_s7 + $0x1a8] sm:$0xff] }
 0x6ae   : > { %3010 = vmatmul.mubr.f32.gmra.mxu0 %v2006_v58  ;;  %v1985_v58 = vld [vmem:[%s9210_s7 + $0xe8] sm:$0xff] }
 0x6af   : > { %3015 = vmatprep.mubr.f32.mxu0 %v2012_v5  ;;  %v2519_v0 = vpop.permute.xlu0 %2518  ;;  %v1990_v5 = vld [vmem:[%s9210_s7 + $0x110] sm:$0xff] }
 0x6b0   : > { %v2682_v46 = vsel %vm1056_vm2, %v2519_v0, %v2521_v59  ;;  %v2413_v40 = vpop.permute.xlu1 %2412  ;;  %v1980_v59 = vld [vmem:[%s9210_s7 + $0xc0] sm:$0xff] }
 0x6b1   : > { %3232 = vmatpush1.msra.mxu0 %v2682_v46  ;;  %v2008_v0 = vld [vmem:[%s9210_s7 + $0x1a0] sm:$0xff] }
 0x6b2   : > { %3016 = vmatmul.mubr.f32.gmra.mxu0 %v2011_v12  ;;  %v1995_v12 = vld [vmem:[%s9210_s7 + $0x138] sm:$0xff]  ;;  %v2000_v46 = vld [vmem:[%s9210_s7 + $0x160] sm:$0xff] }
 0x6b3   : > { %3021 = vmatprep.mubr.f32.mxu0 %v2017_v22  ;;  %v2415_v24 = vpop.permute.xlu0 %2414  ;;  %v2014_v22 = vld [vmem:[%s9210_s7 + $0x1d0] sm:$0xff] }
 0x6b4   : > { %v2515_v20 = vpop.permute.xlu1 %2514  ;;  %v2647_v61 = vsel %vm1056_vm2, %v2413_v40, %v2415_v24  ;;  %v2005_v24 = vld [vmem:[%s9210_s7 + $0x188] sm:$0xff] }
 0x6b5   : > { %3106 = vmatprep.subr.mxu1 %v2647_v61  ;;  %v2010_v61 = vld [vmem:[%s9210_s7 + $0x1b0] sm:$0xff] }
 0x6b6   : > { %3022 = vmatmul.mubr.f32.gmra.mxu0 %v2016_v34  ;;  %v2019_v34 = vld [vmem:[%s9210_s7 + $0x1f8] sm:$0xff] }
 0x6b7   : > { %3027 = vmatprep.mubr.f32.mxu0 %v2022_v21  ;;  %v2517_v51 = vpop.permute.xlu0 %2516  ;;  %v2018_v21 = vld [vmem:[%s9210_s7 + $0x1f0] sm:$0xff] }
 0x6b8   : > { %v2411_v62 = vpop.permute.xlu1 %2410  ;;  %v2681_v25 = vsel %vm1056_vm2, %v2515_v20, %v2517_v51  ;;  %v2029_v51 = vld [vmem:[%s9210_s7 + $0x248] sm:$0xff] }
 0x6b9   : > { %v2646_v3 = vsel %vm1056_vm2, %v2411_v62, %v2413_v40  ;;  %3233 = vmatprep.subr.mxu0 %v2681_v25  ;;  %v2013_v40 = vld [vmem:[%s9210_s7 + $0x1c8] sm:$0xff]  ;;  %v2028_v62 = vld [vmem:[%s9210_s7 + $0x240] sm:$0xff]  ;;  %v2034_v25 = vld [vmem:[%s9210_s7 + $0x270] sm:$0xff] }
 0x6ba   : > { %3028 = vmatmul.mubr.f32.gmra.mxu0 %v2021_v56  ;;  %3107 = vmatpush2.msra.mxu1 %v2646_v3  ;;  %v2023_v56 = vld [vmem:[%s9210_s7 + $0x218] sm:$0xff]  ;;  %v2020_v3 = vld [vmem:[%s9210_s7 + $0x200] sm:$0xff] }
 0x6bb   : > { %3033 = vmatprep.mubr.f32.mxu0 %v2027_v32  ;;  %v2513_v28 = vpop.permute.xlu0 %2512  ;;  %v2015_v32 = vld [vmem:[%s9210_s7 + $0x1d8] sm:$0xff] }
 0x6bc   : > { %v2680_v8 = vsel %vm1056_vm2, %v2513_v28, %v2515_v20  ;;  %v2407_v11 = vpop.permute.xlu1 %2406  ;;  %v2024_v20 = vld [vmem:[%s9210_s7 + $0x220] sm:$0xff]  ;;  %v2025_v28 = vld [vmem:[%s9210_s7 + $0x228] sm:$0xff] }
 0x6bd   : > { %3234 = vmatpush1.msra.mxu0 %v2680_v8  ;;  %v2035_v8 = vld [vmem:[%s9210_s7 + $0x278] sm:$0xff] }
 0x6be   : > { %3034 = vmatmul.mubr.f32.gmra.mxu0 %v2026_v36  ;;  %v2033_v36 = vld [vmem:[%s9210_s7 + $0x268] sm:$0xff] }
 0x6bf   : > { %3039 = vmatprep.mubr.f32.mxu0 %v2032_v9  ;;  %v2030_v9 = vld [vmem:[%s9210_s7 + $0x250] sm:$0xff] }
 0x6c0   : > { %v2409_v31 = vpop.permute.xlu0 %2408 }
 0x6c1   : > { %v2509_v45 = vpop.permute.xlu1 %2508  ;;  %v2645_v19 = vsel %vm1056_vm2, %v2407_v11, %v2409_v31  ;;  %v8408_v31 = vld [vmem:[%s9205_s2 + $0x28] sm:$0xff] }
 0x6c2   : > { %3040 = vmatmul.mubr.f32.gmra.mxu0 %v2031_v10  ;;  %3108 = vmatprep.subr.mxu1 %v2645_v19  ;;  %v8399_v10 = vld [vmem:[%s9205_s2 + $0x30] sm:$0xff]  ;;  %v8426_v19 = vld [vmem:[%s9205_s2 + $0x18] sm:$0xff] }
 0x6c3   : > { %3271 = vmatprep.mubr.f32.mxu0 %v9636_v41 }
 0x6c5   : > { %v2511_v54 = vpop.permute.xlu0 %2510 }
 0x6c6   : > { %v2405_v38 = vpop.permute.xlu1 %2404  ;;  %v2679_v30 = vsel %vm1056_vm2, %v2509_v45, %v2511_v54  ;;  %v8444_v54 = vld [vmem:[%s9205_s2 + $0x8] sm:$0xff] }
 0x6c7   : > { %v2644_v18 = vsel %vm1056_vm2, %v2405_v38, %v2407_v11  ;;  %3235 = vmatprep.subr.mxu0 %v2679_v30  ;;  %v8391_v11 = vld [vmem:[%s9205_s2 + $0x38] sm:$0xff]  ;;  %v8453_v38 = vld [vmem:[%s9205_s2] sm:$0xff] }
 0x6c8   : > { %3109 = vmatpush2.msra.mxu1 %v2644_v18  ;;  %9637 = vst [vmem:[#allocation8_spill] sm:$0xff] %v8453_v38 }
 0x6c9   : > { %3111 = vmatmul.mubr.f32.vlgmr.msra.gmra.mxu1 %v1958_v39  ;;  %4846 = vmatprep.subr.mxu1 %v8391_v11 }
 0x6ca   : > { %v2507_v16 = vpop.permute.xlu0 %2506  ;;  %3116 = vmatprep.mubr.f32.mxu1 %v1964_v17  ;;  %4847 = vmatpush3.msra.mxu1 %v8391_v11 }
 0x6cb   : > { %v2678_v48 = vsel %vm1056_vm2, %v2507_v16, %v2509_v45  ;;  %v2503_v37 = vpop.permute.xlu1 %2502  ;;  %4848 = vmatprep.subr.mxu1 %v8399_v10  ;;  %v8417_v45 = vld [vmem:[%s9205_s2 + $0x20] sm:$0xff] }
 0x6cc   : > { %3236 = vmatpush1.msra.mxu0 %v2678_v48  ;;  %4849 = vmatpush3.msra.mxu1 %v8399_v10 }
 0x6cd   : > { %3117 = vmatmul.mubr.f32.gmra.mxu1 %v1963_v43  ;;  %4850 = vmatprep.subr.mxu1 %v8408_v31 }
 0x6ce   : > { %3122 = vmatprep.mubr.f32.mxu1 %v1969_v33  ;;  %4851 = vmatpush3.msra.mxu1 %v8408_v31 }
 0x6cf   : > { %v2505_v35 = vpop.permute.xlu0 %2504  ;;  %4852 = vmatprep.subr.mxu1 %v8417_v45 }
 0x6d0   : > { %v2501_v14 = vpop.permute.xlu1 %2500  ;;  %v2677_v55 = vsel %vm1056_vm2, %v2503_v37, %v2505_v35  ;;  %4853 = vmatpush3.msra.mxu1 %v8417_v45 }
 0x6d1   : > { %v2676_v27 = vsel %vm1056_vm2, %v2501_v14, %v2503_v37  ;;  %3237 = vmatprep.subr.mxu0 %v2677_v55  ;;  %3123 = vmatmul.mubr.f32.gmra.mxu1 %v1968_v49 }
 0x6d2   : > { %3238 = vmatpush1.msra.mxu0 %v2676_v27  ;;  %3128 = vmatprep.mubr.f32.mxu1 %v1974_v2 }
 0x6d3   : > { %4586 = vmatmul.mubr.msk.f32.vlgmr.msra.gmra.mxu0 %vm2836_vm10, %v1960_v29  ;;  %4886 = vmatprep.subr.mxu0 %v8391_v11 }
 0x6d4   : > { %3277 = vmatprep.mubr.f32.mxu0 %v9636_v41  ;;  %4887 = vmatpush3.msra.mxu0 %v8391_v11 }
 0x6d5   : > { %3129 = vmatmul.mubr.f32.gmra.mxu1 %v1973_v6  ;;  %4888 = vmatprep.subr.mxu0 %v8399_v10 }
 0x6d6   : > { %3134 = vmatprep.mubr.f32.mxu1 %v1979_v47  ;;  %4889 = vmatpush3.msra.mxu0 %v8399_v10 }
 0x6d7   : > { %4587 = vmatmul.mubr.msk.f32.gmra.mxu0 %vm2836_vm10, %v1965_v44  ;;  %4890 = vmatprep.subr.mxu0 %v8408_v31 }
 0x6d8   : > { %3283 = vmatprep.mubr.f32.mxu0 %v9636_v41  ;;  %4891 = vmatpush3.msra.mxu0 %v8408_v31 }
 0x6d9   : > { %3135 = vmatmul.mubr.f32.gmra.mxu1 %v1978_v53  ;;  %4892 = vmatprep.subr.mxu0 %v8417_v45 }
 0x6da   : > { %3140 = vmatprep.mubr.f32.mxu1 %v1984_v63  ;;  %4893 = vmatpush3.msra.mxu0 %v8417_v45 }
 0x6db   : > { %4588 = vmatmul.mubr.msk.f32.gmra.mxu0 %vm2836_vm10, %v1970_v60  ;;  %4854 = vmatprep.subr.mxu1 %v8426_v19 }
 0x6dc   : > { %3289 = vmatprep.mubr.f32.mxu0 %v9636_v41  ;;  %4894 = vmatprep.subr.mxu0 %v8426_v19 }
 0x6dd   : > { %3141 = vmatmul.mubr.f32.gmra.mxu1 %v1983_v15  ;;  %4895 = vmatpush3.msra.mxu0 %v8426_v19 }
 0x6de   : > { %3146 = vmatprep.mubr.f32.mxu1 %v1989_v4  ;;  %4855 = vmatpush3.msra.mxu1 %v8426_v19 }
 0x6df   : > { %4589 = vmatmul.mubr.msk.f32.gmra.mxu0 %vm2836_vm10, %v1975_v1 }
 0x6e0   : > { %3295 = vmatprep.mubr.f32.mxu0 %v9636_v41 }
 0x6e1   : > { %3147 = vmatmul.mubr.f32.gmra.mxu1 %v1988_v13 }
 0x6e2   : > { %3152 = vmatprep.mubr.f32.mxu1 %v1994_v42 }
 0x6e3   : > { %4590 = vmatmul.mubr.msk.f32.gmra.mxu0 %vm2836_vm10, %v1980_v59 }
 0x6e4   : > { %3301 = vmatprep.mubr.f32.mxu0 %v9636_v41 }
 0x6e5   : > { %3153 = vmatmul.mubr.f32.gmra.mxu1 %v1993_v57 }
 0x6e6   : > { %3158 = vmatprep.mubr.f32.mxu1 %v1999_v50 }
 0x6e7   : > { %4591 = vmatmul.mubr.msk.f32.gmra.mxu0 %vm2836_vm10, %v1985_v58 }
 0x6e8   : > { %3307 = vmatprep.mubr.f32.mxu0 %v9636_v41 }
 0x6e9   : > { %3159 = vmatmul.mubr.f32.gmra.mxu1 %v1998_v23 }
 0x6ea   : > { %3164 = vmatprep.mubr.f32.mxu1 %v2004_v26 }
 0x6eb   : > { %4592 = vmatmul.mubr.msk.f32.gmra.mxu0 %vm2836_vm10, %v1990_v5 }
 0x6ec   : > { %3313 = vmatprep.mubr.f32.mxu0 %v9636_v41 }
 0x6ed   : > { %3165 = vmatmul.mubr.f32.gmra.mxu1 %v2003_v7  ;;  %v8518_v7 = vpop.permute.xlu0 %2054 }
 0x6ee   : > { %3170 = vmatprep.mubr.f32.mxu1 %v2009_v52 }
 0x6ef   : > { %4593 = vmatmul.mubr.msk.f32.gmra.mxu0 %vm2836_vm10, %v1995_v12 }
 0x6f0   : > { %3319 = vmatprep.mubr.f32.mxu0 %v9636_v41 }
 0x6f1   : > { %3171 = vmatmul.mubr.f32.gmra.mxu1 %v2008_v0 }
 0x6f2   : > { %3176 = vmatprep.mubr.f32.mxu1 %v2014_v22 }
 0x6f3   : > { %4594 = vmatmul.mubr.msk.f32.gmra.mxu0 %vm2836_vm10, %v2000_v46  ;;  %v8525_v46 = vpop.permute.xlu1 %2059 }
 0x6f4   : > { %3325 = vmatprep.mubr.f32.mxu0 %v9636_v41 }
 0x6f5   : > { %3177 = vmatmul.mubr.f32.gmra.mxu1 %v2013_v40 }
 0x6f6   : > { %3182 = vmatprep.mubr.f32.mxu1 %v2019_v34 }
 0x6f7   : > { %4595 = vmatmul.mubr.msk.f32.gmra.mxu0 %vm2836_vm10, %v2005_v24 }
 0x6f8   : > { %3331 = vmatprep.mubr.f32.mxu0 %v9636_v41 }
 0x6f9   : > { %3183 = vmatmul.mubr.f32.gmra.mxu1 %v2018_v21 }
 0x6fa   : > { %3188 = vmatprep.mubr.f32.mxu1 %v2024_v20 }
 0x6fb   : > { %4596 = vmatmul.mubr.msk.f32.gmra.mxu0 %vm2836_vm10, %v2010_v61 }
 0x6fc   : > { %3337 = vmatprep.mubr.f32.mxu0 %v9636_v41 }
 0x6fd   : > { %3189 = vmatmul.mubr.f32.gmra.mxu1 %v2023_v56 }
 0x6fe   : > { %3194 = vmatprep.mubr.f32.mxu1 %v2029_v51 }
 0x6ff   : > { %4597 = vmatmul.mubr.msk.f32.gmra.mxu0 %vm2836_vm10, %v2015_v32  ;;  %v9644_v32 = vld [vmem:[#allocation3_spill] sm:$0xff] }
 0x700   : > { %3343 = vmatprep.mubr.f32.mxu0 %v9636_v41 }
 0x701   : > { %3195 = vmatmul.mubr.f32.gmra.mxu1 %v2028_v62 }
 0x702   : > { %3200 = vmatprep.mubr.f32.mxu1 %v2034_v25 }
 0x703   : > { %4598 = vmatmul.mubr.msk.f32.gmra.mxu0 %vm2836_vm10, %v2020_v3 }
 0x704   : > { %3349 = vmatprep.mubr.f32.mxu0 %v9636_v41 }
 0x705   : > { %3201 = vmatmul.mubr.f32.gmra.mxu1 %v2033_v36  ;;  %v8537_v36 = vpop.permute.xlu0 %2064 }
 0x707   : > { %4599 = vmatmul.mubr.msk.f32.gmra.mxu0 %vm2836_vm10, %v2025_v28 }
 0x708   : > { %3355 = vmatprep.mubr.f32.mxu0 %v9636_v41 }
 0x70b   : > { %4600 = vmatmul.mubr.msk.f32.gmra.mxu0 %vm2836_vm10, %v2030_v9 }
 0x70c   : > { %3361 = vmatprep.mubr.f32.mxu0 %v9636_v41  ;;  %v8435_v41 = vld [vmem:[%s9205_s2 + $0x10] sm:$0xff] }
 0x70d   : > { %4856 = vmatprep.subr.mxu1 %v8435_v41  ;;  %4896 = vmatprep.subr.mxu0 %v8435_v41 }
 0x70e   : > { %4857 = vmatpush3.msra.mxu1 %v8435_v41  ;;  %4897 = vmatpush3.msra.mxu0 %v8435_v41 }
 0x70f   : > { %4601 = vmatmul.mubr.msk.f32.gmra.mxu0 %vm2836_vm10, %v2035_v8  ;;  %4858 = vmatprep.subr.mxu1 %v8444_v54 }
 0x710   : > { %4898 = vmatprep.subr.mxu0 %v8444_v54  ;;  %4859 = vmatpush3.msra.mxu1 %v8444_v54 }
 0x711   : > { %4899 = vmatpush3.msra.mxu0 %v8444_v54  ;;  %4860 = vmatprep.subr.mxu1 %v8453_v38 }
 0x712   : > { %4900 = vmatprep.subr.mxu0 %v8453_v38  ;;  %4861 = vmatpush3.msra.mxu1 %v8453_v38 }
 0x713   : > { %4901 = vmatpush3.msra.mxu0 %v8453_v38  ;;  %4926 = vmatprep.subr.mxu1 %v8391_v11 }
 0x714   : > { %4966 = vmatprep.subr.mxu0 %v8391_v11 }
 0x746   : > { %v2951_v30 = vpop.f32.mrf.mxu0 }
 0x747   : > { %v2952_v12 = vadd.f32 %v2951_v30, %v8518_v7 }
 0x748   : > { %v8462_v39 = vpop.f32.mrf.mxu0 }
 0x74a   : > { %v2957_v18 = vpop.f32.mrf.mxu0 }
 0x74b   : > { %v2958_v21 = vadd.f32 %v2957_v18, %v8525_v46 }
 0x74c   : > { %v8464_v17 = vpop.f32.mrf.mxu0 }
 0x74e   : > { %v2963_v16 = vpop.f32.mrf.mxu0 }
 0x74f   : > { %v2964_v8 = vadd.f32 %v2963_v16, %v8537_v36 }
 0x750   : > { %v8466_v43 = vpop.f32.mrf.mxu0 }
 0x752   : > { %v2969_v48 = vpop.f32.mrf.mxu0 }
 0x754   : > { %v8468_v37 = vpop.f32.mrf.mxu0 }
 0x756   : > { %v8470_v33 = vpop.f32.mrf.mxu0 }
 0x758   : > { %v8472_v49 = vpop.f32.mrf.mxu0 }
 0x75a   : > { %v8474_v35 = vpop.f32.mrf.mxu0 }
 0x75c   : > { %v8476_v2 = vpop.f32.mrf.mxu0 }
 0x75e   : > { %v8478_v14 = vpop.f32.mrf.mxu0 }
 0x760   : > { %v8480_v55 = vpop.f32.mrf.mxu0 }
 0x762   : > { %v8482_v29 = vpop.f32.mrf.mxu0 }
 0x764   : > { %v8484_v27 = vpop.f32.mrf.mxu0 }
 0x766   : > { %v8486_v6 = vpop.f32.mrf.mxu0 }
 0x768   : > { %v8488_v47 = vpop.f32.mrf.mxu0 }
 0x76a   : > { %v8490_v44 = vpop.f32.mrf.mxu0 }
 0x76c   : > { %v8492_v53 = vpop.f32.mrf.mxu0 }
 0x76e   : > { %v8494_v63 = vpop.f32.mrf.mxu0 }
 0x770   : > { %v8496_v60 = vpop.f32.mrf.mxu0 }
 0x772   : > { %v8498_v15 = vpop.f32.mrf.mxu0 }
 0x774   : > { %v8500_v4 = vpop.f32.mrf.mxu0 }
 0x776   : > { %v8502_v1 = vpop.f32.mrf.mxu0 }
 0x778   : > { %v8504_v13 = vpop.f32.mrf.mxu0 }
 0x77a   : > { %v8506_v42 = vpop.f32.mrf.mxu0 }
 0x77b   : > { %9638 = vst [vmem:[#allocation16_spill] sm:$0xff] %v8506_v42 }
 0x77c   : > { %v8508_v59 = vpop.f32.mrf.mxu0 }
 0x77d   : > { %9639 = vst [vmem:[#allocation33_spill] sm:$0xff] %v8508_v59 }
 0x77e   : > { %v8510_v57 = vpop.f32.mrf.mxu0 }
 0x77f   : > { %9640 = vst [vmem:[#allocation10_spill] sm:$0xff] %v8510_v57 }
 0x780   : > { %v8512_v50 = vpop.f32.mrf.mxu0 }
 0x781   : > { %9641 = vst [vmem:[#allocation12_spill] sm:$0xff] %v8512_v50  ;;  %v8554_v50 = vpop.permute.xlu0 %2074 }
 0x782   : > { %v8516_v26 = vpop.f32.mrf.mxu0 }
 0x783   : > { %9642 = vst [vmem:[#allocation42_spill] sm:$0xff] %v8516_v26 }
 0x784   : > { %v8523_v0 = vpop.f32.mrf.mxu0 }
 0x785   : > { %9643 = vst [vmem:[#allocation32_spill] sm:$0xff] %v8523_v0 }
 0x789   : > { %v3112_v58 = vpop.f32.mrf.mxu1 }
 0x78a   : > { %v3113_v40 = vadd.f32 %v3112_v58, %v2952_v12  ;;  %v8543_v58 = vpop.permute.xlu1 %2069 }
 0x78b   : > { %v8514_v23 = vpop.f32.mrf.mxu1 }
 0x78d   : > { %v3118_v5 = vpop.f32.mrf.mxu1 }
 0x78e   : > { %v3119_v51 = vadd.f32 %v3118_v5, %v2958_v21 }
 0x78f   : > { %v8520_v52 = vpop.f32.mrf.mxu1 }
 0x791   : > { %v3124_v22 = vpop.f32.mrf.mxu1 }
 0x793   : > { %v3273_v34 = vpop.f32.mrf.mxu0  ;;  %v8527_v24 = vpop.f32.mrf.mxu1 }
 0x794   : > { %v3274_v20 = vadd.f32 %v3273_v34, %v3113_v40  ;;  %v3125_v40 = vadd.f32 %v3124_v22, %v2964_v8 }
 0x795   : > { %v8530_v61 = vpop.f32.mrf.mxu0  ;;  %v3130_v56 = vpop.f32.mrf.mxu1 }
 0x796   : > { %v8533_v62 = vmul.f32 %v3274_v20, %v9644_v32  ;;  %v2970_v20 = vadd.f32 %v2969_v48, %v8543_v58  ;;  %v2976_v48 = vadd.f32 %v8470_v33, %v8554_v50 }
 0x797   : > { %v3279_v25 = vpop.f32.mrf.mxu0  ;;  %v8535_v3 = vpop.f32.mrf.mxu1 }
 0x798   : > { %9645 = vst [vmem:[#allocation27_spill] sm:$0xff] %v8535_v3  ;;  %v3432_v28 = vmin.f32 %v8533_v62, 0.0  ;;  %v3280_v9 = vadd.f32 %v3279_v25, %v3119_v51  ;;  %v3131_v59 = vadd.f32 %v3130_v56, %v2970_v20  ;;  %v8566_v3 = vpop.permute.xlu1 %2079  ;;  %vm3400_vm11 = vcmp.gt.f32.partialorder %v8533_v62, 0.0 }
 0x799   : > { %v8541_v30 = vpop.f32.mrf.mxu0  ;;  %v3136_v18 = vpop.f32.mrf.mxu1  ;;  %v2982_v33 = vadd.f32 %v8474_v35, %v8566_v3 }
 0x79a   : > { %v3464_v12 = vmul.f32 1.442695, %v3432_v28  ;;  %v8546_v5 = vmul.f32 %v3280_v9, %v9644_v32  ;;  %v3137_v56 = vadd.f32 %v3136_v18, %v2976_v48 }
 0x79b   : > { %v3285_v34 = vpop.f32.mrf.mxu0  ;;  %v8548_v21 = vpop.f32.mrf.mxu1 }
 0x79c   : > { %9646 = vst [vmem:[#allocation35_spill] sm:$0xff] %v8548_v21  ;;  %5092 = vpow2.f32 %v3464_v12  ;;  %v3434_v51 = vmin.f32 %v8546_v5, 0.0  ;;  %v3286_v25 = vadd.f32 %v3285_v34, %v3125_v40  ;;  %v8595_v42 = vpop.permute.xlu1 %2089  ;;  %vm3402_vm12 = vcmp.gt.f32.partialorder %v8546_v5, 0.0 }
 0x79d   : > { %v8552_v16 = vpop.f32.mrf.mxu0  ;;  %v3142_v0 = vpop.f32.mrf.mxu1 }
 0x79e   : > { %v3468_v28 = vmul.f32 1.442695, %v3434_v51  ;;  %v8557_v9 = vmul.f32 %v3286_v25, %v9644_v32  ;;  %v3143_v18 = vadd.f32 %v3142_v0, %v2982_v33 }
 0x79f   : > { %v3291_v22 = vpop.f32.mrf.mxu0  ;;  %v8559_v8 = vpop.f32.mrf.mxu1 }
 0x7a0   : > { %9647 = vst [vmem:[#allocation41_spill] sm:$0xff] %v8559_v8  ;;  %5094 = vpow2.f32 %v3468_v28  ;;  %v3292_v12 = vadd.f32 %v3291_v22, %v3131_v59  ;;  %v3436_v40 = vmin.f32 %v8557_v9, 0.0  ;;  %vm3404_vm13 = vcmp.gt.f32.partialorder %v8557_v9, 0.0 }
 0x7a1   : > { %v8564_v34 = vpop.f32.mrf.mxu0  ;;  %v3148_v21 = vpop.f32.mrf.mxu1 }
 0x7a2   : > { %9648 = vst [vmem:[#allocation14_spill] sm:$0xff] %v8564_v34  ;;  %v8569_v20 = vmul.f32 %v3292_v12, %v9644_v32  ;;  %v3472_v51 = vmul.f32 1.442695, %v3436_v40  ;;  %v8578_v34 = vpop.permute.xlu0 %2084 }
 0x7a3   : > { %v3297_v25 = vpop.f32.mrf.mxu0  ;;  %v8571_v26 = vpop.f32.mrf.mxu1  ;;  %v2988_v35 = vadd.f32 %v8478_v14, %v8578_v34 }
 0x7a4   : > { %9649 = vst [vmem:[#allocation15_spill] sm:$0xff] %v8571_v26  ;;  %v3438_v59 = vmin.f32 %v8569_v20, 0.0  ;;  %v3298_v28 = vadd.f32 %v3297_v25, %v3137_v56  ;;  %5096 = vpow2.f32 %v3472_v51  ;;  %vm3406_vm14 = vcmp.gt.f32.partialorder %v8569_v20, 0.0 }
 0x7a5   : > { %v8576_v22 = vpop.f32.mrf.mxu0  ;;  %v3154_v8 = vpop.f32.mrf.mxu1  ;;  %v3149_v38 = vadd.f32 %v3148_v21, %v2988_v35  ;;  %v2994_v21 = vadd.f32 %v8482_v29, %v8595_v42 }
 0x7a6   : > { %9650 = vst [vmem:[#allocation22_spill] sm:$0xff] %v8576_v22  ;;  %v3476_v48 = vmul.f32 1.442695, %v3438_v59  ;;  %v8581_v12 = vmul.f32 %v3298_v28, %v9644_v32 }
 0x7a7   : > { %v3303_v40 = vpop.f32.mrf.mxu0  ;;  %v8583_v57 = vpop.f32.mrf.mxu1 }
 0x7a8   : > { %9651 = vst [vmem:[#allocation34_spill] sm:$0xff] %v8583_v57  ;;  %5098 = vpow2.f32 %v3476_v48  ;;  %v3440_v56 = vmin.f32 %v8581_v12, 0.0  ;;  %v3304_v51 = vadd.f32 %v3303_v40, %v3143_v18  ;;  %vm3408_vm15 = vcmp.gt.f32.partialorder %v8581_v12, 0.0 }
 0x7a9   : > { %v5093_v25 = vpop.eup %5092  ;;  %v8588_v26 = vpop.f32.mrf.mxu0 }
 0x7aa   : > { %9652 = vst [vmem:[#allocation13_spill] sm:$0xff] %v8588_v26  ;;  %v3160_v22 = vpop.f32.mrf.mxu1  ;;  %v3480_v0 = vmul.f32 1.442695, %v3440_v56  ;;  %v8591_v33 = vmul.f32 %v3304_v51, %v9644_v32  ;;  %v4602_v57 = vadd.f32 -1.0, %v5093_v25  ;;  %v8604_v51 = vpop.permute.xlu0 %2094 }
 0x7ab   : > { %v3309_v59 = vpop.f32.mrf.mxu0 }
 0x7ac   : > { %v8593_v28 = vpop.f32.mrf.mxu1  ;;  %5100 = vpow2.f32 %v3480_v0  ;;  %v3442_v14 = vmin.f32 %v8591_v33, 0.0  ;;  %v3310_v48 = vadd.f32 %v3309_v59, %v3149_v38  ;;  %v3560_v35 = vsel %vm3400_vm11, %v8533_v62, %v4602_v57 }
 0x7ad   : > { %9653 = vst [vmem:[#allocation52_spill] sm:$0xff] %v8593_v28  ;;  %v5095_v18 = vpop.eup %5094  ;;  %v8601_v40 = vpop.f32.mrf.mxu0  ;;  %3810 = vrot.lane.b32.xlu0 %v3560_v35, %s5199_s18  ;;  %4862 = vmatprep.mubr.msk.f32.mxu1 %vm2836_vm10, %v3560_v35  ;;  %v3155_v38 = vadd.f32 %v3154_v8, %v2994_v21  ;;  %v3000_v57 = vadd.f32 %v8486_v6, %v8604_v51  ;;  %vm3410_vm0 = vcmp.gt.f32.partialorder %v8591_v33, 0.0 }
 0x7ae   : > { %9654 = vst [vmem:[#allocation50_spill] sm:$0xff] %v8601_v40  ;;  %v3166_v56 = vpop.f32.mrf.mxu1  ;;  %v3484_v25 = vmul.f32 1.442695, %v3442_v14  ;;  %v8607_v28 = vmul.f32 %v3310_v48, %v9644_v32  ;;  %v4604_v29 = vadd.f32 -1.0, %v5095_v18  ;;  %v8620_v8 = vpop.permute.xlu1 %2099 }
 0x7af   : > { %v3315_v0 = vpop.f32.mrf.mxu0  ;;  %v3161_v21 = vadd.f32 %v3160_v22, %v3000_v57 }
 0x7b0   : > { %v8611_v59 = vpop.f32.mrf.mxu1  ;;  %5102 = vpow2.f32 %v3484_v25  ;;  %v3444_v62 = vmin.f32 %v8607_v28, 0.0  ;;  %v3316_v14 = vadd.f32 %v3315_v0, %v3155_v38  ;;  %v3562_v26 = vsel %vm3402_vm12, %v8546_v5, %v4604_v29 }
 0x7b1   : > { %9655 = vst [vmem:[#allocation44_spill] sm:$0xff] %v8611_v59  ;;  %v8617_v48 = vpop.f32.mrf.mxu0  ;;  %v5097_v35 = vpop.eup %5096  ;;  %3812 = vrot.lane.b32.xlu1 %v3562_v26, %s5199_s18  ;;  %4863 = vmatmul.mubr.msk.f32.vlgmr.msra.gmra.mxu1 %vm2836_vm10, %v3562_v26  ;;  %v3006_v5 = vadd.f32 %v8490_v44, %v8620_v8  ;;  %v2954_v26 = vadd.f32 %v8462_v39, %v8518_v7  ;;  %vm3412_vm1 = vcmp.gt.f32.partialorder %v8607_v28, 0.0 }
 0x7b2   : > { %v3172_v40 = vpop.f32.mrf.mxu1  ;;  %v3488_v59 = vmul.f32 1.442695, %v3444_v62  ;;  %v8625_v6 = vmul.f32 %v3316_v14, %v9644_v32  ;;  %v4606_v38 = vadd.f32 -1.0, %v5097_v35  ;;  %4927 = vmatpush3.msra.mxu1 %v8391_v11  ;;  %v2960_v29 = vadd.f32 %v8464_v17, %v8525_v46 }
 0x7b3   : > { %v3321_v18 = vpop.f32.mrf.mxu0  ;;  %4928 = vmatprep.subr.mxu1 %v8399_v10  ;;  %v2966_v14 = vadd.f32 %v8466_v43, %v8537_v36  ;;  %v3167_v35 = vadd.f32 %v3166_v56, %v3006_v5  ;;  %v8654_v17 = vadd.f32 %v8468_v37, %v8543_v58  ;;  %v3115_v7 = vadd.f32 %v8514_v23, %v2954_v26  ;;  %v8660_v43 = vpop.permute.xlu1 %2109 }
 0x7b4   : > { %v8627_v25 = vpop.f32.mrf.mxu1  ;;  %5104 = vpow2.f32 %v3488_v59  ;;  %v3322_v0 = vadd.f32 %v3321_v18, %v3161_v21  ;;  %v3446_v57 = vmin.f32 %v8625_v6, 0.0  ;;  %v3564_v11 = vsel %vm3404_vm13, %v8557_v9, %v4606_v38  ;;  %4929 = vmatpush3.msra.mxu1 %v8399_v10  ;;  %v8643_v59 = vpop.permute.xlu0 %2104 }
 0x7b5   : > { %v5099_v22 = vpop.eup %5098  ;;  %v8639_v62 = vpop.f32.mrf.mxu0  ;;  %3814 = vrot.lane.b32.xlu0 %v3564_v11, %s5199_s18  ;;  %4865 = vmatprep.mubr.msk.f32.mxu1 %vm2836_vm10, %v3564_v11  ;;  %v3012_v36 = vadd.f32 %v8494_v63, %v8643_v59  ;;  %v8669_v23 = vadd.f32 %v8472_v49, %v8554_v50  ;;  %v3276_v58 = vadd.f32 %v8530_v61, %v3115_v7  ;;  %vm3414_vm2 = vcmp.gt.f32.partialorder %v8625_v6, 0.0 }
 0x7b6   : > { %v3178_v44 = vpop.f32.mrf.mxu1  ;;  %v8648_v39 = vmul.f32 %v3322_v0, %v9644_v32  ;;  %v3492_v10 = vmul.f32 1.442695, %v3446_v57  ;;  %v4608_v21 = vadd.f32 -1.0, %v5099_v22  ;;  %4930 = vmatprep.subr.mxu1 %v8408_v31  ;;  %v8680_v0 = vadd.f32 %v8476_v2, %v8566_v3 }
 0x7b7   : > { %v3327_v46 = vpop.f32.mrf.mxu0  ;;  %4931 = vmatpush3.msra.mxu1 %v8408_v31  ;;  %v3173_v31 = vadd.f32 %v3172_v40, %v3012_v36  ;;  %v8689_v50 = vadd.f32 %v8480_v55, %v8578_v34  ;;  %v3018_v61 = vadd.f32 %v8498_v15, %v8660_v43  ;;  %v8702_v15 = vadd.f32 %v8484_v27, %v8595_v42  ;;  %v9656_v34 = vld [vmem:[#allocation4_spill] sm:$0xff] }
 0x7b8   : > { %v8657_v9 = vpop.f32.mrf.mxu1  ;;  %v3448_v56 = vmin.f32 %v8648_v39, 0.0  ;;  %v3328_v18 = vadd.f32 %v3327_v46, %v3167_v35  ;;  %5106 = vpow2.f32 %v3492_v10  ;;  %v3566_v5 = vsel %vm3406_vm14, %v8569_v20, %v4608_v21  ;;  %4932 = vmatprep.subr.mxu1 %v8417_v45  ;;  %v2115_v7 = vpop.permute.xlu0 %2114 }
 0x7b9   : > { %v5101_v37 = vpop.eup %5100  ;;  %v8672_v38 = vpop.f32.mrf.mxu0  ;;  %3816 = vrot.lane.b32.xlu1 %v3566_v5, %s5199_s18  ;;  %4866 = vmatmul.mubr.msk.f32.gmra.mxu1 %vm2836_vm10, %v3566_v5  ;;  %v3121_v20 = vadd.f32 %v8520_v52, %v2960_v29  ;;  %v3127_v52 = vadd.f32 %v8527_v24, %v2966_v14  ;;  %v8706_v29 = vmul.f32 %v3276_v58, %v9656_v34  ;;  %vm3416_vm6 = vcmp.gt.f32.partialorder %v8648_v39, 0.0 }
 0x7ba   : > { %v8675_v63 = vpop.f32.mrf.mxu1  ;;  %v3496_v22 = vmul.f32 1.442695, %v3448_v56  ;;  %v8683_v49 = vmul.f32 %v3328_v18, %v9644_v32  ;;  %v4610_v40 = vadd.f32 -1.0, %v5101_v37  ;;  %4933 = vmatpush3.msra.mxu1 %v8417_v45  ;;  %v8712_v10 = vpop.permute.xlu1 %2119  ;;  %v3179_v21 = vadd.f32 %v3178_v44, %v3018_v61 }
 0x7bb   : > { %v3333_v2 = vpop.f32.mrf.mxu0  ;;  %4934 = vmatprep.subr.mxu1 %v8426_v19  ;;  %v3282_v46 = vadd.f32 %v8541_v30, %v3121_v20  ;;  %v8722_v24 = vadd.f32 %v8488_v47, %v8604_v51  ;;  %v3433_v51 = vmin.f32 %v8706_v29, 0.0  ;;  %v8747_v37 = vadd.f32 %v8500_v4, %v8660_v43 }
 0x7bc   : > { %v8694_v3 = vpop.f32.mrf.mxu1  ;;  %5108 = vpow2.f32 %v3496_v22  ;;  %v3450_v26 = vmin.f32 %v8683_v49, 0.0  ;;  %v3334_v57 = vadd.f32 %v3333_v2, %v3173_v31  ;;  %v3568_v45 = vsel %vm3408_vm15, %v8581_v12, %v4610_v40  ;;  %4935 = vmatpush3.msra.mxu1 %v8426_v19  ;;  %v8764_v22 = vpop.permute.xlu0 %2124 }
 0x7bd   : > { %v5103_v55 = vpop.eup %5102  ;;  %v8708_v11 = vpop.f32.mrf.mxu0  ;;  %3818 = vrot.lane.b32.xlu0 %v3568_v45, %s5199_s18  ;;  %4868 = vmatprep.mubr.msk.f32.mxu1 %vm2836_vm10, %v3568_v45  ;;  %v8726_v19 = vadd.f32 %v8492_v53, %v8620_v8  ;;  %v3288_v12 = vadd.f32 %v8552_v16, %v3127_v52  ;;  %v8737_v53 = vadd.f32 %v8496_v60, %v8643_v59  ;;  %v9660_v45 = vld [vmem:[#allocation42_spill] sm:$0xff]  ;;  %vm3418_vm7 = vcmp.gt.f32.partialorder %v8683_v49, 0.0 }
 0x7be   : > { %v3190_v35 = vpop.f32.mrf.mxu1  ;;  %v3500_v27 = vmul.f32 1.442695, %v3450_v26  ;;  %v8716_v42 = vmul.f32 %v3334_v57, %v9644_v32  ;;  %v4612_v14 = vadd.f32 -1.0, %v5103_v55  ;;  %4936 = vmatprep.subr.mxu1 %v8435_v41  ;;  %v3024_v16 = vadd.f32 %v8502_v1, %v2115_v7  ;;  %v8772_v2 = vpop.permute.xlu1 %2129 }
 0x7bf   : > { %v3339_v30 = vpop.f32.mrf.mxu0  ;;  %4937 = vmatpush3.msra.mxu1 %v8435_v41  ;;  %v8750_v41 = vmul.f32 %v3282_v46, %v9656_v34  ;;  %v8758_v1 = vadd.f32 %v8504_v13, %v2115_v7  ;;  %v8767_v61 = vmul.f32 %v3288_v12, %v9656_v34  ;;  %v9658_v13 = vld [vmem:[#allocation8_spill] sm:$0xff]  ;;  %v3466_v26 = vmul.f32 1.442695, %v3433_v51  ;;  %v9661_v12 = vld [vmem:[#allocation27_spill] sm:$0xff] }
 0x7c0   : > { %v8729_v44 = vpop.f32.mrf.mxu1  ;;  %5110 = vpow2.f32 %v3500_v27  ;;  %v3452_v36 = vmin.f32 %v8716_v42, 0.0  ;;  %v3340_v56 = vadd.f32 %v3339_v30, %v3179_v21  ;;  %v3570_v18 = vsel %vm3410_vm0, %v8591_v33, %v4612_v14  ;;  %4938 = vmatprep.subr.mxu1 %v8444_v54  ;;  %v9657_v33 = vld [vmem:[#allocation16_spill] sm:$0xff]  ;;  %v9662_v14 = vld [vmem:[#allocation35_spill] sm:$0xff] }
 0x7c1   : > { %v5105_v47 = vpop.eup %5104  ;;  %v8741_v8 = vpop.f32.mrf.mxu0  ;;  %3820 = vrot.lane.b32.xlu1 %v3570_v18, %s5199_s18  ;;  %4869 = vmatmul.mubr.msk.f32.gmra.mxu1 %vm2836_vm10, %v3570_v18  ;;  %v3030_v59 = vadd.f32 %v9657_v33, %v8712_v10  ;;  %v3185_v4 = vadd.f32 %v8675_v63, %v3024_v16  ;;  %v9659_v63 = vld [vmem:[#allocation10_spill] sm:$0xff]  ;;  %v3042_v7 = vadd.f32 %v9660_v45, %v8772_v2  ;;  %v3435_v46 = vmin.f32 %v8750_v41, 0.0 }
 0x7c2   : > { %v3504_v58 = vmul.f32 1.442695, %v3452_v36  ;;  %v8753_v60 = vmul.f32 %v3340_v56, %v9644_v32  ;;  %v3196_v43 = vpop.f32.mrf.mxu1  ;;  %v4614_v31 = vadd.f32 -1.0, %v5105_v47  ;;  %4939 = vmatpush3.msra.mxu1 %v8444_v54  ;;  %v3036_v40 = vadd.f32 %v9659_v63, %v8764_v22  ;;  %v9665_v63 = vld [vmem:[#allocation41_spill] sm:$0xff] }
 0x7c3   : > { %v3345_v5 = vpop.f32.mrf.mxu0  ;;  %4940 = vmatprep.subr.mxu1 %v9658_v13  ;;  %v3191_v21 = vadd.f32 %v3190_v35, %v3030_v59  ;;  %v3133_v30 = vadd.f32 %v9661_v12, %v8654_v17  ;;  %v3437_v35 = vmin.f32 %v8767_v61, 0.0  ;;  %vm3420_vm8 = vcmp.gt.f32.partialorder %v8716_v42, 0.0 }
 0x7c4   : > { %5112 = vpow2.f32 %v3504_v58  ;;  %v3454_v20 = vmin.f32 %v8753_v60, 0.0  ;;  %v3346_v57 = vadd.f32 %v3345_v5, %v3185_v4  ;;  %v3572_v55 = vsel %vm3412_vm1, %v8607_v28, %v4614_v31  ;;  %4941 = vmatpush3.msra.mxu1 %v9658_v13  ;;  %v8792_v56 = vpop.f32.mrf.mxu1  ;;  %v9663_v58 = vld [vmem:[#allocation14_spill] sm:$0xff] }
 0x7c5   : > { %v8776_v54 = vpop.f32.mrf.mxu0  ;;  %v5107_v52 = vpop.eup %5106  ;;  %3822 = vrot.lane.b32.xlu0 %v3572_v55, %s5199_s18  ;;  %4871 = vmatprep.mubr.msk.f32.mxu1 %vm2836_vm10, %v3572_v55  ;;  %v3139_v28 = vadd.f32 %v9662_v14, %v8669_v23  ;;  %v3294_v17 = vadd.f32 %v9663_v58, %v3133_v30  ;;  %v3470_v4 = vmul.f32 1.442695, %v3435_v46  ;;  %v9664_v5 = vld [vmem:[#allocation22_spill] sm:$0xff]  ;;  %v9669_v58 = vld [vmem:[#allocation13_spill] sm:$0xff]  ;;  %vm3422_vm9 = vcmp.gt.f32.partialorder %v8753_v60, 0.0 }
 0x7c6   : > { %v3508_v27 = vmul.f32 1.442695, %v3454_v20  ;;  %v8790_v36 = vmul.f32 %v3346_v57, %v9644_v32  ;;  %v4616_v16 = vadd.f32 -1.0, %v5107_v52  ;;  %v3197_v20 = vadd.f32 %v3196_v43, %v3036_v40  ;;  %v9666_v57 = vld [vmem:[#allocation15_spill] sm:$0xff]  ;;  %v3202_v45 = vpop.f32.mrf.mxu1  ;;  %v9667_v30 = vld [vmem:[#allocation50_spill] sm:$0xff] }
 0x7c7   : > { %v3351_v47 = vpop.f32.mrf.mxu0  ;;  %v3300_v31 = vadd.f32 %v9664_v5, %v3139_v28  ;;  %v3151_v55 = vadd.f32 %v9666_v57, %v8689_v50  ;;  %v8814_v12 = vmul.f32 %v3294_v17, %v9656_v34  ;;  %vm3401_vm5 = vcmp.gt.f32.partialorder %v8706_v29, 0.0 }
 0x7c8   : > { %5114 = vpow2.f32 %v3508_v27  ;;  %v3352_v51 = vadd.f32 %v3351_v47, %v3191_v21  ;;  %v3456_v33 = vmin.f32 %v8790_v36, 0.0  ;;  %v3574_v59 = vsel %vm3414_vm2, %v8625_v6, %v4616_v16 }
 0x7c9   : > { %v5109_v18 = vpop.eup %5108  ;;  %5116 = vpow2.f32 %v3466_v26  ;;  %v8798_v23 = vpop.f32.mrf.mxu0  ;;  %3824 = vrot.lane.b32.xlu1 %v3574_v59, %s5199_s18  ;;  %4872 = vmatmul.mubr.msk.f32.gmra.mxu1 %vm2836_vm10, %v3574_v59  ;;  %v3145_v26 = vadd.f32 %v9665_v63, %v8680_v0  ;;  %v3474_v21 = vmul.f32 1.442695, %v3437_v35  ;;  %v3312_v14 = vadd.f32 %v9667_v30, %v3151_v55 }
 0x7ca   : > { %v8803_v13 = vmul.f32 %v3352_v51, %v9644_v32  ;;  %v3512_v52 = vmul.f32 1.442695, %v3456_v33  ;;  %v4618_v46 = vadd.f32 -1.0, %v5109_v18  ;;  %v8821_v28 = vmul.f32 %v3300_v31, %v9656_v34  ;;  %v9668_v51 = vld [vmem:[#allocation34_spill] sm:$0xff]  ;;  %v9670_v33 = vld [vmem:[#allocation52_spill] sm:$0xff] }
 0x7cb   : > { %v3357_v6 = vpop.f32.mrf.mxu0  ;;  %v3203_v47 = vadd.f32 %v3202_v45, %v3042_v7  ;;  %v3157_v18 = vadd.f32 %v9668_v51, %v8702_v15  ;;  %v3306_v17 = vadd.f32 %v9669_v58, %v3145_v26  ;;  %v8836_v63 = vmul.f32 %v3312_v14, %v9656_v34 }
 0x7cc   : > { %v3458_v43 = vmin.f32 %v8803_v13, 0.0  ;;  %v3358_v40 = vadd.f32 %v3357_v6, %v3197_v20  ;;  %5118 = vpow2.f32 %v3512_v52  ;;  %v3576_v50 = vsel %vm3416_vm6, %v8648_v39, %v4618_v46 }
 0x7cd   : > { %v5111_v27 = vpop.eup %5110  ;;  %v8817_v0 = vpop.f32.mrf.mxu0  ;;  %3826 = vrot.lane.b32.xlu0 %v3576_v50, %s5199_s18  ;;  %4874 = vmatprep.mubr.msk.f32.mxu1 %vm2836_vm10, %v3576_v50  ;;  %v3163_v39 = vadd.f32 %v9670_v33, %v8722_v24  ;;  %v3318_v15 = vadd.f32 %v8617_v48, %v3157_v18  ;;  %v3441_v52 = vmin.f32 %v8821_v28, 0.0  ;;  %v8849_v45 = vmul.f32 %v3306_v17, %v9656_v34  ;;  %v9673_v18 = vld [vmem:[#allocation12_spill] sm:$0xff] }
 0x7ce   : > { %v3516_v16 = vmul.f32 1.442695, %v3458_v43  ;;  %v8824_v35 = vmul.f32 %v3358_v40, %v9644_v32  ;;  %v4620_v5 = vadd.f32 -1.0, %v5111_v27  ;;  %v3445_v46 = vmin.f32 %v8836_v63, 0.0 }
 0x7cf   : > { %v3363_v59 = vpop.f32.mrf.mxu0  ;;  %v3324_v24 = vadd.f32 %v8639_v62, %v3163_v39  ;;  %v3175_v43 = vadd.f32 %v8627_v25, %v8737_v53  ;;  %v3482_v51 = vmul.f32 1.442695, %v3441_v52  ;;  %v3443_v53 = vmin.f32 %v8849_v45, 0.0  ;;  %v9674_v39 = vld [vmem:[#allocation32_spill] sm:$0xff] }
 0x7d0   : > { %5120 = vpow2.f32 %v3516_v16  ;;  %v3460_v7 = vmin.f32 %v8824_v35, 0.0  ;;  %v3364_v31 = vadd.f32 %v3363_v59, %v3203_v47  ;;  %v3578_v26 = vsel %vm3418_vm7, %v8683_v49, %v4620_v5  ;;  %v9671_v49 = vld [vmem:[#allocation44_spill] sm:$0xff]  ;;  %v9672_v47 = vld [vmem:[#allocation33_spill] sm:$0xff] }
 0x7d1   : > { %v5113_v20 = vpop.eup %5112  ;;  %5122 = vpow2.f32 %v3470_v4  ;;  %3828 = vrot.lane.b32.xlu1 %v3578_v26, %s5199_s18  ;;  %4875 = vmatmul.mubr.msk.f32.gmra.mxu1 %vm2836_vm10, %v3578_v26  ;;  %v3439_v4 = vmin.f32 %v8814_v12, 0.0  ;;  %v3169_v6 = vadd.f32 %v9671_v49, %v8726_v19  ;;  %v8863_v30 = vmul.f32 %v3324_v24, %v9656_v34 }
 0x7d2   : > { %5124 = vpow2.f32 %v3474_v21  ;;  %v3520_v57 = vmul.f32 1.442695, %v3460_v7  ;;  %v8842_v55 = vmul.f32 %v3364_v31, %v9644_v32  ;;  %v4622_v48 = vadd.f32 -1.0, %v5113_v20 }
 0x7d3   : > { %v8857_v21 = vmul.f32 %v3318_v15, %v9656_v34  ;;  %v3330_v19 = vadd.f32 %v8672_v38, %v3169_v6  ;;  %v3032_v16 = vadd.f32 %v9672_v47, %v8712_v10  ;;  %v3336_v25 = vadd.f32 %v8708_v11, %v3175_v43 }
 0x7d4   : > { %5126 = vpow2.f32 %v3520_v57  ;;  %v3462_v62 = vmin.f32 %v8842_v55, 0.0  ;;  %v3580_v40 = vsel %vm3420_vm8, %v8716_v42, %v4622_v48  ;;  %v3478_v42 = vmul.f32 1.442695, %v3439_v4 }
 0x7d5   : > { %v5115_v32 = vpop.eup %5114  ;;  %3830 = vrot.lane.b32.xlu0 %v3580_v40, %s5199_s18  ;;  %4877 = vmatprep.mubr.msk.f32.mxu1 %vm2836_vm10, %v3580_v40  ;;  %v3038_v58 = vadd.f32 %v9673_v18, %v8764_v22  ;;  %v3490_v17 = vmul.f32 1.442695, %v3445_v46  ;;  %v3447_v33 = vmin.f32 %v8857_v21, 0.0  ;;  %v3181_v10 = vadd.f32 %v8657_v9, %v8747_v37 }
 0x7d6   : > { %v5117_v27 = vpop.eup %5116  ;;  %v3524_v14 = vmul.f32 1.442695, %v3462_v62  ;;  %v4624_v50 = vadd.f32 -1.0, %v5115_v32  ;;  %v3044_v59 = vadd.f32 %v9674_v39, %v8772_v2  ;;  %v3449_v5 = vmin.f32 %v8863_v30, 0.0  ;;  %v3365_v32 = vpop.f32.mrf.mxu0 }
 0x7d7   : > { %v3187_v22 = vadd.f32 %v8694_v3, %v8758_v1  ;;  %v8890_v7 = vmul.f32 %v3336_v25, %v9656_v34  ;;  %v3342_v9 = vadd.f32 %v8741_v8, %v3181_v10  ;;  %v3486_v31 = vmul.f32 1.442695, %v3443_v53 }
 0x7d8   : > { %5128 = vpow2.f32 %v3524_v14  ;;  %v3582_v38 = vsel %vm3422_vm9, %v8753_v60, %v4624_v50  ;;  %v8885_v60 = vmul.f32 %v3330_v19, %v9656_v34  ;;  %vm3424_vm3 = vcmp.gt.f32.partialorder %v8790_v36, 0.0 }
 0x7d9   : > { %3832 = vrot.lane.b32.xlu1 %v3582_v38, %s5199_s18  ;;  %4878 = vmatmul.mubr.msk.f32.gmra.mxu1 %vm2836_vm10, %v3582_v38  ;;  %v5119_v11 = vpop.eup %5118  ;;  %5130 = vpow2.f32 %v3482_v51  ;;  %v3348_v20 = vadd.f32 %v8776_v54, %v3187_v22  ;;  %v3494_v15 = vmul.f32 1.442695, %v3447_v33  ;;  %v3193_v26 = vadd.f32 %v8729_v44, %v3032_v16  ;;  %v3204_v44 = vpop.f32.mrf.mxu1 }
 0x7da   : > { %v4626_v37 = vadd.f32 -1.0, %v5119_v11  ;;  %5132 = vpow2.f32 %v3478_v42  ;;  %v3498_v24 = vmul.f32 1.442695, %v3449_v5  ;;  %v3451_v57 = vmin.f32 %v8885_v60, 0.0 }
 0x7db   : > { %5134 = vpow2.f32 %v3490_v17  ;;  %v3199_v8 = vadd.f32 %v8792_v56, %v3038_v58  ;;  %v3453_v52 = vmin.f32 %v8890_v7, 0.0  ;;  %v8903_v48 = vmul.f32 %v3342_v9, %v9656_v34 }
 0x7dc   : > { %v3584_v3 = vsel %vm3424_vm3, %v8790_v36, %v4626_v37  ;;  %v3354_v36 = vadd.f32 %v8798_v23, %v3193_v26  ;;  %vm3426_vm4 = vcmp.gt.f32.partialorder %v8803_v13, 0.0  ;;  %5136 = vpow2.f32 %v3486_v31 }
 0x7dd   : > { %v5121_v2 = vpop.eup %5120  ;;  %3834 = vrot.lane.b32.xlu0 %v3584_v3, %s5199_s18  ;;  %4880 = vmatprep.mubr.msk.f32.mxu1 %vm2836_vm10, %v3584_v3  ;;  %v8908_v49 = vmul.f32 %v3348_v20, %v9656_v34  ;;  %v3360_v56 = vadd.f32 %v8817_v0, %v3199_v8  ;;  %5138 = vpow2.f32 %v3494_v15  ;;  %v4603_v23 = vadd.f32 -1.0, %v5117_v27 }
 0x7de   : > { %v5123_v1 = vpop.eup %5122  ;;  %v4628_v54 = vadd.f32 -1.0, %v5121_v2  ;;  %5140 = vpow2.f32 %v3498_v24  ;;  %v3502_v46 = vmul.f32 1.442695, %v3451_v57  ;;  %v3205_v43 = vadd.f32 %v3204_v44, %v3044_v59 }
 0x7df   : > { %v5125_v4 = vpop.eup %5124  ;;  %v3506_v19 = vmul.f32 1.442695, %v3453_v52  ;;  %v3455_v14 = vmin.f32 %v8903_v48, 0.0  ;;  %v8917_v0 = vmul.f32 %v3354_v36, %v9656_v34  ;;  %vm3428_vm11 = vcmp.gt.f32.partialorder %v8824_v35, 0.0 }
 0x7e0   : > { %v3586_v6 = vsel %vm3426_vm4, %v8803_v13, %v4628_v54  ;;  %v3457_v13 = vmin.f32 %v8908_v49, 0.0  ;;  %v8922_v50 = vmul.f32 %v3360_v56, %v9656_v34  ;;  %v3366_v47 = vadd.f32 %v3365_v32, %v3205_v43 }
 0x7e1   : > { %v5127_v62 = vpop.eup %5126  ;;  %3836 = vrot.lane.b32.xlu1 %v3586_v6, %s5199_s18  ;;  %4881 = vmatmul.mubr.msk.f32.gmra.mxu1 %vm2836_vm10, %v3586_v6  ;;  %v3561_v51 = vsel %vm3401_vm5, %v8706_v29, %v4603_v23  ;;  %5142 = vpow2.f32 %v3502_v46  ;;  %v4607_v42 = vadd.f32 -1.0, %v5125_v4  ;;  %v4605_v53 = vadd.f32 -1.0, %v5123_v1 }
 0x7e2   : > { %v4630_v40 = vadd.f32 -1.0, %v5127_v62  ;;  %5144 = vpow2.f32 %v3506_v19  ;;  %v3510_v38 = vmul.f32 1.442695, %v3455_v14  ;;  %v3459_v18 = vmin.f32 %v8917_v0, 0.0  ;;  %v5156_v14 = vld [vmem:[%s9205_s2 + $0x38] sm:$0xff] }
 0x7e3   : > { %vm3430_vm12 = vcmp.gt.f32.partialorder %v8842_v55, 0.0  ;;  %v3514_v58 = vmul.f32 1.442695, %v3457_v13  ;;  %v3461_v17 = vmin.f32 %v8922_v50, 0.0  ;;  %v8934_v33 = vmul.f32 %v3366_v47, %v9656_v34  ;;  %v5159_v47 = vld [vmem:[%s9205_s2 + $0x20] sm:$0xff] }
 0x7e4   : > { %v3588_v27 = vsel %vm3428_vm11, %v8824_v35, %v4630_v40  ;;  %vm3405_vm13 = vcmp.gt.f32.partialorder %v8767_v61, 0.0  ;;  %vm3403_vm14 = vcmp.gt.f32.partialorder %v8750_v41, 0.0  ;;  %5146 = vpow2.f32 %v3510_v38 }
 0x7e5   : > { %v5129_v16 = vpop.eup %5128  ;;  %3838 = vrot.lane.b32.xlu0 %v3588_v27, %s5199_s18  ;;  %4883 = vmatprep.mubr.msk.f32.mxu1 %vm2836_vm10, %v3588_v27  ;;  %v3565_v39 = vsel %vm3405_vm13, %v8767_v61, %v4607_v42  ;;  %v3518_v59 = vmul.f32 1.442695, %v3459_v18  ;;  %v3563_v34 = vsel %vm3403_vm14, %v8750_v41, %v4605_v53  ;;  %5148 = vpow2.f32 %v3514_v58  ;;  %v5162_v42 = vld [vmem:[%s9205_s2 + $0x8] sm:$0xff]  ;;  %v5163_v53 = vld [vmem:[%s9205_s2] sm:$0xff] }
 0x7e6   : > { %v4632_v25 = vadd.f32 -1.0, %v5129_v16  ;;  %v5131_v35 = vpop.eup %5130  ;;  %v3522_v5 = vmul.f32 1.442695, %v3461_v17  ;;  %v3463_v22 = vmin.f32 %v8934_v33, 0.0  ;;  %vm3409_vm15 = vcmp.gt.f32.partialorder %v8821_v28, 0.0  ;;  %v5160_v16 = vld [vmem:[%s9205_s2 + $0x18] sm:$0xff] }
 0x7e7   : > { %v5133_v29 = vpop.eup %5132  ;;  %5150 = vpow2.f32 %v3518_v59  ;;  %vm3407_vm0 = vcmp.gt.f32.partialorder %v8814_v12, 0.0  ;;  %vm3413_vm1 = vcmp.gt.f32.partialorder %v8836_v63, 0.0  ;;  %vm3411_vm2 = vcmp.gt.f32.partialorder %v8849_v45, 0.0 }
 0x7e8   : > { %v3590_v10 = vsel %vm3430_vm12, %v8842_v55, %v4632_v25  ;;  %v5135_v11 = vpop.eup %5134  ;;  %v4611_v55 = vadd.f32 -1.0, %v5131_v35  ;;  %v4609_v9 = vadd.f32 -1.0, %v5133_v29  ;;  %5152 = vpow2.f32 %v3522_v5 }
 0x7e9   : > { %4246 = vrot.lane.b32.xlu0 %v3561_v51, %s5199_s18  ;;  %3840 = vrot.lane.b32.xlu1 %v3590_v10, %s5199_s18  ;;  %v5137_v37 = vpop.eup %5136  ;;  %v4615_v20 = vadd.f32 -1.0, %v5135_v11  ;;  %v3526_v2 = vmul.f32 1.442695, %v3463_v22  ;;  %vm3417_vm6 = vcmp.gt.f32.partialorder %v8863_v30, 0.0  ;;  %vm3415_vm7 = vcmp.gt.f32.partialorder %v8857_v21, 0.0 }
 0x7ea   : > { %4884 = vmatmul.mubr.msk.f32.gmra.mxu1 %vm2836_vm10, %v3590_v10  ;;  %v5139_v61 = vpop.eup %5138  ;;  %v3569_v41 = vsel %vm3409_vm15, %v8821_v28, %v4611_v55  ;;  %v3567_v15 = vsel %vm3407_vm0, %v8814_v12, %v4609_v9  ;;  %v4613_v26 = vadd.f32 -1.0, %v5137_v37  ;;  %vm3421_vm8 = vcmp.gt.f32.partialorder %v8890_v7, 0.0 }
 0x7eb   : > { %4942 = vmatprep.mubr.msk.f32.mxu1 %vm2836_vm10, %v3561_v51  ;;  %v5141_v31 = vpop.eup %5140  ;;  %v3573_v28 = vsel %vm3413_vm1, %v8836_v63, %v4615_v20  ;;  %5154 = vpow2.f32 %v3526_v2  ;;  %v4617_v57 = vadd.f32 -1.0, %v5139_v61  ;;  %vm3419_vm9 = vcmp.gt.f32.partialorder %v8885_v60, 0.0  ;;  %v5161_v51 = vld [vmem:[%s9205_s2 + $0x10] sm:$0xff] }
 0x7ec   : > { %v3571_v12 = vsel %vm3411_vm2, %v8849_v45, %v4613_v26  ;;  %v4619_v24 = vadd.f32 -1.0, %v5141_v31  ;;  %vm3425_vm3 = vcmp.gt.f32.partialorder %v8908_v49, 0.0  ;;  %vm3423_vm4 = vcmp.gt.f32.partialorder %v8903_v48, 0.0 }
 0x7ed   : > { %4250 = vrot.lane.b32.xlu0 %v3565_v39, %s5199_s18  ;;  %4248 = vrot.lane.b32.xlu1 %v3563_v34, %s5199_s18  ;;  %v3575_v54 = vsel %vm3415_vm7, %v8857_v21, %v4617_v57  ;;  %vm3429_vm5 = vcmp.gt.f32.partialorder %v8922_v50, 0.0  ;;  %vm3427_vm11 = vcmp.gt.f32.partialorder %v8917_v0, 0.0  ;;  %vm3431_vm12 = vcmp.gt.f32.partialorder %v8934_v33, 0.0 }
 0x7ee   : > { %4943 = vmatmul.mubr.msk.f32.vlgmr.msra.gmra.mxu1 %vm2836_vm10, %v3563_v34  ;;  %v5143_v3 = vpop.eup %5142  ;;  %v3577_v8 = vsel %vm3417_vm6, %v8863_v30, %v4619_v24  ;;  %vm3793_vm13 = vcmask 285696  }
 0x7ef   : > { %4945 = vmatprep.mubr.msk.f32.mxu1 %vm2836_vm10, %v3565_v39  ;;  %v5145_v1 = vpop.eup %5144  ;;  %v4621_v4 = vadd.f32 -1.0, %v5143_v3 }
 0x7f0   : > { %v4623_v45 = vadd.f32 -1.0, %v5145_v1 }
 0x7f1   : > { %4254 = vrot.lane.b32.xlu0 %v3569_v41, %s5199_s18  ;;  %4252 = vrot.lane.b32.xlu1 %v3567_v15, %s5199_s18  ;;  %v5147_v63 = vpop.eup %5146  ;;  %v3579_v21 = vsel %vm3419_vm9, %v8885_v60, %v4621_v4 }
 0x7f2   : > { %4946 = vmatmul.mubr.msk.f32.gmra.mxu1 %vm2836_vm10, %v3567_v15  ;;  %v5149_v52 = vpop.eup %5148  ;;  %v3581_v30 = vsel %vm3421_vm8, %v8890_v7, %v4623_v45  ;;  %v4625_v56 = vadd.f32 -1.0, %v5147_v63 }
 0x7f3   : > { %4948 = vmatprep.mubr.msk.f32.mxu1 %vm2836_vm10, %v3569_v41  ;;  %v4627_v36 = vadd.f32 -1.0, %v5149_v52 }
 0x7f4   : > { %v5151_v44 = vpop.eup %5150  ;;  %v3583_v7 = vsel %vm3423_vm4, %v8903_v48, %v4625_v56 }
 0x7f5   : > { %4258 = vrot.lane.b32.xlu0 %v3573_v28, %s5199_s18  ;;  %4256 = vrot.lane.b32.xlu1 %v3571_v12, %s5199_s18  ;;  %v5153_v6 = vpop.eup %5152  ;;  %v3585_v62 = vsel %vm3425_vm3, %v8908_v49, %v4627_v36  ;;  %v4629_v32 = vadd.f32 -1.0, %v5151_v44 }
 0x7f6   : > { %4949 = vmatmul.mubr.msk.f32.gmra.mxu1 %vm2836_vm10, %v3571_v12  ;;  %v4631_v60 = vadd.f32 -1.0, %v5153_v6 }
 0x7f7   : > { %4951 = vmatprep.mubr.msk.f32.mxu1 %vm2836_vm10, %v3573_v28  ;;  %v3587_v49 = vsel %vm3427_vm11, %v8917_v0, %v4629_v32  ;;  %v5157_v0 = vld [vmem:[%s9205_s2 + $0x30] sm:$0xff] }
 0x7f8   : > { %v5155_v23 = vpop.eup %5154  ;;  %v3589_v46 = vsel %vm3429_vm5, %v8922_v50, %v4631_v60  ;;  %v5158_v50 = vld [vmem:[%s9205_s2 + $0x28] sm:$0xff] }
 0x7f9   : > { %4262 = vrot.lane.b32.xlu0 %v3577_v8, %s5199_s18  ;;  %4260 = vrot.lane.b32.xlu1 %v3575_v54, %s5199_s18  ;;  %v4633_v48 = vadd.f32 -1.0, %v5155_v23 }
 0x7fa   : > { %4952 = vmatmul.mubr.msk.f32.gmra.mxu1 %vm2836_vm10, %v3575_v54 }
 0x7fb   : > { %4954 = vmatprep.mubr.msk.f32.mxu1 %vm2836_vm10, %v3577_v8  ;;  %v3591_v43 = vsel %vm3431_vm12, %v8934_v33, %v4633_v48 }
 0x7fd   : > { %4266 = vrot.lane.b32.xlu0 %v3581_v30, %s5199_s18  ;;  %4264 = vrot.lane.b32.xlu1 %v3579_v21, %s5199_s18 }
 0x7fe   : > { %4955 = vmatmul.mubr.msk.f32.gmra.mxu1 %vm2836_vm10, %v3579_v21 }
 0x7ff   : > { %4957 = vmatprep.mubr.msk.f32.mxu1 %vm2836_vm10, %v3581_v30 }
 0x801   : > { %4270 = vrot.lane.b32.xlu0 %v3585_v62, %s5199_s18  ;;  %4268 = vrot.lane.b32.xlu1 %v3583_v7, %s5199_s18 }
 0x802   : > { %4958 = vmatmul.mubr.msk.f32.gmra.mxu1 %vm2836_vm10, %v3583_v7 }
 0x803   : > { %4960 = vmatprep.mubr.msk.f32.mxu1 %vm2836_vm10, %v3585_v62 }
 0x805   : > { %4274 = vrot.lane.b32.xlu0 %v3589_v46, %s5199_s18  ;;  %4272 = vrot.lane.b32.xlu1 %v3587_v49, %s5199_s18 }
 0x806   : > { %4961 = vmatmul.mubr.msk.f32.gmra.mxu1 %vm2836_vm10, %v3587_v49 }
 0x807   : > { %4963 = vmatprep.mubr.msk.f32.mxu1 %vm2836_vm10, %v3589_v46 }
 0x809   : > { %4276 = vrot.lane.b32.xlu1 %v3591_v43, %s5199_s18  ;;  %s9675_s18 = sadd.s32 4294967295, %s5186_s11  }
 0x80a   : > { %4964 = vmatmul.mubr.msk.f32.gmra.mxu1 %vm2836_vm10, %v3591_v43  ;;  %s4545_s20 = sshll.u32 %s9675_s18, 2 }
 0x80b   : > { %p357_p8 = scmp.lt.s32.totalorder %s4545_s20, 7 }
 0x80d   : > { %s9680_s20 = smov (!%p357_p8, %s4545_s20), 7 }
 0x80e   : > { %s4749_s11 = sshll.u32 %s9680_s20, 7 }
 0x80f   : > { %s9057_s19 = scalar_lea.vmem %s9212_s9, %s4749_s11 }
 0x81f   : > { %v3811_v40 = vpop.permute.xlu0 %3810 }
 0x820   : > { %4902 = vmatprep.mubr.msk.f32.mxu0 %vm2836_vm10, %v3811_v40 }
 0x823   : > { %v3813_v19 = vpop.permute.xlu1 %3812 }
 0x824   : > { %4903 = vmatmul.mubr.msk.f32.vlgmr.msra.gmra.mxu0 %vm2836_vm10, %v3813_v19 }
 0x825   : > { %4967 = vmatpush3.msra.mxu0 %v5156_v14 }
 0x826   : > { %4968 = vmatprep.subr.mxu0 %v5157_v0 }
 0x827   : > { %v3815_v13 = vpop.permute.xlu0 %3814  ;;  %4969 = vmatpush3.msra.mxu0 %v5157_v0 }
 0x828   : > { %4905 = vmatprep.mubr.msk.f32.mxu0 %vm2836_vm10, %v3815_v13  ;;  %4970 = vmatprep.subr.mxu0 %v5158_v50 }
 0x829   : > { %4971 = vmatpush3.msra.mxu0 %v5158_v50 }
 0x82a   : > { %4972 = vmatprep.subr.mxu0 %v5159_v47 }
 0x82b   : > { %v3817_v27 = vpop.permute.xlu1 %3816  ;;  %4973 = vmatpush3.msra.mxu0 %v5159_v47 }
 0x82c   : > { %4906 = vmatmul.mubr.msk.f32.gmra.mxu0 %vm2836_vm10, %v3817_v27  ;;  %4974 = vmatprep.subr.mxu0 %v5160_v16 }
 0x82d   : > { %4975 = vmatpush3.msra.mxu0 %v5160_v16 }
 0x82e   : > { %4976 = vmatprep.subr.mxu0 %v5161_v51 }
 0x82f   : > { %v3819_v25 = vpop.permute.xlu0 %3818  ;;  %4977 = vmatpush3.msra.mxu0 %v5161_v51 }
 0x830   : > { %4908 = vmatprep.mubr.msk.f32.mxu0 %vm2836_vm10, %v3819_v25  ;;  %4978 = vmatprep.subr.mxu0 %v5162_v42 }
 0x831   : > { %4979 = vmatpush3.msra.mxu0 %v5162_v42 }
 0x832   : > { %4980 = vmatprep.subr.mxu0 %v5163_v53 }
 0x833   : > { %v3821_v38 = vpop.permute.xlu1 %3820  ;;  %4981 = vmatpush3.msra.mxu0 %v5163_v53 }
 0x834   : > { %4909 = vmatmul.mubr.msk.f32.gmra.mxu0 %vm2836_vm10, %v3821_v38 }
 0x837   : > { %v3823_v18 = vpop.permute.xlu0 %3822 }
 0x838   : > { %4911 = vmatprep.mubr.msk.f32.mxu0 %vm2836_vm10, %v3823_v18 }
 0x83b   : > { %v3825_v35 = vpop.permute.xlu1 %3824 }
 0x83c   : > { %4912 = vmatmul.mubr.msk.f32.gmra.mxu0 %vm2836_vm10, %v3825_v35 }
 0x83f   : > { %v3827_v58 = vpop.permute.xlu0 %3826 }
 0x840   : > { %4914 = vmatprep.mubr.msk.f32.mxu0 %vm2836_vm10, %v3827_v58 }
 0x843   : > { %v3829_v17 = vpop.permute.xlu1 %3828 }
 0x844   : > { %4915 = vmatmul.mubr.msk.f32.gmra.mxu0 %vm2836_vm10, %v3829_v17 }
 0x847   : > { %v3831_v33 = vpop.permute.xlu0 %3830 }
 0x848   : > { %4917 = vmatprep.mubr.msk.f32.mxu0 %vm2836_vm10, %v3831_v33 }
 0x84b   : > { %v3833_v10 = vpop.permute.xlu1 %3832 }
 0x84c   : > { %4918 = vmatmul.mubr.msk.f32.gmra.mxu0 %vm2836_vm10, %v3833_v10 }
 0x84f   : > { %v3835_v29 = vpop.permute.xlu0 %3834 }
 0x850   : > { %4920 = vmatprep.mubr.msk.f32.mxu0 %vm2836_vm10, %v3835_v29 }
 0x853   : > { %v3837_v11 = vpop.permute.xlu1 %3836 }
 0x854   : > { %4921 = vmatmul.mubr.msk.f32.gmra.mxu0 %vm2836_vm10, %v3837_v11 }
 0x857   : > { %v3839_v39 = vpop.permute.xlu0 %3838 }
 0x858   : > { %4923 = vmatprep.mubr.msk.f32.mxu0 %vm2836_vm10, %v3839_v39 }
 0x85b   : > { %v4247_v59 = vpop.permute.xlu0 %4246  ;;  %v3841_v34 = vpop.permute.xlu1 %3840 }
 0x85c   : > { %4924 = vmatmul.mubr.msk.f32.gmra.mxu0 %vm2836_vm10, %v3841_v34 }
 0x85d   : > { %4982 = vmatprep.mubr.msk.f32.mxu0 %vm2836_vm10, %v4247_v59 }
 0x85f   : > { %v4251_v55 = vpop.permute.xlu0 %4250  ;;  %v4249_v5 = vpop.permute.xlu1 %4248 }
 0x860   : > { %4983 = vmatmul.mubr.msk.f32.vlgmr.msra.gmra.mxu0 %vm2836_vm10, %v4249_v5 }
 0x861   : > { %4985 = vmatprep.mubr.msk.f32.mxu0 %vm2836_vm10, %v4251_v55 }
 0x863   : > { %v4255_v22 = vpop.permute.xlu0 %4254  ;;  %v4253_v9 = vpop.permute.xlu1 %4252 }
 0x864   : > { %4986 = vmatmul.mubr.msk.f32.gmra.mxu0 %vm2836_vm10, %v4253_v9 }
 0x865   : > { %4988 = vmatprep.mubr.msk.f32.mxu0 %vm2836_vm10, %v4255_v22 }
 0x867   : > { %v4259_v37 = vpop.permute.xlu0 %4258  ;;  %v4257_v61 = vpop.permute.xlu1 %4256 }
 0x868   : > { %4989 = vmatmul.mubr.msk.f32.gmra.mxu0 %vm2836_vm10, %v4257_v61 }
 0x869   : > { %4991 = vmatprep.mubr.msk.f32.mxu0 %vm2836_vm10, %v4259_v37 }
 0x86b   : > { %v4263_v31 = vpop.permute.xlu0 %4262  ;;  %v4261_v41 = vpop.permute.xlu1 %4260 }
 0x86c   : > { %4992 = vmatmul.mubr.msk.f32.gmra.mxu0 %vm2836_vm10, %v4261_v41 }
 0x86d   : > { %4994 = vmatprep.mubr.msk.f32.mxu0 %vm2836_vm10, %v4263_v31 }
 0x86f   : > { %v4267_v20 = vpop.permute.xlu0 %4266  ;;  %v4265_v2 = vpop.permute.xlu1 %4264 }
 0x870   : > { %4995 = vmatmul.mubr.msk.f32.gmra.mxu0 %vm2836_vm10, %v4265_v2 }
 0x871   : > { %4997 = vmatprep.mubr.msk.f32.mxu0 %vm2836_vm10, %v4267_v20  ;;  %v4864_v15 = vpop.f32.mrf.mxu1 }
 0x872   : > { %3795 = vst.msk [vmem:[%s9057_s19 + $0x8] sm:$0xff] %vm3793_vm13, %v4864_v15 }
 0x873   : > { %v4271_v26 = vpop.permute.xlu0 %4270  ;;  %v4269_v3 = vpop.permute.xlu1 %4268 }
 0x874   : > { %v3714_v28 = vpop.f32.mrf.mxu1  ;;  %4998 = vmatmul.mubr.msk.f32.gmra.mxu0 %vm2836_vm10, %v4269_v3 }
 0x875   : > { %3794 = vst.msk [vmem:[%s9057_s19] sm:$0xff] %vm3793_vm13, %v3714_v28  ;;  %5000 = vmatprep.mubr.msk.f32.mxu0 %vm2836_vm10, %v4271_v26 }
 0x877   : > { %v4275_v1 = vpop.permute.xlu0 %4274  ;;  %v4273_v12 = vpop.permute.xlu1 %4272 }
 0x878   : > { %5001 = vmatmul.mubr.msk.f32.gmra.mxu0 %vm2836_vm10, %v4273_v12 }
 0x879   : > { %5003 = vmatprep.mubr.msk.f32.mxu0 %vm2836_vm10, %v4275_v1  ;;  %v4867_v24 = vpop.f32.mrf.mxu1 }
 0x87a   : > { %3797 = vst.msk [vmem:[%s9057_s19 + $0x18] sm:$0xff] %vm3793_vm13, %v4867_v24 }
 0x87b   : > { %v4277_v57 = vpop.permute.xlu1 %4276  ;;  %v3724_v63 = vpop.f32.mrf.mxu1 }
 0x87c   : > { %5004 = vmatmul.mubr.msk.f32.gmra.mxu0 %vm2836_vm10, %v4277_v57  ;;  %3796 = vst.msk [vmem:[%s9057_s19 + $0x10] sm:$0xff] %vm3793_vm13, %v3724_v63 }
 0x881   : > { %v4870_v8 = vpop.f32.mrf.mxu1 }
 0x882   : > { %3799 = vst.msk [vmem:[%s9057_s19 + $0x28] sm:$0xff] %vm3793_vm13, %v4870_v8 }
 0x883   : > { %v3734_v54 = vpop.f32.mrf.mxu1 }
 0x884   : > { %3798 = vst.msk [vmem:[%s9057_s19 + $0x20] sm:$0xff] %vm3793_vm13, %v3734_v54 }
 0x889   : > { %v4873_v45 = vpop.f32.mrf.mxu1 }
 0x88a   : > { %3801 = vst.msk [vmem:[%s9057_s19 + $0x38] sm:$0xff] %vm3793_vm13, %v4873_v45 }
 0x88b   : > { %v3744_v4 = vpop.f32.mrf.mxu1 }
 0x88c   : > { %3800 = vst.msk [vmem:[%s9057_s19 + $0x30] sm:$0xff] %vm3793_vm13, %v3744_v4 }
 0x891   : > { %v4876_v52 = vpop.f32.mrf.mxu1 }
 0x892   : > { %3803 = vst.msk [vmem:[%s9057_s19 + $0x48] sm:$0xff] %vm3793_vm13, %v4876_v52 }
 0x893   : > { %v3754_v44 = vpop.f32.mrf.mxu1 }
 0x894   : > { %3802 = vst.msk [vmem:[%s9057_s19 + $0x40] sm:$0xff] %vm3793_vm13, %v3754_v44 }
 0x899   : > { %v4879_v30 = vpop.f32.mrf.mxu1 }
 0x89a   : > { %3805 = vst.msk [vmem:[%s9057_s19 + $0x58] sm:$0xff] %vm3793_vm13, %v4879_v30 }
 0x89b   : > { %v3764_v21 = vpop.f32.mrf.mxu1 }
 0x89c   : > { %3804 = vst.msk [vmem:[%s9057_s19 + $0x50] sm:$0xff] %vm3793_vm13, %v3764_v21 }
 0x8a1   : > { %v4882_v36 = vpop.f32.mrf.mxu1 }
 0x8a2   : > { %3807 = vst.msk [vmem:[%s9057_s19 + $0x68] sm:$0xff] %vm3793_vm13, %v4882_v36 }
 0x8a3   : > { %v3774_v56 = vpop.f32.mrf.mxu1 }
 0x8a4   : > { %3806 = vst.msk [vmem:[%s9057_s19 + $0x60] sm:$0xff] %vm3793_vm13, %v3774_v56 }
 0x8aa   : > { %v4885_v6 = vpop.f32.mrf.mxu1 }
 0x8ab   : > { %3809 = vst.msk [vmem:[%s9057_s19 + $0x78] sm:$0xff] %vm3793_vm13, %v4885_v6 }
 0x8ac   : > { %v3784_v62 = vpop.f32.mrf.mxu1 }
 0x8ad   : > { %3808 = vst.msk [vmem:[%s9057_s19 + $0x70] sm:$0xff] %vm3793_vm13, %v3784_v62 }
 0x8ae   : > { %v4944_v7 = vpop.f32.mrf.mxu1 }
 0x8af   : > { %4699 = vst.msk [vmem:[%s9057_s19 + $0x108] sm:$0xff] %vm3793_vm13, %v4944_v7 }
 0x8b0   : > { %v4150_v32 = vpop.f32.mrf.mxu1 }
 0x8b1   : > { %4698 = vst.msk [vmem:[%s9057_s19 + $0x100] sm:$0xff] %vm3793_vm13, %v4150_v32 }
 0x8b2   : > { %v4947_v46 = vpop.f32.mrf.mxu1 }
 0x8b3   : > { %4701 = vst.msk [vmem:[%s9057_s19 + $0x118] sm:$0xff] %vm3793_vm13, %v4947_v46 }
 0x8b4   : > { %v4160_v48 = vpop.f32.mrf.mxu1 }
 0x8b5   : > { %4700 = vst.msk [vmem:[%s9057_s19 + $0x110] sm:$0xff] %vm3793_vm13, %v4160_v48 }
 0x8b6   : > { %v4950_v40 = vpop.f32.mrf.mxu1 }
 0x8b7   : > { %4703 = vst.msk [vmem:[%s9057_s19 + $0x128] sm:$0xff] %vm3793_vm13, %v4950_v40 }
 0x8b8   : > { %v4170_v14 = vpop.f32.mrf.mxu1 }
 0x8b9   : > { %4702 = vst.msk [vmem:[%s9057_s19 + $0x120] sm:$0xff] %vm3793_vm13, %v4170_v14 }
 0x8ba   : > { %v4953_v13 = vpop.f32.mrf.mxu1 }
 0x8bb   : > { %4705 = vst.msk [vmem:[%s9057_s19 + $0x138] sm:$0xff] %vm3793_vm13, %v4953_v13 }
 0x8bc   : > { %v4180_v47 = vpop.f32.mrf.mxu1 }
 0x8bd   : > { %4704 = vst.msk [vmem:[%s9057_s19 + $0x130] sm:$0xff] %vm3793_vm13, %v4180_v47 }
 0x8be   : > { %v4956_v16 = vpop.f32.mrf.mxu1 }
 0x8bf   : > { %4707 = vst.msk [vmem:[%s9057_s19 + $0x148] sm:$0xff] %vm3793_vm13, %v4956_v16 }
 0x8c0   : > { %v4190_v25 = vpop.f32.mrf.mxu1 }
 0x8c1   : > { %4706 = vst.msk [vmem:[%s9057_s19 + $0x140] sm:$0xff] %vm3793_vm13, %v4190_v25 }
 0x8c2   : > { %v4959_v53 = vpop.f32.mrf.mxu1 }
 0x8c3   : > { %4709 = vst.msk [vmem:[%s9057_s19 + $0x158] sm:$0xff] %vm3793_vm13, %v4959_v53 }
 0x8c4   : > { %v4200_v35 = vpop.f32.mrf.mxu1 }
 0x8c5   : > { %4708 = vst.msk [vmem:[%s9057_s19 + $0x150] sm:$0xff] %vm3793_vm13, %v4200_v35 }
 0x8c6   : > { %v4962_v58 = vpop.f32.mrf.mxu1 }
 0x8c7   : > { %4711 = vst.msk [vmem:[%s9057_s19 + $0x168] sm:$0xff] %vm3793_vm13, %v4962_v58 }
 0x8c8   : > { %v4210_v10 = vpop.f32.mrf.mxu1 }
 0x8c9   : > { %4710 = vst.msk [vmem:[%s9057_s19 + $0x160] sm:$0xff] %vm3793_vm13, %v4210_v10 }
 0x8ca   : > { %v4965_v29 = vpop.f32.mrf.mxu1 }
 0x8cb   : > { %4713 = vst.msk [vmem:[%s9057_s19 + $0x178] sm:$0xff] %vm3793_vm13, %v4965_v29 }
 0x8cc   : > { %v4220_v59 = vpop.f32.mrf.mxu1 }
 0x8cd   : > { %4712 = vst.msk [vmem:[%s9057_s19 + $0x170] sm:$0xff] %vm3793_vm13, %v4220_v59 }
 0x8e4   : > { %v4904_v60 = vpop.f32.mrf.mxu0 }
 0x8e5   : > { %4667 = vst.msk [vmem:[%s9057_s19 + $0x88] sm:$0xff] %vm3793_vm13, %v4904_v60 }
 0x8e6   : > { %v3940_v23 = vpop.f32.mrf.mxu0 }
 0x8e7   : > { %4666 = vst.msk [vmem:[%s9057_s19 + $0x80] sm:$0xff] %vm3793_vm13, %v3940_v23 }
 0x8ec   : > { %v4907_v49 = vpop.f32.mrf.mxu0 }
 0x8ed   : > { %4669 = vst.msk [vmem:[%s9057_s19 + $0x98] sm:$0xff] %vm3793_vm13, %v4907_v49 }
 0x8ee   : > { %v3950_v43 = vpop.f32.mrf.mxu0 }
 0x8ef   : > { %4668 = vst.msk [vmem:[%s9057_s19 + $0x90] sm:$0xff] %vm3793_vm13, %v3950_v43 }
 0x8f4   : > { %v4910_v19 = vpop.f32.mrf.mxu0 }
 0x8f5   : > { %4671 = vst.msk [vmem:[%s9057_s19 + $0xa8] sm:$0xff] %vm3793_vm13, %v4910_v19 }
 0x8f6   : > { %v3960_v0 = vpop.f32.mrf.mxu0 }
 0x8f7   : > { %4670 = vst.msk [vmem:[%s9057_s19 + $0xa0] sm:$0xff] %vm3793_vm13, %v3960_v0 }
 0x8fc   : > { %v4913_v50 = vpop.f32.mrf.mxu0 }
 0x8fd   : > { %4673 = vst.msk [vmem:[%s9057_s19 + $0xb8] sm:$0xff] %vm3793_vm13, %v4913_v50 }
 0x8fe   : > { %v3970_v27 = vpop.f32.mrf.mxu0 }
 0x8ff   : > { %4672 = vst.msk [vmem:[%s9057_s19 + $0xb0] sm:$0xff] %vm3793_vm13, %v3970_v27 }
 0x904   : > { %v4916_v51 = vpop.f32.mrf.mxu0 }
 0x905   : > { %4675 = vst.msk [vmem:[%s9057_s19 + $0xc8] sm:$0xff] %vm3793_vm13, %v4916_v51 }
 0x906   : > { %v3980_v42 = vpop.f32.mrf.mxu0 }
 0x907   : > { %4674 = vst.msk [vmem:[%s9057_s19 + $0xc0] sm:$0xff] %vm3793_vm13, %v3980_v42 }
 0x90c   : > { %v4919_v38 = vpop.f32.mrf.mxu0 }
 0x90d   : > { %4677 = vst.msk [vmem:[%s9057_s19 + $0xd8] sm:$0xff] %vm3793_vm13, %v4919_v38 }
 0x90e   : > { %v3990_v18 = vpop.f32.mrf.mxu0 }
 0x90f   : > { %4676 = vst.msk [vmem:[%s9057_s19 + $0xd0] sm:$0xff] %vm3793_vm13, %v3990_v18 }
 0x914   : > { %v4922_v17 = vpop.f32.mrf.mxu0 }
 0x915   : > { %4679 = vst.msk [vmem:[%s9057_s19 + $0xe8] sm:$0xff] %vm3793_vm13, %v4922_v17 }
 0x916   : > { %v4000_v33 = vpop.f32.mrf.mxu0 }
 0x917   : > { %4678 = vst.msk [vmem:[%s9057_s19 + $0xe0] sm:$0xff] %vm3793_vm13, %v4000_v33 }
 0x91c   : > { %v4925_v11 = vpop.f32.mrf.mxu0 }
 0x91d   : > { %4681 = vst.msk [vmem:[%s9057_s19 + $0xf8] sm:$0xff] %vm3793_vm13, %v4925_v11 }
 0x91e   : > { %v4010_v39 = vpop.f32.mrf.mxu0 }
 0x91f   : > { %4680 = vst.msk [vmem:[%s9057_s19 + $0xf0] sm:$0xff] %vm3793_vm13, %v4010_v39 }
 0x920   : > { %v4984_v34 = vpop.f32.mrf.mxu0 }
 0x921   : > { %4731 = vst.msk [vmem:[%s9057_s19 + $0x188] sm:$0xff] %vm3793_vm13, %v4984_v34 }
 0x922   : > { %v4376_v55 = vpop.f32.mrf.mxu0 }
 0x923   : > { %4730 = vst.msk [vmem:[%s9057_s19 + $0x180] sm:$0xff] %vm3793_vm13, %v4376_v55 }
 0x924   : > { %v4987_v5 = vpop.f32.mrf.mxu0 }
 0x925   : > { %4733 = vst.msk [vmem:[%s9057_s19 + $0x198] sm:$0xff] %vm3793_vm13, %v4987_v5 }
 0x926   : > { %v4386_v22 = vpop.f32.mrf.mxu0 }
 0x927   : > { %4732 = vst.msk [vmem:[%s9057_s19 + $0x190] sm:$0xff] %vm3793_vm13, %v4386_v22 }
 0x928   : > { %v4990_v9 = vpop.f32.mrf.mxu0 }
 0x929   : > { %4735 = vst.msk [vmem:[%s9057_s19 + $0x1a8] sm:$0xff] %vm3793_vm13, %v4990_v9 }
 0x92a   : > { %v4396_v37 = vpop.f32.mrf.mxu0 }
 0x92b   : > { %4734 = vst.msk [vmem:[%s9057_s19 + $0x1a0] sm:$0xff] %vm3793_vm13, %v4396_v37 }
 0x92c   : > { %v4993_v61 = vpop.f32.mrf.mxu0 }
 0x92d   : > { %4737 = vst.msk [vmem:[%s9057_s19 + $0x1b8] sm:$0xff] %vm3793_vm13, %v4993_v61 }
 0x92e   : > { %v4406_v31 = vpop.f32.mrf.mxu0 }
 0x92f   : > { %4736 = vst.msk [vmem:[%s9057_s19 + $0x1b0] sm:$0xff] %vm3793_vm13, %v4406_v31 }
 0x930   : > { %v4996_v41 = vpop.f32.mrf.mxu0 }
 0x931   : > { %4739 = vst.msk [vmem:[%s9057_s19 + $0x1c8] sm:$0xff] %vm3793_vm13, %v4996_v41 }
 0x932   : > { %v4416_v20 = vpop.f32.mrf.mxu0 }
 0x933   : > { %4738 = vst.msk [vmem:[%s9057_s19 + $0x1c0] sm:$0xff] %vm3793_vm13, %v4416_v20 }
 0x934   : > { %v4999_v2 = vpop.f32.mrf.mxu0 }
 0x935   : > { %4741 = vst.msk [vmem:[%s9057_s19 + $0x1d8] sm:$0xff] %vm3793_vm13, %v4999_v2 }
 0x936   : > { %v4426_v15 = vpop.f32.mrf.mxu0 }
 0x937   : > { %4740 = vst.msk [vmem:[%s9057_s19 + $0x1d0] sm:$0xff] %vm3793_vm13, %v4426_v15 }
 0x938   : > { %v5002_v26 = vpop.f32.mrf.mxu0 }
 0x939   : > { %4743 = vst.msk [vmem:[%s9057_s19 + $0x1e8] sm:$0xff] %vm3793_vm13, %v5002_v26 }
 0x93a   : > { %v4436_v3 = vpop.f32.mrf.mxu0 }
 0x93b   : > { %4742 = vst.msk [vmem:[%s9057_s19 + $0x1e0] sm:$0xff] %vm3793_vm13, %v4436_v3 }
 0x93c   : > { %v5005_v28 = vpop.f32.mrf.mxu0 }
 0x93d   : > { %4745 = vst.msk [vmem:[%s9057_s19 + $0x1f8] sm:$0xff] %vm3793_vm13, %v5005_v28 }
 0x93e   : > { %v4446_v1 = vpop.f32.mrf.mxu0 }
 0x93f   : > { %4744 = vst.msk [vmem:[%s9057_s19 + $0x1f0] sm:$0xff] %vm3793_vm13, %v4446_v1 }
 0x940 PF: > { %p16_p9 = scmp.ge.s32.totalorder %s5267_s13, 4   ;;  %s9676_s30 = smov %s5182_s10 }
 0x941   : > { %s9677_s10 = smov %s5276_s16  ;;  %s9678_s11 = smov %s5267_s13 }
 0x942   :  { %18 = sbr.rel (!%p16_p9) target bundleno = 2 (0x2), region = 117 }

</bundles_post_ra>
